<compile_context>
chip_gen: v7x
topology: tpu7x:2x2x1
jax: 0.10.0
libtpu: 0.0.40
codegen_flags: <defaults>
</compile_context>

<pallas_src>
import numpy as np
import jax
import jax.numpy as jnp
from jax.experimental import pallas as pl
from jax.experimental.pallas import tpu as pltpu

# ----- synthetic config (mirrors the script's derivation) -----
NDIMS_A = 3                    # sys.argv[1] in the original script
NDIMS_B = 5
D = NDIMS_A + NDIMS_B          # data.shape[1] = 8
WIDTH = int(D * 1.1 + 20)      # = 28
HIDDEN = 25

N_IA = 7                       # Linear(B,width), Linear(width,25), 5x Linear(25,25)
N_H = 6                        # Linear(A+25,25), 5x Linear(25,25)
LANE = 128                     # pad fan_in / fan_out up to full vreg tiles


def _round_up(x, m):
    return (x + m - 1) // m * m


# ------------------------------------------------------------------ kernel ----
def make_nre_kernel(compute_dtype):
    def nre_kernel(x_ref, wfirst_ref, ia_w_ref, ia_b_ref, h_w_ref, h_b_ref,
                   fcn_w_ref, fcn_b_ref, out_ref):
        # x_ref: (D, T) f32 — features on sublanes, batch on lanes.
        x = x_ref[...]

        # Fused first MXU pass: rows 0:128 = ia layer 0 (B columns only, zero cols
        # elsewhere), rows 128:256 = A-column part of hidden layer 0.
        h2 = jnp.dot(wfirst_ref[...], x, preferred_element_type=jnp.float32)  # (256, T)
        acc = h2[:LANE, :]
        h_a = h2[LANE:, :]

        # --- "ia" tower (operates purely on the transformed/B block).
        xb = jnp.maximum(acc + ia_b_ref[0], 0.0).astype(compute_dtype)        # (128, T)
        for l in range(1, N_IA):
            acc = jnp.dot(ia_w_ref[l - 1], xb, preferred_element_type=jnp.float32)
            xb = jnp.maximum(acc + ia_b_ref[l], 0.0).astype(compute_dtype)

        # --- hidden layer 0 on concat([x_A, xb]) as a split matmul (A-part came from
        #     the fused first dot, B-part uses h_w[0]).
        acc = h_a + jnp.dot(h_w_ref[0], xb, preferred_element_type=jnp.float32)
        h = jnp.maximum(acc + h_b_ref[0], 0.0).astype(compute_dtype)
        for l in range(1, N_H):
            acc = jnp.dot(h_w_ref[l], h, preferred_element_type=jnp.float32)
            h = jnp.maximum(acc + h_b_ref[l], 0.0).astype(compute_dtype)

        # --- final Linear(25, 1): VPU multiply + cross-sublane reduce (no N=1 MXU pass).
        col = jnp.sum(h.astype(jnp.float32) * fcn_w_ref[...], axis=0, keepdims=True)
        out_ref[...] = col + fcn_b_ref[0, 0]                                   # (1, T)
    return nre_kernel


# ------------------------------------------------------------- param packing ----
def init_linear(key, fan_in, fan_out):
    """Deterministic PyTorch-style init; weight returned as (in, out)."""
    kw, kb = jax.random.split(key)
    bound = 1.0 / float(np.sqrt(fan_in))
    w = jax.random.uniform(kw, (fan_in, fan_out), jnp.float32, -bound, bound)
    b = jax.random.uniform(kb, (1, fan_out), jnp.float32, -bound, bound)
    return w, b


def build_params(key):
    ia_dims = [(NDIMS_B, WIDTH), (WIDTH, HIDDEN)] + [(HIDDEN, HIDDEN)] * 5
    h_dims = [(NDIMS_A + HIDDEN, HIDDEN)] + [(HIDDEN, HIDDEN)] * 5
    keys = jax.random.split(key, N_IA + N_H + 1)
    ia_w, ia_b, h_w, h_b = [], [], [], []
    for i, (fi, fo) in enumerate(ia_dims):
        w, b = init_linear(keys[i], fi, fo)
        ia_w.append(w); ia_b.append(b)
    for i, (fi, fo) in enumerate(h_dims):
        w, b = init_linear(keys[N_IA + i], fi, fo)
        h_w.append(w); h_b.append(b)
    fcn_w, fcn_b = init_linear(keys[-1], HIDDEN, 1)
    return ia_w, ia_b, h_w, h_b, fcn_w, fcn_b


def pack_params(params, compute_dtype=jnp.bfloat16):
    """Pack the 31 parameters into 7 stacked, zero-padded device arrays.

    Call ONCE and reuse — this is hoisted out of the per-call forward path.
    Weights are stored transposed to (out, in) because the kernel uses the
    weights-as-LHS (batch-along-lanes) formulation: y^T = W @ x^T.
    """
    ia_w, ia_b, h_w, h_b, fcn_w, fcn_b = params

    wfirst = jnp.zeros((2 * LANE, D), jnp.float32)
    wfirst = wfirst.at[:WIDTH, NDIMS_A:].set(ia_w[0].T)                    # ia layer 0 (B cols)
    wfirst = wfirst.at[LANE:LANE + HIDDEN, :NDIMS_A].set(h_w[0].T[:, :NDIMS_A])  # hidden-0 A-part

    ia_w_stack = jnp.zeros((N_IA - 1, LANE, LANE), jnp.float32)
    for l in range(1, N_IA):
        wt = ia_w[l].T
        ia_w_stack = ia_w_stack.at[l - 1, :wt.shape[0], :wt.shape[1]].set(wt)

    ia_b_stack = jnp.zeros((N_IA, LANE, 1), jnp.float32)
    for l in range(N_IA):
        b = ia_b[l].reshape(-1)
        ia_b_stack = ia_b_stack.at[l, :b.shape[0], 0].set(b)

    h_w_stack = jnp.zeros((N_H, LANE, LANE), jnp.float32)
    h_w_stack = h_w_stack.at[0, :HIDDEN, :HIDDEN].set(h_w[0].T[:, NDIMS_A:])     # hidden-0 B-part
    for l in range(1, N_H):
        wt = h_w[l].T
        h_w_stack = h_w_stack.at[l, :wt.shape[0], :wt.shape[1]].set(wt)

    h_b_stack = jnp.zeros((N_H, LANE, 1), jnp.float32)
    for l in range(N_H):
        b = h_b[l].reshape(-1)
        h_b_stack = h_b_stack.at[l, :b.shape[0], 0].set(b)

    fcn_col = jnp.zeros((LANE, 1), jnp.float32).at[:HIDDEN, 0].set(fcn_w.reshape(-1))
    fcn_scalar = jnp.asarray(fcn_b, jnp.float32).reshape(1, 1)

    return (wfirst,                                  # tiny first-layer weights: f32
            ia_w_stack.astype(compute_dtype),        # big stacks: compute dtype (MXU)
            ia_b_stack,                              # biases stay f32 (VPU math)
            h_w_stack.astype(compute_dtype),
            h_b_stack,
            fcn_col,
            fcn_scalar)


# ----------------------------------------------------------------- wrapper ----
def nre_forward(x, packed, *, tile_b=2048):
    """Forward pass. `packed` comes from pack_params() (pack once, reuse)."""
    n = x.shape[0]
    compute_dtype = packed[1].dtype

    # Batch tile: multiple of 128 (batch sits on lanes in the kernel).
    tile = max(LANE, (int(tile_b) // LANE) * LANE)
    n_pad = _round_up(max(n, 1), tile)

    # Feature-major ("batch along lanes") input slab; padded columns are zero.
    xt = jnp.zeros((D, n_pad), jnp.float32).at[:, :n].set(x.astype(jnp.float32).T)

    grid = (n_pad // tile,)
    const2 = lambda i: (0, 0)
    const3 = lambda i: (0, 0, 0)

    out = pl.pallas_call(
        make_nre_kernel(compute_dtype),
        out_shape=jax.ShapeDtypeStruct((1, n_pad), jnp.float32),
        grid_spec=pltpu.PrefetchScalarGridSpec(
            num_scalar_prefetch=0,
            grid=grid,
            in_specs=[
                pl.BlockSpec((D, tile), lambda i: (0, i)),          # x^T: tiled along lanes
                pl.BlockSpec((2 * LANE, D), const2),                # fused first-layer weights
                pl.BlockSpec((N_IA - 1, LANE, LANE), const3),       # constant index maps ->
                pl.BlockSpec((N_IA, LANE, 1), const3),              #   DMA'd once,
                pl.BlockSpec((N_H, LANE, LANE), const3),            #   VMEM-resident
                pl.BlockSpec((N_H, LANE, 1), const3),
                pl.BlockSpec((LANE, 1), const2),
                pl.BlockSpec(memory_space=pltpu.MemorySpace.SMEM),  # fcn bias scalar
            ],
            out_specs=pl.BlockSpec((1, tile), lambda i: (0, i)),    # lane-dense output slab
        ),
        compiler_params=pltpu.CompilerParams(
            dimension_semantics=("parallel",),       # v7x megacore: tiles split across TCs
            vmem_limit_bytes=32 * 1024 * 1024,       # headroom for tile_b up to ~4096
        ),
    )(xt, *packed)

    return out[0, :n].reshape(n, 1)


# --------------------------------------------------------------- reference ----
def nre_reference(x, params):
    """Pure-JAX reference, written exactly as the PyTorch forward (concat/slice loop)."""
    ia_w, ia_b, h_w, h_b, fcn_w, fcn_b = params
    for w, b in zip(ia_w, ia_b):
        x = jnp.concatenate(
            [x[..., :NDIMS_A], jnp.maximum(x[..., NDIMS_A:] @ w + b, 0.0)], axis=1)
    for w, b in zip(h_w, h_b):
        x = jnp.maximum(x @ w + b, 0.0)
    return x @ fcn_w + fcn_b


if __name__ == "__main__":
    key = jax.random.PRNGKey(0)
    kx, kp = jax.random.split(key)
    params = build_params(kp)

    # Pack once (hoisted out of the forward); reuse across every call below.
    packed_f32 = pack_params(params, jnp.float32)
    packed_bf16 = pack_params(params, jnp.bfloat16)   # default / fast path

    # Multi-tile grid test (batch=300, tile=128 -> padded to 384, grid of 3 steps).
    BATCH = 300
    x = jax.random.normal(kx, (BATCH, D), dtype=jnp.float32)
    ref = jax.block_until_ready(nre_reference(x, params))

    out = jax.block_until_ready(nre_forward(x, packed_f32, tile_b=128))
    assert out.shape == (BATCH, 1)
    np.testing.assert_allclose(np.asarray(out), np.asarray(ref), rtol=1e-4, atol=1e-4)

    # Ragged batch (not a tile multiple) exercises the pad + slice path.
    out_odd = jax.block_until_ready(nre_forward(x[:13], packed_f32))
    np.testing.assert_allclose(np.asarray(out_odd), np.asarray(ref[:13]),
                               rtol=1e-4, atol=1e-4)

    # Default bf16 weights/activations on the MXU (f32 accumulate / bias / ReLU).
    # bf16 activations compound over 13 layers, hence the loose tolerance.
    out_bf16 = jax.block_until_ready(nre_forward(x, packed_bf16, tile_b=256))
    assert out_bf16.shape == (BATCH, 1)
    assert np.all(np.isfinite(np.asarray(out_bf16)))
    np.testing.assert_allclose(np.asarray(out_bf16), np.asarray(ref), rtol=1e-1, atol=1e-1)

    print("KERNEL_OK")
</pallas_src>

<mosaic_0001>
module attributes {stable_mosaic.version = 11 : i64} {
  func.func @nre_kernel(%arg0: i32, %arg1: memref<8x128xf32, #tpu.memory_space<vmem>>, %arg2: memref<256x8xf32, #tpu.memory_space<vmem>>, %arg3: memref<6x128x128xf32, #tpu.memory_space<vmem>>, %arg4: memref<7x128x1xf32, #tpu.memory_space<vmem>>, %arg5: memref<6x128x128xf32, #tpu.memory_space<vmem>>, %arg6: memref<6x128x1xf32, #tpu.memory_space<vmem>>, %arg7: memref<128x1xf32, #tpu.memory_space<vmem>>, %arg8: memref<1x1xf32, #tpu.memory_space<smem>>, %arg9: memref<1x128xf32, #tpu.memory_space<vmem>>) attributes {dimension_semantics = [#tpu.dimension_semantics<parallel>], iteration_bounds = array<i64: 3>, scalar_prefetch = 0 : i64, scratch_operands = 0 : i64, tpu.core_type = #tpu.core_type<tc>, window_params = [{transform_indices = @transform_0, window_bounds = array<i64: 8, 128>}, {pipeline_mode = #tpu.pipeline_mode<synchronous>, transform_indices = @transform_1, window_bounds = array<i64: 256, 8>}, {pipeline_mode = #tpu.pipeline_mode<synchronous>, transform_indices = @transform_2, window_bounds = array<i64: 6, 128, 128>}, {pipeline_mode = #tpu.pipeline_mode<synchronous>, transform_indices = @transform_3, window_bounds = array<i64: 7, 128, 1>}, {pipeline_mode = #tpu.pipeline_mode<synchronous>, transform_indices = @transform_4, window_bounds = array<i64: 6, 128, 128>}, {pipeline_mode = #tpu.pipeline_mode<synchronous>, transform_indices = @transform_5, window_bounds = array<i64: 6, 128, 1>}, {pipeline_mode = #tpu.pipeline_mode<synchronous>, transform_indices = @transform_6, window_bounds = array<i64: 128, 1>}, {transform_indices = @transform_7, window_bounds = array<i64: 1, 1>}, {transform_indices = @transform_8, window_bounds = array<i64: 1, 128>}]} {
    %c0 = arith.constant 0 : index
    %c0_0 = arith.constant 0 : index
    %0 = vector.load %arg1[%c0, %c0_0] : memref<8x128xf32, #tpu.memory_space<vmem>>, vector<8x128xf32>
    %c0_1 = arith.constant 0 : index
    %c0_2 = arith.constant 0 : index
    %1 = vector.load %arg2[%c0_1, %c0_2] : memref<256x8xf32, #tpu.memory_space<vmem>>, vector<256x8xf32>
    %cst = arith.constant dense<0.000000e+00> : vector<256x128xf32>
    %2 = tpu.matmul %1, %0, %cst {dimension_numbers = #tpu.dot_dimension_numbers<[1], [0], [0], [1], [0, 0, 1, 1], [], []>} : vector<256x8xf32>, vector<8x128xf32>, vector<256x128xf32> -> vector<256x128xf32>
    %3 = vector.extract_strided_slice %2 {offsets = [0, 0], sizes = [128, 128], strides = [1, 1]} : vector<256x128xf32> to vector<128x128xf32>
    %4 = vector.extract_strided_slice %2 {offsets = [128, 0], sizes = [128, 128], strides = [1, 1]} : vector<256x128xf32> to vector<128x128xf32>
    %c0_3 = arith.constant 0 : index
    %c0_4 = arith.constant 0 : index
    %c0_5 = arith.constant 0 : index
    %5 = vector.load %arg4[%c0_3, %c0_4, %c0_5] : memref<7x128x1xf32, #tpu.memory_space<vmem>>, vector<1x128x1xf32>
    %6 = vector.shape_cast %5 : vector<1x128x1xf32> to vector<128x1xf32>
    %7 = vector.broadcast %6 : vector<128x1xf32> to vector<128x128xf32>
    %8 = arith.addf %3, %7 : vector<128x128xf32>
    %cst_6 = arith.constant 0.000000e+00 : f32
    %9 = vector.broadcast %cst_6 : f32 to vector<128x128xf32>
    %10 = arith.maximumf %8, %9 : vector<128x128xf32>
    %c0_7 = arith.constant 0 : index
    %c0_8 = arith.constant 0 : index
    %c0_9 = arith.constant 0 : index
    %11 = vector.load %arg3[%c0_7, %c0_8, %c0_9] : memref<6x128x128xf32, #tpu.memory_space<vmem>>, vector<1x128x128xf32>
    %12 = vector.shape_cast %11 : vector<1x128x128xf32> to vector<128x128xf32>
    %cst_10 = arith.constant dense<0.000000e+00> : vector<128x128xf32>
    %13 = tpu.matmul %12, %10, %cst_10 {dimension_numbers = #tpu.dot_dimension_numbers<[1], [0], [0], [1], [0, 0, 1, 1], [], []>} : vector<128x128xf32>, vector<128x128xf32>, vector<128x128xf32> -> vector<128x128xf32>
    %c1 = arith.constant 1 : index
    %c0_11 = arith.constant 0 : index
    %c0_12 = arith.constant 0 : index
    %14 = vector.load %arg4[%c1, %c0_11, %c0_12] : memref<7x128x1xf32, #tpu.memory_space<vmem>>, vector<1x128x1xf32>
    %15 = vector.shape_cast %14 : vector<1x128x1xf32> to vector<128x1xf32>
    %16 = vector.broadcast %15 : vector<128x1xf32> to vector<128x128xf32>
    %17 = arith.addf %13, %16 : vector<128x128xf32>
    %cst_13 = arith.constant 0.000000e+00 : f32
    %18 = vector.broadcast %cst_13 : f32 to vector<128x128xf32>
    %19 = arith.maximumf %17, %18 : vector<128x128xf32>
    %c1_14 = arith.constant 1 : index
    %c0_15 = arith.constant 0 : index
    %c0_16 = arith.constant 0 : index
    %20 = vector.load %arg3[%c1_14, %c0_15, %c0_16] : memref<6x128x128xf32, #tpu.memory_space<vmem>>, vector<1x128x128xf32>
    %21 = vector.shape_cast %20 : vector<1x128x128xf32> to vector<128x128xf32>
    %cst_17 = arith.constant dense<0.000000e+00> : vector<128x128xf32>
    %22 = tpu.matmul %21, %19, %cst_17 {dimension_numbers = #tpu.dot_dimension_numbers<[1], [0], [0], [1], [0, 0, 1, 1], [], []>} : vector<128x128xf32>, vector<128x128xf32>, vector<128x128xf32> -> vector<128x128xf32>
    %c2 = arith.constant 2 : index
    %c0_18 = arith.constant 0 : index
    %c0_19 = arith.constant 0 : index
    %23 = vector.load %arg4[%c2, %c0_18, %c0_19] : memref<7x128x1xf32, #tpu.memory_space<vmem>>, vector<1x128x1xf32>
    %24 = vector.shape_cast %23 : vector<1x128x1xf32> to vector<128x1xf32>
    %25 = vector.broadcast %24 : vector<128x1xf32> to vector<128x128xf32>
    %26 = arith.addf %22, %25 : vector<128x128xf32>
    %cst_20 = arith.constant 0.000000e+00 : f32
    %27 = vector.broadcast %cst_20 : f32 to vector<128x128xf32>
    %28 = arith.maximumf %26, %27 : vector<128x128xf32>
    %c2_21 = arith.constant 2 : index
    %c0_22 = arith.constant 0 : index
    %c0_23 = arith.constant 0 : index
    %29 = vector.load %arg3[%c2_21, %c0_22, %c0_23] : memref<6x128x128xf32, #tpu.memory_space<vmem>>, vector<1x128x128xf32>
    %30 = vector.shape_cast %29 : vector<1x128x128xf32> to vector<128x128xf32>
    %cst_24 = arith.constant dense<0.000000e+00> : vector<128x128xf32>
    %31 = tpu.matmul %30, %28, %cst_24 {dimension_numbers = #tpu.dot_dimension_numbers<[1], [0], [0], [1], [0, 0, 1, 1], [], []>} : vector<128x128xf32>, vector<128x128xf32>, vector<128x128xf32> -> vector<128x128xf32>
    %c3 = arith.constant 3 : index
    %c0_25 = arith.constant 0 : index
    %c0_26 = arith.constant 0 : index
    %32 = vector.load %arg4[%c3, %c0_25, %c0_26] : memref<7x128x1xf32, #tpu.memory_space<vmem>>, vector<1x128x1xf32>
    %33 = vector.shape_cast %32 : vector<1x128x1xf32> to vector<128x1xf32>
    %34 = vector.broadcast %33 : vector<128x1xf32> to vector<128x128xf32>
    %35 = arith.addf %31, %34 : vector<128x128xf32>
    %cst_27 = arith.constant 0.000000e+00 : f32
    %36 = vector.broadcast %cst_27 : f32 to vector<128x128xf32>
    %37 = arith.maximumf %35, %36 : vector<128x128xf32>
    %c3_28 = arith.constant 3 : index
    %c0_29 = arith.constant 0 : index
    %c0_30 = arith.constant 0 : index
    %38 = vector.load %arg3[%c3_28, %c0_29, %c0_30] : memref<6x128x128xf32, #tpu.memory_space<vmem>>, vector<1x128x128xf32>
    %39 = vector.shape_cast %38 : vector<1x128x128xf32> to vector<128x128xf32>
    %cst_31 = arith.constant dense<0.000000e+00> : vector<128x128xf32>
    %40 = tpu.matmul %39, %37, %cst_31 {dimension_numbers = #tpu.dot_dimension_numbers<[1], [0], [0], [1], [0, 0, 1, 1], [], []>} : vector<128x128xf32>, vector<128x128xf32>, vector<128x128xf32> -> vector<128x128xf32>
    %c4 = arith.constant 4 : index
    %c0_32 = arith.constant 0 : index
    %c0_33 = arith.constant 0 : index
    %41 = vector.load %arg4[%c4, %c0_32, %c0_33] : memref<7x128x1xf32, #tpu.memory_space<vmem>>, vector<1x128x1xf32>
    %42 = vector.shape_cast %41 : vector<1x128x1xf32> to vector<128x1xf32>
    %43 = vector.broadcast %42 : vector<128x1xf32> to vector<128x128xf32>
    %44 = arith.addf %40, %43 : vector<128x128xf32>
    %cst_34 = arith.constant 0.000000e+00 : f32
    %45 = vector.broadcast %cst_34 : f32 to vector<128x128xf32>
    %46 = arith.maximumf %44, %45 : vector<128x128xf32>
    %c4_35 = arith.constant 4 : index
    %c0_36 = arith.constant 0 : index
    %c0_37 = arith.constant 0 : index
    %47 = vector.load %arg3[%c4_35, %c0_36, %c0_37] : memref<6x128x128xf32, #tpu.memory_space<vmem>>, vector<1x128x128xf32>
    %48 = vector.shape_cast %47 : vector<1x128x128xf32> to vector<128x128xf32>
    %cst_38 = arith.constant dense<0.000000e+00> : vector<128x128xf32>
    %49 = tpu.matmul %48, %46, %cst_38 {dimension_numbers = #tpu.dot_dimension_numbers<[1], [0], [0], [1], [0, 0, 1, 1], [], []>} : vector<128x128xf32>, vector<128x128xf32>, vector<128x128xf32> -> vector<128x128xf32>
    %c5 = arith.constant 5 : index
    %c0_39 = arith.constant 0 : index
    %c0_40 = arith.constant 0 : index
    %50 = vector.load %arg4[%c5, %c0_39, %c0_40] : memref<7x128x1xf32, #tpu.memory_space<vmem>>, vector<1x128x1xf32>
    %51 = vector.shape_cast %50 : vector<1x128x1xf32> to vector<128x1xf32>
    %52 = vector.broadcast %51 : vector<128x1xf32> to vector<128x128xf32>
    %53 = arith.addf %49, %52 : vector<128x128xf32>
    %cst_41 = arith.constant 0.000000e+00 : f32
    %54 = vector.broadcast %cst_41 : f32 to vector<128x128xf32>
    %55 = arith.maximumf %53, %54 : vector<128x128xf32>
    %c5_42 = arith.constant 5 : index
    %c0_43 = arith.constant 0 : index
    %c0_44 = arith.constant 0 : index
    %56 = vector.load %arg3[%c5_42, %c0_43, %c0_44] : memref<6x128x128xf32, #tpu.memory_space<vmem>>, vector<1x128x128xf32>
    %57 = vector.shape_cast %56 : vector<1x128x128xf32> to vector<128x128xf32>
    %cst_45 = arith.constant dense<0.000000e+00> : vector<128x128xf32>
    %58 = tpu.matmul %57, %55, %cst_45 {dimension_numbers = #tpu.dot_dimension_numbers<[1], [0], [0], [1], [0, 0, 1, 1], [], []>} : vector<128x128xf32>, vector<128x128xf32>, vector<128x128xf32> -> vector<128x128xf32>
    %c6 = arith.constant 6 : index
    %c0_46 = arith.constant 0 : index
    %c0_47 = arith.constant 0 : index
    %59 = vector.load %arg4[%c6, %c0_46, %c0_47] : memref<7x128x1xf32, #tpu.memory_space<vmem>>, vector<1x128x1xf32>
    %60 = vector.shape_cast %59 : vector<1x128x1xf32> to vector<128x1xf32>
    %61 = vector.broadcast %60 : vector<128x1xf32> to vector<128x128xf32>
    %62 = arith.addf %58, %61 : vector<128x128xf32>
    %cst_48 = arith.constant 0.000000e+00 : f32
    %63 = vector.broadcast %cst_48 : f32 to vector<128x128xf32>
    %64 = arith.maximumf %62, %63 : vector<128x128xf32>
    %c0_49 = arith.constant 0 : index
    %c0_50 = arith.constant 0 : index
    %c0_51 = arith.constant 0 : index
    %65 = vector.load %arg5[%c0_49, %c0_50, %c0_51] : memref<6x128x128xf32, #tpu.memory_space<vmem>>, vector<1x128x128xf32>
    %66 = vector.shape_cast %65 : vector<1x128x128xf32> to vector<128x128xf32>
    %cst_52 = arith.constant dense<0.000000e+00> : vector<128x128xf32>
    %67 = tpu.matmul %66, %64, %cst_52 {dimension_numbers = #tpu.dot_dimension_numbers<[1], [0], [0], [1], [0, 0, 1, 1], [], []>} : vector<128x128xf32>, vector<128x128xf32>, vector<128x128xf32> -> vector<128x128xf32>
    %68 = arith.addf %4, %67 : vector<128x128xf32>
    %c0_53 = arith.constant 0 : index
    %c0_54 = arith.constant 0 : index
    %c0_55 = arith.constant 0 : index
    %69 = vector.load %arg6[%c0_53, %c0_54, %c0_55] : memref<6x128x1xf32, #tpu.memory_space<vmem>>, vector<1x128x1xf32>
    %70 = vector.shape_cast %69 : vector<1x128x1xf32> to vector<128x1xf32>
    %71 = vector.broadcast %70 : vector<128x1xf32> to vector<128x128xf32>
    %72 = arith.addf %68, %71 : vector<128x128xf32>
    %cst_56 = arith.constant 0.000000e+00 : f32
    %73 = vector.broadcast %cst_56 : f32 to vector<128x128xf32>
    %74 = arith.maximumf %72, %73 : vector<128x128xf32>
    %c1_57 = arith.constant 1 : index
    %c0_58 = arith.constant 0 : index
    %c0_59 = arith.constant 0 : index
    %75 = vector.load %arg5[%c1_57, %c0_58, %c0_59] : memref<6x128x128xf32, #tpu.memory_space<vmem>>, vector<1x128x128xf32>
    %76 = vector.shape_cast %75 : vector<1x128x128xf32> to vector<128x128xf32>
    %cst_60 = arith.constant dense<0.000000e+00> : vector<128x128xf32>
    %77 = tpu.matmul %76, %74, %cst_60 {dimension_numbers = #tpu.dot_dimension_numbers<[1], [0], [0], [1], [0, 0, 1, 1], [], []>} : vector<128x128xf32>, vector<128x128xf32>, vector<128x128xf32> -> vector<128x128xf32>
    %c1_61 = arith.constant 1 : index
    %c0_62 = arith.constant 0 : index
    %c0_63 = arith.constant 0 : index
    %78 = vector.load %arg6[%c1_61, %c0_62, %c0_63] : memref<6x128x1xf32, #tpu.memory_space<vmem>>, vector<1x128x1xf32>
    %79 = vector.shape_cast %78 : vector<1x128x1xf32> to vector<128x1xf32>
    %80 = vector.broadcast %79 : vector<128x1xf32> to vector<128x128xf32>
    %81 = arith.addf %77, %80 : vector<128x128xf32>
    %cst_64 = arith.constant 0.000000e+00 : f32
    %82 = vector.broadcast %cst_64 : f32 to vector<128x128xf32>
    %83 = arith.maximumf %81, %82 : vector<128x128xf32>
    %c2_65 = arith.constant 2 : index
    %c0_66 = arith.constant 0 : index
    %c0_67 = arith.constant 0 : index
    %84 = vector.load %arg5[%c2_65, %c0_66, %c0_67] : memref<6x128x128xf32, #tpu.memory_space<vmem>>, vector<1x128x128xf32>
    %85 = vector.shape_cast %84 : vector<1x128x128xf32> to vector<128x128xf32>
    %cst_68 = arith.constant dense<0.000000e+00> : vector<128x128xf32>
    %86 = tpu.matmul %85, %83, %cst_68 {dimension_numbers = #tpu.dot_dimension_numbers<[1], [0], [0], [1], [0, 0, 1, 1], [], []>} : vector<128x128xf32>, vector<128x128xf32>, vector<128x128xf32> -> vector<128x128xf32>
    %c2_69 = arith.constant 2 : index
    %c0_70 = arith.constant 0 : index
    %c0_71 = arith.constant 0 : index
    %87 = vector.load %arg6[%c2_69, %c0_70, %c0_71] : memref<6x128x1xf32, #tpu.memory_space<vmem>>, vector<1x128x1xf32>
    %88 = vector.shape_cast %87 : vector<1x128x1xf32> to vector<128x1xf32>
    %89 = vector.broadcast %88 : vector<128x1xf32> to vector<128x128xf32>
    %90 = arith.addf %86, %89 : vector<128x128xf32>
    %cst_72 = arith.constant 0.000000e+00 : f32
    %91 = vector.broadcast %cst_72 : f32 to vector<128x128xf32>
    %92 = arith.maximumf %90, %91 : vector<128x128xf32>
    %c3_73 = arith.constant 3 : index
    %c0_74 = arith.constant 0 : index
    %c0_75 = arith.constant 0 : index
    %93 = vector.load %arg5[%c3_73, %c0_74, %c0_75] : memref<6x128x128xf32, #tpu.memory_space<vmem>>, vector<1x128x128xf32>
    %94 = vector.shape_cast %93 : vector<1x128x128xf32> to vector<128x128xf32>
    %cst_76 = arith.constant dense<0.000000e+00> : vector<128x128xf32>
    %95 = tpu.matmul %94, %92, %cst_76 {dimension_numbers = #tpu.dot_dimension_numbers<[1], [0], [0], [1], [0, 0, 1, 1], [], []>} : vector<128x128xf32>, vector<128x128xf32>, vector<128x128xf32> -> vector<128x128xf32>
    %c3_77 = arith.constant 3 : index
    %c0_78 = arith.constant 0 : index
    %c0_79 = arith.constant 0 : index
    %96 = vector.load %arg6[%c3_77, %c0_78, %c0_79] : memref<6x128x1xf32, #tpu.memory_space<vmem>>, vector<1x128x1xf32>
    %97 = vector.shape_cast %96 : vector<1x128x1xf32> to vector<128x1xf32>
    %98 = vector.broadcast %97 : vector<128x1xf32> to vector<128x128xf32>
    %99 = arith.addf %95, %98 : vector<128x128xf32>
    %cst_80 = arith.constant 0.000000e+00 : f32
    %100 = vector.broadcast %cst_80 : f32 to vector<128x128xf32>
    %101 = arith.maximumf %99, %100 : vector<128x128xf32>
    %c4_81 = arith.constant 4 : index
    %c0_82 = arith.constant 0 : index
    %c0_83 = arith.constant 0 : index
    %102 = vector.load %arg5[%c4_81, %c0_82, %c0_83] : memref<6x128x128xf32, #tpu.memory_space<vmem>>, vector<1x128x128xf32>
    %103 = vector.shape_cast %102 : vector<1x128x128xf32> to vector<128x128xf32>
    %cst_84 = arith.constant dense<0.000000e+00> : vector<128x128xf32>
    %104 = tpu.matmul %103, %101, %cst_84 {dimension_numbers = #tpu.dot_dimension_numbers<[1], [0], [0], [1], [0, 0, 1, 1], [], []>} : vector<128x128xf32>, vector<128x128xf32>, vector<128x128xf32> -> vector<128x128xf32>
    %c4_85 = arith.constant 4 : index
    %c0_86 = arith.constant 0 : index
    %c0_87 = arith.constant 0 : index
    %105 = vector.load %arg6[%c4_85, %c0_86, %c0_87] : memref<6x128x1xf32, #tpu.memory_space<vmem>>, vector<1x128x1xf32>
    %106 = vector.shape_cast %105 : vector<1x128x1xf32> to vector<128x1xf32>
    %107 = vector.broadcast %106 : vector<128x1xf32> to vector<128x128xf32>
    %108 = arith.addf %104, %107 : vector<128x128xf32>
    %cst_88 = arith.constant 0.000000e+00 : f32
    %109 = vector.broadcast %cst_88 : f32 to vector<128x128xf32>
    %110 = arith.maximumf %108, %109 : vector<128x128xf32>
    %c5_89 = arith.constant 5 : index
    %c0_90 = arith.constant 0 : index
    %c0_91 = arith.constant 0 : index
    %111 = vector.load %arg5[%c5_89, %c0_90, %c0_91] : memref<6x128x128xf32, #tpu.memory_space<vmem>>, vector<1x128x128xf32>
    %112 = vector.shape_cast %111 : vector<1x128x128xf32> to vector<128x128xf32>
    %cst_92 = arith.constant dense<0.000000e+00> : vector<128x128xf32>
    %113 = tpu.matmul %112, %110, %cst_92 {dimension_numbers = #tpu.dot_dimension_numbers<[1], [0], [0], [1], [0, 0, 1, 1], [], []>} : vector<128x128xf32>, vector<128x128xf32>, vector<128x128xf32> -> vector<128x128xf32>
    %c5_93 = arith.constant 5 : index
    %c0_94 = arith.constant 0 : index
    %c0_95 = arith.constant 0 : index
    %114 = vector.load %arg6[%c5_93, %c0_94, %c0_95] : memref<6x128x1xf32, #tpu.memory_space<vmem>>, vector<1x128x1xf32>
    %115 = vector.shape_cast %114 : vector<1x128x1xf32> to vector<128x1xf32>
    %116 = vector.broadcast %115 : vector<128x1xf32> to vector<128x128xf32>
    %117 = arith.addf %113, %116 : vector<128x128xf32>
    %cst_96 = arith.constant 0.000000e+00 : f32
    %118 = vector.broadcast %cst_96 : f32 to vector<128x128xf32>
    %119 = arith.maximumf %117, %118 : vector<128x128xf32>
    %c0_97 = arith.constant 0 : index
    %c0_98 = arith.constant 0 : index
    %120 = vector.load %arg7[%c0_97, %c0_98] : memref<128x1xf32, #tpu.memory_space<vmem>>, vector<128x1xf32>
    %121 = vector.broadcast %120 : vector<128x1xf32> to vector<128x128xf32>
    %122 = arith.mulf %119, %121 : vector<128x128xf32>
    %cst_99 = arith.constant dense<0.000000e+00> : vector<128xf32>
    %123 = vector.multi_reduction <add>, %122, %cst_99 [0] : vector<128x128xf32> to vector<128xf32>
    %124 = vector.shape_cast %123 : vector<128xf32> to vector<1x128xf32>
    %c0_100 = arith.constant 0 : index
    %c0_101 = arith.constant 0 : index
    %125 = memref.load %arg8[%c0_100, %c0_101] : memref<1x1xf32, #tpu.memory_space<smem>>
    %126 = vector.broadcast %125 : f32 to vector<1x128xf32>
    %127 = arith.addf %124, %126 : vector<1x128xf32>
    %c0_102 = arith.constant 0 : index
    %c0_103 = arith.constant 0 : index
    %128 = vector.load %arg9[%c0_102, %c0_103] : memref<1x128xf32, #tpu.memory_space<vmem>>, vector<1x128xf32>
    tpu.vector_store %arg9[%c0_102, %c0_103], %127 {strides = array<i32>} : memref<1x128xf32, #tpu.memory_space<vmem>>, vector<1x128xf32>,
    return
  }
  func.func @transform_0(%arg0: i32) -> (i32, i32) {
    %c0_i32 = arith.constant 0 : i32
    %c0_i32_0 = arith.constant 0 : i32
    return %c0_i32, %arg0 : i32, i32
  }
  func.func @transform_1(%arg0: i32) -> (i32, i32) {
    %c0_i32 = arith.constant 0 : i32
    %c0_i32_0 = arith.constant 0 : i32
    %c0_i32_1 = arith.constant 0 : i32
    return %c0_i32, %c0_i32_0 : i32, i32
  }
  func.func @transform_2(%arg0: i32) -> (i32, i32, i32) {
    %c0_i32 = arith.constant 0 : i32
    %c0_i32_0 = arith.constant 0 : i32
    %c0_i32_1 = arith.constant 0 : i32
    %c0_i32_2 = arith.constant 0 : i32
    return %c0_i32, %c0_i32_0, %c0_i32_1 : i32, i32, i32
  }
  func.func @transform_3(%arg0: i32) -> (i32, i32, i32) {
    %c0_i32 = arith.constant 0 : i32
    %c0_i32_0 = arith.constant 0 : i32
    %c0_i32_1 = arith.constant 0 : i32
    %c0_i32_2 = arith.constant 0 : i32
    return %c0_i32, %c0_i32_0, %c0_i32_1 : i32, i32, i32
  }
  func.func @transform_4(%arg0: i32) -> (i32, i32, i32) {
    %c0_i32 = arith.constant 0 : i32
    %c0_i32_0 = arith.constant 0 : i32
    %c0_i32_1 = arith.constant 0 : i32
    %c0_i32_2 = arith.constant 0 : i32
    return %c0_i32, %c0_i32_0, %c0_i32_1 : i32, i32, i32
  }
  func.func @transform_5(%arg0: i32) -> (i32, i32, i32) {
    %c0_i32 = arith.constant 0 : i32
    %c0_i32_0 = arith.constant 0 : i32
    %c0_i32_1 = arith.constant 0 : i32
    %c0_i32_2 = arith.constant 0 : i32
    return %c0_i32, %c0_i32_0, %c0_i32_1 : i32, i32, i32
  }
  func.func @transform_6(%arg0: i32) -> (i32, i32) {
    %c0_i32 = arith.constant 0 : i32
    %c0_i32_0 = arith.constant 0 : i32
    %c0_i32_1 = arith.constant 0 : i32
    return %c0_i32, %c0_i32_0 : i32, i32
  }
  func.func @transform_7(%arg0: i32) -> (i32, i32) {
    %c0_i32 = arith.constant 0 : i32
    %c0_i32_0 = arith.constant 0 : i32
    %c0_i32_1 = arith.constant 0 : i32
    return %c0_i32, %c0_i32_0 : i32, i32
  }
  func.func @transform_8(%arg0: i32) -> (i32, i32) {
    %c0_i32 = arith.constant 0 : i32
    %c0_i32_0 = arith.constant 0 : i32
    return %c0_i32, %arg0 : i32, i32
  }
}

</mosaic_0001>

<bundles_post_ra>
// kernel: tpu_custom_call.1
= control target key start
LH: loop header
LB: loop body
LE: loop exit
PB: predicated region body
PF: predicated region fallthrough
CT: control target
= control target key end

     0   :  { %s8259_s0 = inlined_call_operand.vmem [shape: f32[8,384], index: 0, kind: input, shape index: {}]   ;;  %s8260_s1 = inlined_call_operand.vmem [shape: f32[256,8], index: 1, kind: input, shape index: {}]   ;;  %s8261_s2 = inlined_call_operand.vmem [shape: f32[6,128,128], index: 2, kind: input, shape index: {}]   ;;  %s8262_s3 = inlined_call_operand.vmem [shape: f32[7,128,1], index: 3, kind: input, shape index: {}]   ;;  %s8263_s4 = inlined_call_operand.vmem [shape: f32[6,128,128], index: 4, kind: input, shape index: {}]   ;;  %s8264_s5 = inlined_call_operand.vmem [shape: f32[6,128,1], index: 5, kind: input, shape index: {}]   ;;  %s8265_s6 = inlined_call_operand.vmem [shape: f32[128,1], index: 6, kind: input, shape index: {}]   ;;  %s8266_s7 = inlined_call_operand.<no memory space> [shape: f32[1,1], index: 7, kind: input, shape index: {}]   ;;  %s8267_s8 = inlined_call_operand.hbm [shape: f32[1,384], index: 8, kind: output, shape index: {}]  }
   0x1   :  { %13 = sst [smem:[#allocation2]] %s8266_s7 }
   0x2   :  { %14 = vsyncpa [#allocation4], 0 }
   0x3   :  { %16 = vsyncpa [#allocation4 + $0x1], 0  ;;  %s6405_s29 = smov 0   ;;  %s6407_s30 = smov 0  }
   0x4   :  { %s6409_s9 = smov 0   ;;  %s6411_s10 = smov 0  }
   0x5 LB: > { %s6426_s7 = sadd.s32 4294967295, %s6353_s10   ;;  %s4318_s11 = sadd.s32 4294967294, %s6353_s10   ;;  %s6353_s10 = sphi %s6411_s10, %s8397_s10   ;;  %s6349_s9 = sphi %s6409_s9, %s8396_s9   ;;  %s6345_s30 = sphi %s6407_s30, %s8395_s30   ;;  %s6341_s29 = sphi %s6405_s29, %s8394_s29  }
   0x6   : > { %s6430_s12 = sadd.s32 1, %s6353_s10   ;;  %s202_s13 = sadd.s32 1, %s6349_s9 }
   0x7   : > { %s199_s14 = ssub.s32 %s6353_s10, %s6430_s12  ;;  %p212_p0 = scmp.ne.s32.totalorder %s6349_s9, %s6345_s30 }
   0x8   : > { %p200_p1 = scmp.eq.s32.totalorder %s199_s14, 0  ;;  %p213_p2 = scmp.eq.s32.totalorder %s6426_s7, 2 }
   0x9   : > { %p218_p3 = scmp.ne.s32.totalorder %s6345_s30, %s6341_s29  ;;  %p219_p4 = scmp.eq.s32.totalorder %s4318_s11, 2 }
   0xa   : > { %s6441_s15 = scalar_select %p200_p1, %s6349_s9, %s202_s13  }
   0xb   : > { %p6443_p5 = por %p213_p2, %p212_p0  ;;  %p6447_p6 = por %p219_p4, %p218_p3 }
   0xc   : > { %p4321_p7 = scmp.ge.s32.totalorder %s6353_s10, 1  ;;  %p265_p8 = scmp.lt.s32.totalorder %s6353_s10, 4 }
   0xe   : > { %p266_p9 = pnand %p4321_p7, %p265_p8 }
  0x10   : > { %269 = sbr.rel (%p266_p9) target bundleno = 3324 (0xcfc), region = 52 }
  0x17   : > { %v658_v0 = vld [vmem:[%s8262_s3 + $0x10] sm:$0xff]  ;;  %v656_v1 = vld [vmem:[%s8262_s3] sm:$0xff]  ;;  %p297_p10 = scmp.lt.s32.totalorder %s6426_s7, 2  ;;  %vm334_vm0 = vcmask 64512   ;;  %v6355_v2 = vmov 0   ;;  %v659_v4 = vld [vmem:[%s8262_s3 + $0x18] sm:$0xff] }
  0x18   : > { %6290 = vset.pattern.permute.xlu1 %v6355_v2  ;;  %6289 = vset.pattern.permute.xlu0 %v6355_v2  ;;  %v302_v3 = vld [vmem:[%s8260_s1] sm:$0xff]  ;;  %v657_v5 = vld [vmem:[%s8262_s3 + $0x8] sm:$0xff]  ;;  %v304_v10 = vld [vmem:[%s8260_s1 + $0x10] sm:$0xff]  ;;  %s4246_s23 = sld [smem:[#allocation2]]  ;;  %s295_s25 = sand.u32 1, %s6345_s30  }
  0x19   : > { %684 = vperm.xlu1 %6290, %v658_v0   ;;  %674 = vperm.xlu0 %6289, %v656_v1   ;;  %s298_s24 = scalar_select %p297_p10, %s6426_s7, 2  ;;  %v303_v7 = vld [vmem:[%s8260_s1 + $0x8] sm:$0xff]  ;;  %v660_v9 = vld [vmem:[%s8262_s3 + $0x20] sm:$0xff]  ;;  %v305_v11 = vld [vmem:[%s8260_s1 + $0x18] sm:$0xff] }
  0x1a   : > { %5113 = vmatprep.mubr.msk.f32.mxu0 %vm334_vm0, %v302_v3  ;;  %v661_v8 = vld [vmem:[%s8262_s3 + $0x28] sm:$0xff]  ;;  %v663_v12 = vld [vmem:[%s8262_s3 + $0x38] sm:$0xff]  ;;  %v662_v13 = vld [vmem:[%s8262_s3 + $0x30] sm:$0xff]  ;;  %s296_s26 = scalar_lea.vmem [#allocation3], %s295_s25  ;;  %s4251_s14 = scalar_lea.sflag [#allocation4], %s295_s25 }
  0x1b   : > { %s4322_s11 = sshll.u32 %s298_s24, 3  ;;  %v306_v14 = vld [vmem:[%s8260_s1 + $0x20] sm:$0xff]  ;;  %v307_v15 = vld [vmem:[%s8260_s1 + $0x28] sm:$0xff]  ;;  %v308_v18 = vld [vmem:[%s8260_s1 + $0x30] sm:$0xff]  ;;  %s4691_s24 = sshll.u32 %s6426_s7, 4 }
  0x1c   : > { %s300_s18 = scalar_lea.vmem %s8259_s0, %s4322_s11  ;;  %v665_v16 = vld [vmem:[%s8262_s3 + $0x48] sm:$0xff]  ;;  %v664_v17 = vld [vmem:[%s8262_s3 + $0x40] sm:$0xff]  ;;  %v309_v19 = vld [vmem:[%s8260_s1 + $0x38] sm:$0xff]  ;;  %s4263_s27 = sshll.u32 %s296_s26, 4  ;;  %s8219_s27 = int_to_ptr.vmem [resolvable:$true] %s4263_s27 }
  0x1d   : > { %689 = vperm.xlu1 %6290, %v659_v4   ;;  %679 = vperm.xlu0 %6289, %v657_v5   ;;  %v301_v6 = vld [vmem:[%s300_s18] sm:$0xff]  ;;  %v667_v20 = vld [vmem:[%s8262_s3 + $0x58] sm:$0xff]  ;;  %v666_v21 = vld [vmem:[%s8262_s3 + $0x50] sm:$0xff]  ;;  %s8217_s13 = scalar_lea.hbm %s8267_s8, %s4691_s24  ;;  %s6291_s18 = scalar_lea.vmem %s8219_s27, 16 }
  0x1e   : > { %5111 = vmatprep.subr.mxu0 %v301_v6  ;;  %v310_v22 = vld [vmem:[%s8260_s1 + $0x40] sm:$0xff]  ;;  %v311_v23 = vld [vmem:[%s8260_s1 + $0x48] sm:$0xff]  ;;  %v312_v26 = vld [vmem:[%s8260_s1 + $0x50] sm:$0xff]  ;;  %p6292_p11 = scmp.ne.s32.totalorder %s8219_s27, %s6291_s18  ;;  %s6356_s7 = smov [#allocation3]  }
  0x1f   : > { %5112 = vmatpush3.msra.mxu0 %v301_v6  ;;  %v669_v24 = vld [vmem:[%s8262_s3 + $0x68] sm:$0xff]  ;;  %v668_v25 = vld [vmem:[%s8262_s3 + $0x60] sm:$0xff]  ;;  %v313_v27 = vld [vmem:[%s8260_s1 + $0x58] sm:$0xff]  ;;  %s6295_s19 = sshll.u32 %s6356_s7, 4  ;;  %s6296_s19 = int_to_ptr.vmem [resolvable:$false] %s6295_s19 }
  0x20   : > { %5114 = vmatmul.mubr.msk.f32.vlgmr.msra.gmra.mrb[0].mxu0 %vm334_vm0, %v303_v7  ;;  %v671_v28 = vld [vmem:[%s8262_s3 + $0x78] sm:$0xff]  ;;  %v670_v29 = vld [vmem:[%s8262_s3 + $0x70] sm:$0xff]  ;;  %v314_v30 = vld [vmem:[%s8260_s1 + $0x60] sm:$0xff]  ;;  %p6293_p12 = pnand %p6292_p11, %p6443_p5  ;;  %s6297_s20 = scalar_lea.vmem %s6296_s19, 32 }
  0x21   : > { %699 = vperm.xlu1 %6290, %v661_v8   ;;  %694 = vperm.xlu0 %6289, %v660_v9   ;;  %v315_v31 = vld [vmem:[%s8260_s1 + $0x68] sm:$0xff]  ;;  %v4355_v33 = vld [vmem:[%s8262_s3 + $0x80] sm:$0xff]  ;;  %v316_v34 = vld [vmem:[%s8260_s1 + $0x70] sm:$0xff]  ;;  %p6298_p0 = scmp.lt.s32.totalorder %s8219_s27, %s6296_s19  ;;  %p6299_p1 = scmp.lt.s32.totalorder %s6297_s20, %s6291_s18 }
  0x22   : > { %5116 = vmatprep.mubr.msk.f32.mxu0 %vm334_vm0, %v304_v10  ;;  %v4356_v32 = vld [vmem:[%s8262_s3 + $0x88] sm:$0xff]  ;;  %v317_v35 = vld [vmem:[%s8260_s1 + $0x78] sm:$0xff]  ;;  %v4357_v37 = vld [vmem:[%s8262_s3 + $0x90] sm:$0xff]  ;;  %p6294_p13 = pneg %p6293_p12 }
  0x23   : > { %v4358_v36 = vld [vmem:[%s8262_s3 + $0x98] sm:$0xff]  ;;  %v4360_v38 = vld [vmem:[%s8262_s3 + $0xa8] sm:$0xff]  ;;  %v4359_v39 = vld [vmem:[%s8262_s3 + $0xa0] sm:$0xff]  ;;  %p6300_p2 = por %p6299_p1, %p6298_p0 }
  0x24   : > { %5117 = vmatmul.mubr.msk.f32.gmra.mrb[2].mxu0 %vm334_vm0, %v305_v11  ;;  %v4362_v40 = vld [vmem:[%s8262_s3 + $0xb8] sm:$0xff]  ;;  %v4361_v41 = vld [vmem:[%s8262_s3 + $0xb0] sm:$0xff]  ;;  %v4364_v42 = vld [vmem:[%s8262_s3 + $0xc8] sm:$0xff] }
  0x25   : > { %709 = vperm.xlu1 %6290, %v663_v12   ;;  %704 = vperm.xlu0 %6289, %v662_v13   ;;  %v4363_v43 = vld [vmem:[%s8262_s3 + $0xc0] sm:$0xff]  ;;  %v4366_v44 = vld [vmem:[%s8262_s3 + $0xd8] sm:$0xff]  ;;  %v4365_v45 = vld [vmem:[%s8262_s3 + $0xd0] sm:$0xff]  ;;  %p6301_p3 = pnand %p6300_p2, %p6294_p13 }
  0x26   : > { %5119 = vmatprep.mubr.msk.f32.mxu0 %vm334_vm0, %v306_v14  ;;  %v4368_v46 = vld [vmem:[%s8262_s3 + $0xe8] sm:$0xff]  ;;  %v4367_v47 = vld [vmem:[%s8262_s3 + $0xe0] sm:$0xff]  ;;  %v4370_v48 = vld [vmem:[%s8262_s3 + $0xf8] sm:$0xff] }
  0x27   : > { %v4369_v49 = vld [vmem:[%s8262_s3 + $0xf0] sm:$0xff]  ;;  %v4388_v50 = vld [vmem:[%s8262_s3 + $0x108] sm:$0xff]  ;;  %v4387_v51 = vld [vmem:[%s8262_s3 + $0x100] sm:$0xff] }
  0x28   : > { %5120 = vmatmul.mubr.msk.f32.gmra.mrb[4].mxu0 %vm334_vm0, %v307_v15  ;;  %v4390_v52 = vld [vmem:[%s8262_s3 + $0x118] sm:$0xff]  ;;  %v4389_v53 = vld [vmem:[%s8262_s3 + $0x110] sm:$0xff]  ;;  %v4392_v54 = vld [vmem:[%s8262_s3 + $0x128] sm:$0xff] }
  0x29   : > { %719 = vperm.xlu1 %6290, %v665_v16   ;;  %714 = vperm.xlu0 %6289, %v664_v17   ;;  %v4391_v55 = vld [vmem:[%s8262_s3 + $0x120] sm:$0xff]  ;;  %v4394_v56 = vld [vmem:[%s8262_s3 + $0x138] sm:$0xff]  ;;  %v4393_v57 = vld [vmem:[%s8262_s3 + $0x130] sm:$0xff] }
  0x2a   : > { %5122 = vmatprep.mubr.msk.f32.mxu0 %vm334_vm0, %v308_v18  ;;  %v4396_v58 = vld [vmem:[%s8262_s3 + $0x148] sm:$0xff]  ;;  %v4395_v59 = vld [vmem:[%s8262_s3 + $0x140] sm:$0xff]  ;;  %v4398_v60 = vld [vmem:[%s8262_s3 + $0x158] sm:$0xff] }
  0x2b   : > { %v4397_v61 = vld [vmem:[%s8262_s3 + $0x150] sm:$0xff]  ;;  %v4400_v62 = vld [vmem:[%s8262_s3 + $0x168] sm:$0xff]  ;;  %v4399_v63 = vld [vmem:[%s8262_s3 + $0x160] sm:$0xff] }
  0x2c   : > { %5123 = vmatmul.mubr.msk.f32.gmra.mrb[6].mxu0 %vm334_vm0, %v309_v19  ;;  %v4402_v0 = vld [vmem:[%s8262_s3 + $0x178] sm:$0xff]  ;;  %v4401_v1 = vld [vmem:[%s8262_s3 + $0x170] sm:$0xff]  ;;  %v4420_v2 = vld [vmem:[%s8262_s3 + $0x188] sm:$0xff] }
  0x2d   : > { %729 = vperm.xlu1 %6290, %v667_v20   ;;  %724 = vperm.xlu0 %6289, %v666_v21   ;;  %v4419_v3 = vld [vmem:[%s8262_s3 + $0x180] sm:$0xff]  ;;  %v4422_v4 = vld [vmem:[%s8262_s3 + $0x198] sm:$0xff]  ;;  %v4421_v5 = vld [vmem:[%s8262_s3 + $0x190] sm:$0xff] }
  0x2e   : > { %5125 = vmatprep.mubr.msk.f32.mxu0 %vm334_vm0, %v310_v22  ;;  %v4424_v6 = vld [vmem:[%s8262_s3 + $0x1a8] sm:$0xff]  ;;  %v4423_v7 = vld [vmem:[%s8262_s3 + $0x1a0] sm:$0xff]  ;;  %v4426_v8 = vld [vmem:[%s8262_s3 + $0x1b8] sm:$0xff] }
  0x2f   : > { %v4425_v9 = vld [vmem:[%s8262_s3 + $0x1b0] sm:$0xff]  ;;  %v4428_v10 = vld [vmem:[%s8262_s3 + $0x1c8] sm:$0xff]  ;;  %v4427_v11 = vld [vmem:[%s8262_s3 + $0x1c0] sm:$0xff] }
  0x30   : > { %5126 = vmatmul.mubr.msk.f32.gmra.mrb[8].mxu0 %vm334_vm0, %v311_v23  ;;  %v4430_v12 = vld [vmem:[%s8262_s3 + $0x1d8] sm:$0xff]  ;;  %v4429_v13 = vld [vmem:[%s8262_s3 + $0x1d0] sm:$0xff]  ;;  %v4432_v14 = vld [vmem:[%s8262_s3 + $0x1e8] sm:$0xff] }
  0x31   : > { %739 = vperm.xlu1 %6290, %v669_v24   ;;  %734 = vperm.xlu0 %6289, %v668_v25   ;;  %v4431_v15 = vld [vmem:[%s8262_s3 + $0x1e0] sm:$0xff]  ;;  %v4434_v16 = vld [vmem:[%s8262_s3 + $0x1f8] sm:$0xff]  ;;  %v4433_v17 = vld [vmem:[%s8262_s3 + $0x1f0] sm:$0xff] }
  0x32   : > { %5128 = vmatprep.mubr.msk.f32.mxu0 %vm334_vm0, %v312_v26  ;;  %v4452_v18 = vld [vmem:[%s8262_s3 + $0x208] sm:$0xff]  ;;  %v4451_v19 = vld [vmem:[%s8262_s3 + $0x200] sm:$0xff]  ;;  %v4454_v22 = vld [vmem:[%s8262_s3 + $0x218] sm:$0xff] }
  0x33   : > { %v4453_v23 = vld [vmem:[%s8262_s3 + $0x210] sm:$0xff]  ;;  %v784_v24 = vld [vmem:[%s8261_s2] sm:$0xff] }
  0x34   : > { %5129 = vmatmul.mubr.msk.f32.gmra.mrb[10].mxu0 %vm334_vm0, %v313_v27  ;;  %5193 = vmatprep.mubr.f32.mxu1 %v784_v24  ;;  %v4456_v27 = vld [vmem:[%s8262_s3 + $0x228] sm:$0xff] }
  0x35   : > { %749 = vperm.xlu1 %6290, %v671_v28   ;;  %744 = vperm.xlu0 %6289, %v670_v29   ;;  %v4455_v28 = vld [vmem:[%s8262_s3 + $0x220] sm:$0xff] }
  0x36   : > { %5131 = vmatprep.mubr.msk.f32.mxu0 %vm334_vm0, %v314_v30 }
  0x38   : > { %5132 = vmatmul.mubr.msk.f32.gmra.mrb[12].mxu0 %vm334_vm0, %v315_v31  ;;  %v4458_v31 = vld [vmem:[%s8262_s3 + $0x238] sm:$0xff] }
  0x39   : > { %824 = vperm.xlu1 %6290, %v4356_v32   ;;  %819 = vperm.xlu0 %6289, %v4355_v33   ;;  %v4457_v32 = vld [vmem:[%s8262_s3 + $0x230] sm:$0xff] }
  0x3a   : > { %5134 = vmatprep.mubr.msk.f32.mxu0 %vm334_vm0, %v316_v34 }
  0x3c   : > { %5135 = vmatmul.mubr.msk.f32.gmra.mrb[14].mxu0 %vm334_vm0, %v317_v35  ;;  %v4460_v35 = vld [vmem:[%s8262_s3 + $0x248] sm:$0xff] }
  0x3d   : > { %834 = vperm.xlu1 %6290, %v4358_v36   ;;  %829 = vperm.xlu0 %6289, %v4357_v37   ;;  %v4459_v36 = vld [vmem:[%s8262_s3 + $0x240] sm:$0xff] }
  0x41   : > { %844 = vperm.xlu1 %6290, %v4360_v38   ;;  %839 = vperm.xlu0 %6289, %v4359_v39   ;;  %v4462_v39 = vld [vmem:[%s8262_s3 + $0x258] sm:$0xff] }
  0x45   : > { %854 = vperm.xlu1 %6290, %v4362_v40   ;;  %849 = vperm.xlu0 %6289, %v4361_v41   ;;  %v4461_v40 = vld [vmem:[%s8262_s3 + $0x250] sm:$0xff] }
  0x49   : > { %864 = vperm.xlu1 %6290, %v4364_v42   ;;  %859 = vperm.xlu0 %6289, %v4363_v43   ;;  %v4464_v43 = vld [vmem:[%s8262_s3 + $0x268] sm:$0xff] }
  0x4d   : > { %874 = vperm.xlu1 %6290, %v4366_v44   ;;  %869 = vperm.xlu0 %6289, %v4365_v45   ;;  %v4463_v44 = vld [vmem:[%s8262_s3 + $0x260] sm:$0xff] }
  0x51   : > { %884 = vperm.xlu1 %6290, %v4368_v46   ;;  %879 = vperm.xlu0 %6289, %v4367_v47   ;;  %v4466_v47 = vld [vmem:[%s8262_s3 + $0x278] sm:$0xff] }
  0x55   : > { %894 = vperm.xlu1 %6290, %v4370_v48   ;;  %889 = vperm.xlu0 %6289, %v4369_v49   ;;  %v4465_v48 = vld [vmem:[%s8262_s3 + $0x270] sm:$0xff] }
  0x59   : > { %1099 = vperm.xlu1 %6290, %v4388_v50   ;;  %1094 = vperm.xlu0 %6289, %v4387_v51   ;;  %v4484_v51 = vld [vmem:[%s8262_s3 + $0x288] sm:$0xff] }
  0x5d   : > { %1109 = vperm.xlu1 %6290, %v4390_v52   ;;  %1104 = vperm.xlu0 %6289, %v4389_v53   ;;  %v4483_v52 = vld [vmem:[%s8262_s3 + $0x280] sm:$0xff] }
  0x61   : > { %1119 = vperm.xlu1 %6290, %v4392_v54   ;;  %1114 = vperm.xlu0 %6289, %v4391_v55   ;;  %v4486_v55 = vld [vmem:[%s8262_s3 + $0x298] sm:$0xff] }
  0x65   : > { %1129 = vperm.xlu1 %6290, %v4394_v56   ;;  %1124 = vperm.xlu0 %6289, %v4393_v57   ;;  %v4485_v56 = vld [vmem:[%s8262_s3 + $0x290] sm:$0xff] }
  0x69   : > { %1139 = vperm.xlu1 %6290, %v4396_v58   ;;  %1134 = vperm.xlu0 %6289, %v4395_v59   ;;  %v4488_v59 = vld [vmem:[%s8262_s3 + $0x2a8] sm:$0xff] }
  0x6d   : > { %1149 = vperm.xlu1 %6290, %v4398_v60   ;;  %1144 = vperm.xlu0 %6289, %v4397_v61   ;;  %v4487_v60 = vld [vmem:[%s8262_s3 + $0x2a0] sm:$0xff] }
  0x71   : > { %1159 = vperm.xlu1 %6290, %v4400_v62   ;;  %1154 = vperm.xlu0 %6289, %v4399_v63   ;;  %v4490_v63 = vld [vmem:[%s8262_s3 + $0x2b8] sm:$0xff] }
  0x75   : > { %1169 = vperm.xlu1 %6290, %v4402_v0   ;;  %1164 = vperm.xlu0 %6289, %v4401_v1   ;;  %v4489_v0 = vld [vmem:[%s8262_s3 + $0x2b0] sm:$0xff] }
  0x79   : > { %1374 = vperm.xlu1 %6290, %v4420_v2   ;;  %1369 = vperm.xlu0 %6289, %v4419_v3   ;;  %v4492_v3 = vld [vmem:[%s8262_s3 + $0x2c8] sm:$0xff] }
  0x7d   : > { %1384 = vperm.xlu1 %6290, %v4422_v4   ;;  %1379 = vperm.xlu0 %6289, %v4421_v5   ;;  %v4491_v4 = vld [vmem:[%s8262_s3 + $0x2c0] sm:$0xff] }
  0x81   : > { %1394 = vperm.xlu1 %6290, %v4424_v6   ;;  %1389 = vperm.xlu0 %6289, %v4423_v7   ;;  %v4494_v7 = vld [vmem:[%s8262_s3 + $0x2d8] sm:$0xff] }
  0x85   : > { %1404 = vperm.xlu1 %6290, %v4426_v8   ;;  %1399 = vperm.xlu0 %6289, %v4425_v9   ;;  %v4493_v8 = vld [vmem:[%s8262_s3 + $0x2d0] sm:$0xff] }
  0x89   : > { %1414 = vperm.xlu1 %6290, %v4428_v10   ;;  %1409 = vperm.xlu0 %6289, %v4427_v11   ;;  %v4496_v11 = vld [vmem:[%s8262_s3 + $0x2e8] sm:$0xff] }
  0x8d   : > { %1424 = vperm.xlu1 %6290, %v4430_v12   ;;  %1419 = vperm.xlu0 %6289, %v4429_v13   ;;  %v4495_v12 = vld [vmem:[%s8262_s3 + $0x2e0] sm:$0xff] }
  0x91   : > { %1434 = vperm.xlu1 %6290, %v4432_v14   ;;  %1429 = vperm.xlu0 %6289, %v4431_v15   ;;  %v4498_v15 = vld [vmem:[%s8262_s3 + $0x2f8] sm:$0xff] }
  0x95   : > { %1444 = vperm.xlu1 %6290, %v4434_v16   ;;  %1439 = vperm.xlu0 %6289, %v4433_v17   ;;  %v4497_v16 = vld [vmem:[%s8262_s3 + $0x2f0] sm:$0xff] }
  0x98   : > { %v6720_v20 = vpop.permute.xlu1 %684  ;;  %v6722_v21 = vpop.permute.xlu0 %674 }
  0x99   : > { %1649 = vperm.xlu1 %6290, %v4452_v18   ;;  %1644 = vperm.xlu0 %6289, %v4451_v19   ;;  %v4516_v19 = vld [vmem:[%s8262_s3 + $0x308] sm:$0xff] }
  0x9c   : > { %v6733_v25 = vpop.permute.xlu1 %689  ;;  %v6735_v26 = vpop.permute.xlu0 %679 }
  0x9d   : > { %1659 = vperm.xlu1 %6290, %v4454_v22   ;;  %1654 = vperm.xlu0 %6289, %v4453_v23   ;;  %v4515_v22 = vld [vmem:[%s8262_s3 + $0x300] sm:$0xff] }
  0xa0   : > { %v6743_v29 = vpop.permute.xlu1 %699  ;;  %v6745_v30 = vpop.permute.xlu0 %694 }
  0xa1   : > { %1669 = vperm.xlu1 %6290, %v4456_v27   ;;  %1664 = vperm.xlu0 %6289, %v4455_v28   ;;  %v4518_v27 = vld [vmem:[%s8262_s3 + $0x318] sm:$0xff]  ;;  %v4517_v28 = vld [vmem:[%s8262_s3 + $0x310] sm:$0xff] }
  0xa4   : > { %v6753_v33 = vpop.permute.xlu1 %709  ;;  %v6755_v34 = vpop.permute.xlu0 %704 }
  0xa5   : > { %1679 = vperm.xlu1 %6290, %v4458_v31   ;;  %1674 = vperm.xlu0 %6289, %v4457_v32  }
  0xa8   : > { %v6763_v37 = vpop.permute.xlu1 %719  ;;  %v6765_v38 = vpop.permute.xlu0 %714 }
  0xa9   : > { %1689 = vperm.xlu1 %6290, %v4460_v35   ;;  %1684 = vperm.xlu0 %6289, %v4459_v36   ;;  %v4520_v35 = vld [vmem:[%s8262_s3 + $0x328] sm:$0xff]  ;;  %v4519_v36 = vld [vmem:[%s8262_s3 + $0x320] sm:$0xff] }
  0xac   : > { %v6773_v41 = vpop.permute.xlu1 %729  ;;  %v6775_v42 = vpop.permute.xlu0 %724 }
  0xad   : > { %1699 = vperm.xlu1 %6290, %v4462_v39   ;;  %1694 = vperm.xlu0 %6289, %v4461_v40  }
  0xb0   : > { %v6783_v45 = vpop.permute.xlu1 %739  ;;  %v6785_v46 = vpop.permute.xlu0 %734 }
  0xb1   : > { %1709 = vperm.xlu1 %6290, %v4464_v43   ;;  %1704 = vperm.xlu0 %6289, %v4463_v44   ;;  %v4522_v43 = vld [vmem:[%s8262_s3 + $0x338] sm:$0xff]  ;;  %v4521_v44 = vld [vmem:[%s8262_s3 + $0x330] sm:$0xff] }
  0xb4   : > { %v6793_v49 = vpop.permute.xlu1 %749  ;;  %v6795_v50 = vpop.permute.xlu0 %744 }
  0xb5   : > { %1719 = vperm.xlu1 %6290, %v4466_v47   ;;  %1714 = vperm.xlu0 %6289, %v4465_v48  }
  0xb8   : > { %v6803_v53 = vpop.permute.xlu1 %824  ;;  %v6805_v54 = vpop.permute.xlu0 %819 }
  0xb9   : > { %1924 = vperm.xlu1 %6290, %v4484_v51   ;;  %1919 = vperm.xlu0 %6289, %v4483_v52   ;;  %v4524_v51 = vld [vmem:[%s8262_s3 + $0x348] sm:$0xff]  ;;  %v4523_v52 = vld [vmem:[%s8262_s3 + $0x340] sm:$0xff] }
  0xbc   : > { %v6813_v57 = vpop.permute.xlu1 %834  ;;  %v6815_v58 = vpop.permute.xlu0 %829 }
  0xbd   : > { %1934 = vperm.xlu1 %6290, %v4486_v55   ;;  %1929 = vperm.xlu0 %6289, %v4485_v56  }
  0xc0   : > { %v6823_v61 = vpop.permute.xlu1 %844  ;;  %v6825_v62 = vpop.permute.xlu0 %839 }
  0xc1   : > { %1944 = vperm.xlu1 %6290, %v4488_v59   ;;  %1939 = vperm.xlu0 %6289, %v4487_v60   ;;  %v4526_v59 = vld [vmem:[%s8262_s3 + $0x358] sm:$0xff]  ;;  %v4525_v60 = vld [vmem:[%s8262_s3 + $0x350] sm:$0xff] }
  0xc4   : > { %v6833_v1 = vpop.permute.xlu1 %854  ;;  %v6835_v2 = vpop.permute.xlu0 %849 }
  0xc5   : > { %1954 = vperm.xlu1 %6290, %v4490_v63   ;;  %1949 = vperm.xlu0 %6289, %v4489_v0  }
  0xc8   : > { %v6843_v5 = vpop.permute.xlu1 %864  ;;  %v6845_v6 = vpop.permute.xlu0 %859 }
  0xc9   : > { %1964 = vperm.xlu1 %6290, %v4492_v3   ;;  %1959 = vperm.xlu0 %6289, %v4491_v4   ;;  %v4528_v3 = vld [vmem:[%s8262_s3 + $0x368] sm:$0xff]  ;;  %v4527_v4 = vld [vmem:[%s8262_s3 + $0x360] sm:$0xff] }
  0xcc   : > { %v6853_v9 = vpop.permute.xlu1 %874  ;;  %v6855_v10 = vpop.permute.xlu0 %869 }
  0xcd   : > { %1974 = vperm.xlu1 %6290, %v4494_v7   ;;  %1969 = vperm.xlu0 %6289, %v4493_v8  }
  0xd0   : > { %v6863_v13 = vpop.permute.xlu1 %884  ;;  %v6865_v14 = vpop.permute.xlu0 %879 }
  0xd1   : > { %1984 = vperm.xlu1 %6290, %v4496_v11   ;;  %1979 = vperm.xlu0 %6289, %v4495_v12   ;;  %v4530_v11 = vld [vmem:[%s8262_s3 + $0x378] sm:$0xff]  ;;  %v4529_v12 = vld [vmem:[%s8262_s3 + $0x370] sm:$0xff] }
  0xd4   : > { %v6873_v17 = vpop.permute.xlu1 %894  ;;  %v6875_v18 = vpop.permute.xlu0 %889 }
  0xd5   : > { %1994 = vperm.xlu1 %6290, %v4498_v15   ;;  %1989 = vperm.xlu0 %6289, %v4497_v16  }
  0xd8   : > { %v6883_v23 = vpop.permute.xlu1 %1099  ;;  %v6885_v24 = vpop.permute.xlu0 %1094 }
  0xd9   : > { %2199 = vperm.xlu1 %6290, %v4516_v19   ;;  %2194 = vperm.xlu0 %6289, %v4515_v22  }
  0xdc   : > { %v6893_v31 = vpop.permute.xlu1 %1109  ;;  %v6895_v32 = vpop.permute.xlu0 %1104 }
  0xdd   : > { %2209 = vperm.xlu1 %6290, %v4518_v27   ;;  %2204 = vperm.xlu0 %6289, %v4517_v28  }
  0xe0   : > { %v6903_v39 = vpop.permute.xlu1 %1119  ;;  %v6905_v40 = vpop.permute.xlu0 %1114 }
  0xe1   : > { %2219 = vperm.xlu1 %6290, %v4520_v35   ;;  %2214 = vperm.xlu0 %6289, %v4519_v36   ;;  %v2611_v36 = vld [vmem:[%s8264_s5 + $0x8] sm:$0xff] }
  0xe4   : > { %v6913_v47 = vpop.permute.xlu1 %1129  ;;  %v6915_v48 = vpop.permute.xlu0 %1124 }
  0xe5   : > { %2229 = vperm.xlu1 %6290, %v4522_v43   ;;  %2224 = vperm.xlu0 %6289, %v4521_v44   ;;  %v2610_v43 = vld [vmem:[%s8264_s5] sm:$0xff] }
  0xe8   : > { %v6923_v55 = vpop.permute.xlu1 %1139  ;;  %v6925_v56 = vpop.permute.xlu0 %1134 }
  0xe9   : > { %2239 = vperm.xlu1 %6290, %v4524_v51   ;;  %2234 = vperm.xlu0 %6289, %v4523_v52  }
  0xec   : > { %v6933_v63 = vpop.permute.xlu1 %1149  ;;  %v6935_v0 = vpop.permute.xlu0 %1144 }
  0xed   : > { %2249 = vperm.xlu1 %6290, %v4526_v59   ;;  %2244 = vperm.xlu0 %6289, %v4525_v60  }
  0xf0   : > { %v6943_v7 = vpop.permute.xlu1 %1159  ;;  %v6945_v8 = vpop.permute.xlu0 %1154 }
  0xf1   : > { %2259 = vperm.xlu1 %6290, %v4528_v3   ;;  %2254 = vperm.xlu0 %6289, %v4527_v4  }
  0xf3   : > { %v5115_v15 = vpop.f32.mrb[0].mxu0 }
  0xf4   : > { %v753_v16 = vadd.f32 %v5115_v15, %v6735_v26  ;;  %v6954_v19 = vpop.permute.xlu1 %1169  ;;  %v6956_v22 = vpop.permute.xlu0 %1164 }
  0xf5   : > { %v497_v27 = vpop.f32.mrb[1].mxu0  ;;  %2269 = vperm.xlu1 %6290, %v4530_v11   ;;  %2264 = vperm.xlu0 %6289, %v4529_v12   ;;  %v2613_v11 = vld [vmem:[%s8264_s5 + $0x18] sm:$0xff] }
  0xf6   : > { %v769_v28 = vmax.f32 %v753_v16, 0.0  ;;  %v752_v35 = vadd.f32 %v6722_v21, %v497_v27 }
  0xf7   : > { %v5118_v44 = vpop.f32.mrb[2].mxu0 }
  0xf8   : > { %v768_v26 = vmax.f32 %v752_v35, 0.0  ;;  %v755_v51 = vadd.f32 %v5118_v44, %v6733_v25  ;;  %v6966_v52 = vpop.permute.xlu1 %1374  ;;  %v6968_v59 = vpop.permute.xlu0 %1369  ;;  %v2612_v25 = vld [vmem:[%s8264_s5 + $0x10] sm:$0xff]  ;;  %v2615_v44 = vld [vmem:[%s8264_s5 + $0x28] sm:$0xff] }
  0xf9   : > { %v507_v60 = vpop.f32.mrb[3].mxu0  ;;  %2633 = vperm.xlu1 %6290, %v2611_v36   ;;  %2628 = vperm.xlu0 %6289, %v2610_v43  }
  0xfa   : > { %v771_v21 = vmax.f32 %v755_v51, 0.0  ;;  %v754_v3 = vadd.f32 %v6720_v20, %v507_v60  ;;  %v5833_v4 = vpack.c.bf16 %v769_v28, %v768_v26 }
  0xfb   : > { %v5121_v12 = vpop.f32.mrb[4].mxu0 }
  0xfc   : > { %v770_v15 = vmax.f32 %v754_v3, 0.0  ;;  %v757_v16 = vadd.f32 %v5121_v12, %v6743_v29  ;;  %5834 = vmatprep.subr.bf16.mxu1 %v5833_v4  ;;  %v6978_v27 = vpop.permute.xlu1 %1384  ;;  %v6980_v35 = vpop.permute.xlu0 %1379  ;;  %v2614_v29 = vld [vmem:[%s8264_s5 + $0x20] sm:$0xff] }
  0xfd   : > { %v517_v36 = vpop.f32.mrb[5].mxu0  ;;  %5836 = vmatpush3.bf16.msra.mxu1 %v5833_v4  ;;  %2643 = vperm.xlu1 %6290, %v2613_v11  }
  0xfe   : > { %v5837_v20 = vpack.c.bf16 %v771_v21, %v770_v15  ;;  %v773_v28 = vmax.f32 %v757_v16, 0.0  ;;  %v756_v43 = vadd.f32 %v6745_v30, %v517_v36  ;;  %2638 = vperm.xlu0 %6289, %v2612_v25   ;;  %v2617_v25 = vld [vmem:[%s8264_s5 + $0x38] sm:$0xff] }
  0xff   : > { %v5124_v26 = vpop.f32.mrb[6].mxu0 }
 0x100   : > { %v772_v51 = vmax.f32 %v756_v43, 0.0  ;;  %v759_v60 = vadd.f32 %v5124_v26, %v6753_v33  ;;  %5838 = vmatprep.subr.bf16.mxu1 %v5837_v20  ;;  %v6990_v3 = vpop.permute.xlu1 %1394  ;;  %v6992_v21 = vpop.permute.xlu0 %1389  ;;  %v2616_v33 = vld [vmem:[%s8264_s5 + $0x30] sm:$0xff] }
 0x101   : > { %v527_v4 = vpop.f32.mrb[7].mxu0  ;;  %5840 = vmatpush3.bf16.msra.mxu1 %v5837_v20  ;;  %2653 = vperm.xlu1 %6290, %v2615_v44  }
 0x102   : > { %v5841_v30 = vpack.c.bf16 %v773_v28, %v772_v51  ;;  %v775_v11 = vmax.f32 %v759_v60, 0.0  ;;  %v758_v12 = vadd.f32 %v6755_v34, %v527_v4  ;;  %2648 = vperm.xlu0 %6289, %v2614_v29   ;;  %v2619_v29 = vld [vmem:[%s8264_s5 + $0x48] sm:$0xff] }
 0x103   : > { %v5127_v15 = vpop.f32.mrb[8].mxu0 }
 0x104   : > { %v774_v16 = vmax.f32 %v758_v12, 0.0  ;;  %v761_v36 = vadd.f32 %v5127_v15, %v6763_v37  ;;  %5842 = vmatprep.subr.bf16.mxu1 %v5841_v30  ;;  %v7002_v20 = vpop.permute.xlu1 %1404  ;;  %v7004_v28 = vpop.permute.xlu0 %1399  ;;  %v2618_v37 = vld [vmem:[%s8264_s5 + $0x40] sm:$0xff] }
 0x105   : > { %v537_v43 = vpop.f32.mrb[9].mxu0  ;;  %5844 = vmatpush3.bf16.msra.mxu1 %v5841_v30  ;;  %2663 = vperm.xlu1 %6290, %v2617_v25  }
 0x106   : > { %v5845_v34 = vpack.c.bf16 %v775_v11, %v774_v16  ;;  %v777_v44 = vmax.f32 %v761_v36, 0.0  ;;  %v760_v26 = vadd.f32 %v6765_v38, %v537_v43  ;;  %2658 = vperm.xlu0 %6289, %v2616_v33   ;;  %v2621_v33 = vld [vmem:[%s8264_s5 + $0x58] sm:$0xff] }
 0x107   : > { %v5130_v51 = vpop.f32.mrb[10].mxu0 }
 0x108   : > { %v776_v60 = vmax.f32 %v760_v26, 0.0  ;;  %v763_v4 = vadd.f32 %v5130_v51, %v6773_v41  ;;  %5846 = vmatprep.subr.bf16.mxu1 %v5845_v34  ;;  %v7014_v30 = vpop.permute.xlu1 %1414  ;;  %v547_v11 = vpop.f32.mrb[11].mxu0  ;;  %v2620_v41 = vld [vmem:[%s8264_s5 + $0x50] sm:$0xff] }
 0x109   : > { %5848 = vmatpush3.bf16.msra.mxu1 %v5845_v34  ;;  %2673 = vperm.xlu1 %6290, %v2619_v29   ;;  %v7016_v25 = vpop.permute.xlu0 %1409  ;;  %v762_v15 = vadd.f32 %v6775_v42, %v547_v11  ;;  %v2623_v29 = vld [vmem:[%s8264_s5 + $0x68] sm:$0xff] }
 0x10a   : > { %v5849_v38 = vpack.c.bf16 %v777_v44, %v776_v60  ;;  %v779_v12 = vmax.f32 %v763_v4, 0.0  ;;  %2668 = vperm.xlu0 %6289, %v2618_v37  }
 0x10b   : > { %v5133_v16 = vpop.f32.mrb[12].mxu0  ;;  %v778_v36 = vmax.f32 %v762_v15, 0.0 }
 0x10c   : > { %v765_v43 = vadd.f32 %v5133_v16, %v6783_v45  ;;  %5850 = vmatprep.subr.bf16.mxu1 %v5849_v38  ;;  %v557_v34 = vpop.f32.mrb[13].mxu0  ;;  %v7030_v51 = vpop.permute.xlu1 %1424  ;;  %v2622_v45 = vld [vmem:[%s8264_s5 + $0x60] sm:$0xff]  ;;  %v2624_v16 = vld [vmem:[%s8264_s5 + $0x70] sm:$0xff] }
 0x10d   : > { %5852 = vmatpush3.bf16.msra.mxu1 %v5849_v38  ;;  %2683 = vperm.xlu1 %6290, %v2621_v33   ;;  %v5853_v44 = vpack.c.bf16 %v779_v12, %v778_v36  ;;  %v764_v42 = vadd.f32 %v6785_v46, %v557_v34  ;;  %v7035_v60 = vpop.permute.xlu0 %1419  ;;  %v2625_v33 = vld [vmem:[%s8264_s5 + $0x78] sm:$0xff]  ;;  %v4547_v34 = vld [vmem:[%s8264_s5 + $0x80] sm:$0xff] }
 0x10e   : > { %v781_v26 = vmax.f32 %v765_v43, 0.0  ;;  %2678 = vperm.xlu0 %6289, %v2620_v41  }
 0x10f   : > { %v5136_v37 = vpop.f32.mrb[14].mxu0  ;;  %v780_v4 = vmax.f32 %v764_v42, 0.0  ;;  %5854 = vmatprep.subr.bf16.mxu1 %v5853_v44  ;;  %v786_v42 = vld [vmem:[%s8261_s2 + $0x10] sm:$0xff] }
 0x110   : > { %v767_v11 = vadd.f32 %v5136_v37, %v6793_v49  ;;  %v567_v38 = vpop.f32.mrb[15].mxu0  ;;  %v7045_v49 = vpop.permute.xlu1 %1434  ;;  %v4549_v37 = vld [vmem:[%s8264_s5 + $0x90] sm:$0xff] }
 0x111   : > { %5856 = vmatpush3.bf16.msra.mxu1 %v5853_v44  ;;  %2693 = vperm.xlu1 %6290, %v2623_v29   ;;  %v5857_v46 = vpack.c.bf16 %v781_v26, %v780_v4  ;;  %v766_v15 = vadd.f32 %v6795_v50, %v567_v38  ;;  %v7047_v36 = vpop.permute.xlu0 %1429  ;;  %v4548_v50 = vld [vmem:[%s8264_s5 + $0x88] sm:$0xff]  ;;  %v4550_v26 = vld [vmem:[%s8264_s5 + $0x98] sm:$0xff]  ;;  %v788_v38 = vld [vmem:[%s8261_s2 + $0x20] sm:$0xff] }
 0x112   : > { %v783_v12 = vmax.f32 %v767_v11, 0.0  ;;  %2688 = vperm.xlu0 %6289, %v2622_v45   ;;  %v785_v44 = vld [vmem:[%s8261_s2 + $0x8] sm:$0xff]  ;;  %v787_v4 = vld [vmem:[%s8261_s2 + $0x18] sm:$0xff] }
 0x113   : > { %v782_v41 = vmax.f32 %v766_v15, 0.0  ;;  %5858 = vmatprep.subr.bf16.mxu1 %v5857_v46  ;;  %v4552_v11 = vld [vmem:[%s8264_s5 + $0xa8] sm:$0xff] }
 0x114   : > { %v7064_v29 = vpop.permute.xlu1 %1444  ;;  %v789_v15 = vld [vmem:[%s8261_s2 + $0x28] sm:$0xff] }
 0x115   : > { %5860 = vmatpush3.bf16.msra.mxu1 %v5857_v46  ;;  %2703 = vperm.xlu1 %6290, %v2625_v33   ;;  %v5861_v43 = vpack.c.bf16 %v783_v12, %v782_v41  ;;  %v7069_v45 = vpop.permute.xlu0 %1439  ;;  %v4551_v46 = vld [vmem:[%s8264_s5 + $0xa0] sm:$0xff]  ;;  %v790_v41 = vld [vmem:[%s8261_s2 + $0x30] sm:$0xff] }
 0x116   : > { %2698 = vperm.xlu0 %6289, %v2624_v16   ;;  %v4554_v16 = vld [vmem:[%s8264_s5 + $0xb8] sm:$0xff] }
 0x117   : > { %5862 = vmatprep.subr.bf16.mxu1 %v5861_v43 }
 0x118   : > { %v7083_v12 = vpop.permute.xlu1 %1649 }
 0x119   : > { %5864 = vmatpush3.bf16.msra.mxu1 %v5861_v43  ;;  %2779 = vperm.xlu1 %6290, %v4548_v50   ;;  %8270 = vst [vmem:[#allocation6_spill] sm:$0xff] %v7083_v12  ;;  %v7088_v33 = vpop.permute.xlu0 %1644  ;;  %v4553_v43 = vld [vmem:[%s8264_s5 + $0xb0] sm:$0xff]  ;;  %v791_v50 = vld [vmem:[%s8261_s2 + $0x38] sm:$0xff] }
 0x11a   : > { %2774 = vperm.xlu0 %6289, %v4547_v34   ;;  %8271 = vst [vmem:[#allocation7_spill] sm:$0xff] %v7088_v33  ;;  %v4556_v34 = vld [vmem:[%s8264_s5 + $0xc8] sm:$0xff] }
 0x11c   : > { %5194 = vmatmul.mubr.f32.vlgmr.msra.gmra.mrb[0].mxu1 %v785_v44  ;;  %v792_v44 = vld [vmem:[%s8261_s2 + $0x40] sm:$0xff] }
 0x11d   : > { %2789 = vperm.xlu1 %6290, %v4550_v26   ;;  %5196 = vmatprep.mubr.f32.mxu1 %v786_v42  ;;  %v7108_v26 = vpop.permute.xlu1 %1659  ;;  %v4555_v42 = vld [vmem:[%s8264_s5 + $0xc0] sm:$0xff] }
 0x11e   : > { %2784 = vperm.xlu0 %6289, %v4549_v37   ;;  %8272 = vst [vmem:[#allocation8_spill] sm:$0xff] %v7108_v26  ;;  %v7113_v37 = vpop.permute.xlu0 %1654 }
 0x11f   : > { %8273 = vst [vmem:[#allocation9_spill] sm:$0xff] %v7113_v37 }
 0x120   : > { %5197 = vmatmul.mubr.f32.gmra.mrb[2].mxu1 %v787_v4  ;;  %v793_v4 = vld [vmem:[%s8261_s2 + $0x48] sm:$0xff] }
 0x121   : > { %2799 = vperm.xlu1 %6290, %v4552_v11   ;;  %5199 = vmatprep.mubr.f32.mxu1 %v788_v38  ;;  %v4558_v11 = vld [vmem:[%s8264_s5 + $0xd8] sm:$0xff]  ;;  %v794_v38 = vld [vmem:[%s8261_s2 + $0x50] sm:$0xff] }
 0x122   : > { %2794 = vperm.xlu0 %6289, %v4551_v46   ;;  %v4557_v46 = vld [vmem:[%s8264_s5 + $0xd0] sm:$0xff] }
 0x124   : > { %5200 = vmatmul.mubr.f32.gmra.mrb[4].mxu1 %v789_v15  ;;  %v7127_v15 = vpop.permute.xlu1 %1669 }
 0x125   : > { %2809 = vperm.xlu1 %6290, %v4554_v16   ;;  %5202 = vmatprep.mubr.f32.mxu1 %v790_v41  ;;  %8274 = vst [vmem:[#allocation10_spill] sm:$0xff] %v7127_v15  ;;  %v795_v16 = vld [vmem:[%s8261_s2 + $0x58] sm:$0xff]  ;;  %v7132_v41 = vpop.permute.xlu0 %1664 }
 0x126   : > { %2804 = vperm.xlu0 %6289, %v4553_v43   ;;  %8275 = vst [vmem:[#allocation11_spill] sm:$0xff] %v7132_v41  ;;  %v4560_v43 = vld [vmem:[%s8264_s5 + $0xe8] sm:$0xff] }
 0x128   : > { %5203 = vmatmul.mubr.f32.gmra.mrb[6].mxu1 %v791_v50  ;;  %v796_v50 = vld [vmem:[%s8261_s2 + $0x60] sm:$0xff] }
 0x129   : > { %2819 = vperm.xlu1 %6290, %v4556_v34   ;;  %5205 = vmatprep.mubr.f32.mxu1 %v792_v44  ;;  %v4559_v34 = vld [vmem:[%s8264_s5 + $0xe0] sm:$0xff]  ;;  %v797_v44 = vld [vmem:[%s8261_s2 + $0x68] sm:$0xff] }
 0x12a   : > { %2814 = vperm.xlu0 %6289, %v4555_v42   ;;  %v4562_v42 = vld [vmem:[%s8264_s5 + $0xf8] sm:$0xff] }
 0x12c   : > { %5206 = vmatmul.mubr.f32.gmra.mrb[8].mxu1 %v793_v4  ;;  %v798_v4 = vld [vmem:[%s8261_s2 + $0x70] sm:$0xff] }
 0x12d   : > { %2829 = vperm.xlu1 %6290, %v4558_v11   ;;  %5208 = vmatprep.mubr.f32.mxu1 %v794_v38  ;;  %v7152_v11 = vpop.permute.xlu1 %1679  ;;  %v4561_v38 = vld [vmem:[%s8264_s5 + $0xf0] sm:$0xff] }
 0x12e   : > { %2824 = vperm.xlu0 %6289, %v4557_v46   ;;  %8276 = vst [vmem:[#allocation12_spill] sm:$0xff] %v7152_v11  ;;  %v7157_v46 = vpop.permute.xlu0 %1674 }
 0x12f   : > { %8277 = vst [vmem:[#allocation13_spill] sm:$0xff] %v7157_v46 }
 0x130   : > { %5209 = vmatmul.mubr.f32.gmra.mrb[10].mxu1 %v795_v16  ;;  %v799_v16 = vld [vmem:[%s8261_s2 + $0x78] sm:$0xff] }
 0x131   : > { %2839 = vperm.xlu1 %6290, %v4560_v43   ;;  %5211 = vmatprep.mubr.f32.mxu1 %v796_v50  ;;  %v4580_v43 = vld [vmem:[%s8264_s5 + $0x108] sm:$0xff]  ;;  %v4579_v50 = vld [vmem:[%s8264_s5 + $0x100] sm:$0xff] }
 0x132   : > { %2834 = vperm.xlu0 %6289, %v4559_v34   ;;  %v7168_v34 = vpop.permute.xlu1 %1689 }
 0x133   : > { %8278 = vst [vmem:[#allocation14_spill] sm:$0xff] %v7168_v34 }
 0x134   : > { %5212 = vmatmul.mubr.f32.gmra.mrb[12].mxu1 %v797_v44  ;;  %v7170_v44 = vpop.permute.xlu0 %1684 }
 0x135   : > { %2849 = vperm.xlu1 %6290, %v4562_v42   ;;  %5214 = vmatprep.mubr.f32.mxu1 %v798_v4  ;;  %8279 = vst [vmem:[#allocation15_spill] sm:$0xff] %v7170_v44  ;;  %v4582_v42 = vld [vmem:[%s8264_s5 + $0x118] sm:$0xff]  ;;  %v4581_v4 = vld [vmem:[%s8264_s5 + $0x110] sm:$0xff] }
 0x136   : > { %2844 = vperm.xlu0 %6289, %v4561_v38   ;;  %v4584_v38 = vld [vmem:[%s8264_s5 + $0x128] sm:$0xff]  ;;  %v4586_v44 = vld [vmem:[%s8264_s5 + $0x138] sm:$0xff] }
 0x138   : > { %5215 = vmatmul.mubr.f32.gmra.mrb[14].mxu1 %v799_v16  ;;  %v7181_v16 = vpop.permute.xlu1 %1699 }
 0x139   : > { %3054 = vperm.xlu1 %6290, %v4580_v43   ;;  %8280 = vst [vmem:[#allocation16_spill] sm:$0xff] %v7181_v16  ;;  %v4583_v43 = vld [vmem:[%s8264_s5 + $0x120] sm:$0xff] }
 0x13a   : > { %3049 = vperm.xlu0 %6289, %v4579_v50   ;;  %v7186_v50 = vpop.permute.xlu0 %1694 }
 0x13b   : > { %8281 = vst [vmem:[#allocation17_spill] sm:$0xff] %v7186_v50  ;;  %v4588_v50 = vld [vmem:[%s8264_s5 + $0x148] sm:$0xff] }
 0x13d   : > { %3064 = vperm.xlu1 %6290, %v4582_v42   ;;  %v4585_v42 = vld [vmem:[%s8264_s5 + $0x130] sm:$0xff] }
 0x13e   : > { %3059 = vperm.xlu0 %6289, %v4581_v4   ;;  %v7194_v4 = vpop.permute.xlu1 %1709  ;;  %v7196_v16 = vpop.permute.xlu0 %1704 }
 0x13f   : > { %8282 = vst [vmem:[#allocation18_spill] sm:$0xff] %v7194_v4  ;;  %8283 = vst [vmem:[#allocation19_spill] sm:$0xff] %v7196_v16  ;;  %v4592_v16 = vld [vmem:[%s8264_s5 + $0x168] sm:$0xff] }
 0x141   : > { %3074 = vperm.xlu1 %6290, %v4584_v38   ;;  %v4587_v38 = vld [vmem:[%s8264_s5 + $0x140] sm:$0xff] }
 0x142   : > { %3069 = vperm.xlu0 %6289, %v4583_v43   ;;  %v4590_v43 = vld [vmem:[%s8264_s5 + $0x158] sm:$0xff]  ;;  %v7207_v34 = vpop.permute.xlu1 %1719 }
 0x143   : > { %8284 = vst [vmem:[#allocation20_spill] sm:$0xff] %v7207_v34 }
 0x145   : > { %3084 = vperm.xlu1 %6290, %v4586_v44   ;;  %v4589_v44 = vld [vmem:[%s8264_s5 + $0x150] sm:$0xff] }
 0x146   : > { %3079 = vperm.xlu0 %6289, %v4585_v42   ;;  %v7212_v42 = vpop.permute.xlu0 %1714 }
 0x147   : > { %8285 = vst [vmem:[#allocation21_spill] sm:$0xff] %v7212_v42  ;;  %v4594_v42 = vld [vmem:[%s8264_s5 + $0x178] sm:$0xff] }
 0x149   : > { %3094 = vperm.xlu1 %6290, %v4588_v50   ;;  %v4591_v50 = vld [vmem:[%s8264_s5 + $0x160] sm:$0xff] }
 0x14a   : > { %3089 = vperm.xlu0 %6289, %v4587_v38   ;;  %v7220_v38 = vpop.permute.xlu1 %1924  ;;  %v7222_v34 = vpop.permute.xlu0 %1919 }
 0x14b   : > { %8286 = vst [vmem:[#allocation22_spill] sm:$0xff] %v7220_v38  ;;  %8287 = vst [vmem:[#allocation23_spill] sm:$0xff] %v7222_v34  ;;  %v4614_v34 = vld [vmem:[%s8264_s5 + $0x198] sm:$0xff] }
 0x14d   : > { %3104 = vperm.xlu1 %6290, %v4590_v43   ;;  %v4593_v43 = vld [vmem:[%s8264_s5 + $0x170] sm:$0xff] }
 0x14e   : > { %3099 = vperm.xlu0 %6289, %v4589_v44   ;;  %v4612_v44 = vld [vmem:[%s8264_s5 + $0x188] sm:$0xff]  ;;  %v7233_v4 = vpop.permute.xlu1 %1934 }
 0x14f   : > { %8288 = vst [vmem:[#allocation24_spill] sm:$0xff] %v7233_v4 }
 0x151   : > { %3114 = vperm.xlu1 %6290, %v4592_v16   ;;  %v4611_v16 = vld [vmem:[%s8264_s5 + $0x180] sm:$0xff] }
 0x152   : > { %3109 = vperm.xlu0 %6289, %v4591_v50   ;;  %v7238_v50 = vpop.permute.xlu0 %1929 }
 0x153   : > { %8289 = vst [vmem:[#allocation25_spill] sm:$0xff] %v7238_v50  ;;  %v4616_v50 = vld [vmem:[%s8264_s5 + $0x1a8] sm:$0xff] }
 0x155   : > { %3124 = vperm.xlu1 %6290, %v4594_v42   ;;  %v4613_v42 = vld [vmem:[%s8264_s5 + $0x190] sm:$0xff] }
 0x156   : > { %3119 = vperm.xlu0 %6289, %v4593_v43   ;;  %v7246_v43 = vpop.permute.xlu1 %1944  ;;  %v7248_v4 = vpop.permute.xlu0 %1939 }
 0x157   : > { %8290 = vst [vmem:[#allocation26_spill] sm:$0xff] %v7246_v43  ;;  %8291 = vst [vmem:[#allocation27_spill] sm:$0xff] %v7248_v4  ;;  %v4620_v4 = vld [vmem:[%s8264_s5 + $0x1c8] sm:$0xff] }
 0x159   : > { %3329 = vperm.xlu1 %6290, %v4612_v44   ;;  %v4615_v44 = vld [vmem:[%s8264_s5 + $0x1a0] sm:$0xff] }
 0x15a   : > { %3324 = vperm.xlu0 %6289, %v4611_v16   ;;  %v4618_v16 = vld [vmem:[%s8264_s5 + $0x1b8] sm:$0xff]  ;;  %v7259_v38 = vpop.permute.xlu1 %1954 }
 0x15b   : > { %8292 = vst [vmem:[#allocation28_spill] sm:$0xff] %v7259_v38 }
 0x15d   : > { %3339 = vperm.xlu1 %6290, %v4614_v34   ;;  %v4617_v34 = vld [vmem:[%s8264_s5 + $0x1b0] sm:$0xff] }
 0x15e   : > { %3334 = vperm.xlu0 %6289, %v4613_v42   ;;  %v7264_v42 = vpop.permute.xlu0 %1949 }
 0x15f   : > { %8293 = vst [vmem:[#allocation29_spill] sm:$0xff] %v7264_v42  ;;  %v4622_v42 = vld [vmem:[%s8264_s5 + $0x1d8] sm:$0xff] }
 0x161   : > { %3349 = vperm.xlu1 %6290, %v4616_v50   ;;  %v4619_v50 = vld [vmem:[%s8264_s5 + $0x1c0] sm:$0xff] }
 0x162   : > { %3344 = vperm.xlu0 %6289, %v4615_v44   ;;  %v7272_v44 = vpop.permute.xlu1 %1964  ;;  %v7274_v38 = vpop.permute.xlu0 %1959 }
 0x163   : > { %8294 = vst [vmem:[#allocation30_spill] sm:$0xff] %v7272_v44  ;;  %8295 = vst [vmem:[#allocation31_spill] sm:$0xff] %v7274_v38  ;;  %v4626_v38 = vld [vmem:[%s8264_s5 + $0x1f8] sm:$0xff] }
 0x165   : > { %3359 = vperm.xlu1 %6290, %v4618_v16   ;;  %v4621_v16 = vld [vmem:[%s8264_s5 + $0x1d0] sm:$0xff] }
 0x166   : > { %3354 = vperm.xlu0 %6289, %v4617_v34   ;;  %v4624_v34 = vld [vmem:[%s8264_s5 + $0x1e8] sm:$0xff]  ;;  %v7285_v43 = vpop.permute.xlu1 %1974 }
 0x167   : > { %8296 = vst [vmem:[#allocation32_spill] sm:$0xff] %v7285_v43 }
 0x169   : > { %3369 = vperm.xlu1 %6290, %v4620_v4   ;;  %v4623_v4 = vld [vmem:[%s8264_s5 + $0x1e0] sm:$0xff] }
 0x16a   : > { %3364 = vperm.xlu0 %6289, %v4619_v50   ;;  %v7290_v50 = vpop.permute.xlu0 %1969 }
 0x16b   : > { %8297 = vst [vmem:[#allocation33_spill] sm:$0xff] %v7290_v50  ;;  %v4644_v50 = vld [vmem:[%s8264_s5 + $0x208] sm:$0xff] }
 0x16d   : > { %3379 = vperm.xlu1 %6290, %v4622_v42   ;;  %v4625_v42 = vld [vmem:[%s8264_s5 + $0x1f0] sm:$0xff] }
 0x16e   : > { %3374 = vperm.xlu0 %6289, %v4621_v16   ;;  %v7298_v16 = vpop.permute.xlu1 %1984  ;;  %v7300_v43 = vpop.permute.xlu0 %1979 }
 0x16f   : > { %8298 = vst [vmem:[#allocation34_spill] sm:$0xff] %v7298_v16  ;;  %8299 = vst [vmem:[#allocation35_spill] sm:$0xff] %v7300_v43  ;;  %v4648_v43 = vld [vmem:[%s8264_s5 + $0x228] sm:$0xff] }
 0x171   : > { %3389 = vperm.xlu1 %6290, %v4624_v34   ;;  %v4643_v34 = vld [vmem:[%s8264_s5 + $0x200] sm:$0xff] }
 0x172   : > { %3384 = vperm.xlu0 %6289, %v4623_v4   ;;  %v4646_v4 = vld [vmem:[%s8264_s5 + $0x218] sm:$0xff]  ;;  %v7311_v44 = vpop.permute.xlu1 %1994 }
 0x173   : > { %8300 = vst [vmem:[#allocation36_spill] sm:$0xff] %v7311_v44 }
 0x175   : > { %3399 = vperm.xlu1 %6290, %v4626_v38   ;;  %v4645_v38 = vld [vmem:[%s8264_s5 + $0x210] sm:$0xff] }
 0x176   : > { %3394 = vperm.xlu0 %6289, %v4625_v42   ;;  %v7316_v42 = vpop.permute.xlu0 %1989 }
 0x177   : > { %8301 = vst [vmem:[#allocation37_spill] sm:$0xff] %v7316_v42  ;;  %v4650_v42 = vld [vmem:[%s8264_s5 + $0x238] sm:$0xff] }
 0x179   : > { %3604 = vperm.xlu1 %6290, %v4644_v50   ;;  %v4647_v50 = vld [vmem:[%s8264_s5 + $0x220] sm:$0xff] }
 0x17a   : > { %3599 = vperm.xlu0 %6289, %v4643_v34   ;;  %v7324_v34 = vpop.permute.xlu1 %2199  ;;  %v7326_v44 = vpop.permute.xlu0 %2194 }
 0x17b   : > { %8302 = vst [vmem:[#allocation38_spill] sm:$0xff] %v7324_v34  ;;  %8303 = vst [vmem:[#allocation39_spill] sm:$0xff] %v7326_v44  ;;  %v4654_v44 = vld [vmem:[%s8264_s5 + $0x258] sm:$0xff] }
 0x17d   : > { %3614 = vperm.xlu1 %6290, %v4646_v4   ;;  %v4649_v4 = vld [vmem:[%s8264_s5 + $0x230] sm:$0xff] }
 0x17e   : > { %3609 = vperm.xlu0 %6289, %v4645_v38   ;;  %v4652_v38 = vld [vmem:[%s8264_s5 + $0x248] sm:$0xff]  ;;  %v7337_v16 = vpop.permute.xlu1 %2209 }
 0x17f   : > { %8304 = vst [vmem:[#allocation40_spill] sm:$0xff] %v7337_v16 }
 0x181   : > { %3624 = vperm.xlu1 %6290, %v4648_v43   ;;  %v4651_v43 = vld [vmem:[%s8264_s5 + $0x240] sm:$0xff] }
 0x182   : > { %3619 = vperm.xlu0 %6289, %v4647_v50   ;;  %v7342_v50 = vpop.permute.xlu0 %2204 }
 0x183   : > { %8305 = vst [vmem:[#allocation41_spill] sm:$0xff] %v7342_v50  ;;  %v4656_v50 = vld [vmem:[%s8264_s5 + $0x268] sm:$0xff] }
 0x185   : > { %3634 = vperm.xlu1 %6290, %v4650_v42   ;;  %v4653_v42 = vld [vmem:[%s8264_s5 + $0x250] sm:$0xff] }
 0x186   : > { %3629 = vperm.xlu0 %6289, %v4649_v4   ;;  %v7350_v4 = vpop.permute.xlu1 %2219  ;;  %v7352_v16 = vpop.permute.xlu0 %2214 }
 0x187   : > { %8306 = vst [vmem:[#allocation42_spill] sm:$0xff] %v7350_v4  ;;  %8307 = vst [vmem:[#allocation43_spill] sm:$0xff] %v7352_v16  ;;  %v4371_v16 = vld [vmem:[%s8261_s2 + $0x80] sm:$0xff] }
 0x188   : > { %5249 = vmatprep.mubr.f32.mxu1 %v4371_v16  ;;  %v4114_v16 = vld [vmem:[%s8265_s6 + $0x8] sm:$0xff] }
 0x189   : > { %3644 = vperm.xlu1 %6290, %v4652_v38   ;;  %v4655_v38 = vld [vmem:[%s8264_s5 + $0x260] sm:$0xff] }
 0x18a   : > { %3639 = vperm.xlu0 %6289, %v4651_v43   ;;  %v4658_v43 = vld [vmem:[%s8264_s5 + $0x278] sm:$0xff]  ;;  %v7363_v34 = vpop.permute.xlu1 %2229 }
 0x18b   : > { %8308 = vst [vmem:[#allocation44_spill] sm:$0xff] %v7363_v34 }
 0x18d   : > { %3654 = vperm.xlu1 %6290, %v4654_v44   ;;  %v4657_v44 = vld [vmem:[%s8264_s5 + $0x270] sm:$0xff] }
 0x18e   : > { %3649 = vperm.xlu0 %6289, %v4653_v42   ;;  %v7368_v42 = vpop.permute.xlu0 %2224  ;;  %v7379_v34 = vpop.permute.xlu1 %2239 }
 0x18f   : > { %8309 = vst [vmem:[#allocation45_spill] sm:$0xff] %v7368_v42  ;;  %8310 = vst [vmem:[#allocation46_spill] sm:$0xff] %v7379_v34 }
 0x191   : > { %3664 = vperm.xlu1 %6290, %v4656_v50   ;;  %v4676_v50 = vld [vmem:[%s8264_s5 + $0x288] sm:$0xff] }
 0x192   : > { %3659 = vperm.xlu0 %6289, %v4655_v38   ;;  %v4675_v38 = vld [vmem:[%s8264_s5 + $0x280] sm:$0xff]  ;;  %v7381_v4 = vpop.permute.xlu0 %2234  ;;  %v7392_v42 = vpop.permute.xlu1 %2249 }
 0x193   : > { %8311 = vst [vmem:[#allocation47_spill] sm:$0xff] %v7381_v4  ;;  %8312 = vst [vmem:[#allocation48_spill] sm:$0xff] %v7392_v42  ;;  %v4115_v4 = vld [vmem:[%s8265_s6 + $0x10] sm:$0xff] }
 0x195   : > { %3674 = vperm.xlu1 %6290, %v4658_v43   ;;  %v4678_v43 = vld [vmem:[%s8264_s5 + $0x298] sm:$0xff] }
 0x196   : > { %3669 = vperm.xlu0 %6289, %v4657_v44   ;;  %v4677_v44 = vld [vmem:[%s8264_s5 + $0x290] sm:$0xff] }
 0x199   : > { %3879 = vperm.xlu1 %6290, %v4676_v50   ;;  %v4113_v50 = vld [vmem:[%s8265_s6] sm:$0xff] }
 0x19a   : > { %3874 = vperm.xlu0 %6289, %v4675_v38   ;;  %v7397_v38 = vpop.permute.xlu0 %2244 }
 0x19b   : > { %8313 = vst [vmem:[#allocation49_spill] sm:$0xff] %v7397_v38  ;;  %v4116_v38 = vld [vmem:[%s8265_s6 + $0x18] sm:$0xff] }
 0x19d   : > { %3889 = vperm.xlu1 %6290, %v4678_v43   ;;  %v4679_v43 = vld [vmem:[%s8264_s5 + $0x2a0] sm:$0xff] }
 0x19e   : > { %3884 = vperm.xlu0 %6289, %v4677_v44   ;;  %v7405_v44 = vpop.permute.xlu1 %2259  ;;  %v7407_v42 = vpop.permute.xlu0 %2254 }
 0x19f   : > { %8314 = vst [vmem:[#allocation50_spill] sm:$0xff] %v7405_v44  ;;  %8315 = vst [vmem:[#allocation51_spill] sm:$0xff] %v7407_v42  ;;  %v4118_v42 = vld [vmem:[%s8265_s6 + $0x28] sm:$0xff] }
 0x1a1   : > { %4136 = vperm.xlu1 %6290, %v4114_v16   ;;  %v4680_v16 = vld [vmem:[%s8264_s5 + $0x2a8] sm:$0xff] }
 0x1a2   : > { %4131 = vperm.xlu0 %6289, %v4113_v50   ;;  %v4117_v50 = vld [vmem:[%s8265_s6 + $0x20] sm:$0xff]  ;;  %v7418_v34 = vpop.permute.xlu1 %2269 }
 0x1a3   : > { %8316 = vst [vmem:[#allocation52_spill] sm:$0xff] %v7418_v34 }
 0x1a5   : > { %4141 = vperm.xlu1 %6290, %v4115_v4   ;;  %v4681_v4 = vld [vmem:[%s8264_s5 + $0x2b0] sm:$0xff] }
 0x1a6   : > { %3894 = vperm.xlu0 %6289, %v4679_v43   ;;  %v7423_v43 = vpop.permute.xlu0 %2264 }
 0x1a7   : > { %8317 = vst [vmem:[#allocation53_spill] sm:$0xff] %v7423_v43  ;;  %v4119_v43 = vld [vmem:[%s8265_s6 + $0x30] sm:$0xff] }
 0x1a9   : > { %4146 = vperm.xlu1 %6290, %v4116_v38   ;;  %v4682_v38 = vld [vmem:[%s8264_s5 + $0x2b8] sm:$0xff] }
 0x1aa   : > { %3899 = vperm.xlu0 %6289, %v4680_v16   ;;  %v7431_v16 = vpop.permute.xlu1 %2633  ;;  %v7433_v34 = vpop.permute.xlu0 %2628 }
 0x1ab   : > { %8318 = vst [vmem:[#allocation54_spill] sm:$0xff] %v7431_v16  ;;  %8319 = vst [vmem:[#allocation55_spill] sm:$0xff] %v7433_v34  ;;  %v4121_v34 = vld [vmem:[%s8265_s6 + $0x40] sm:$0xff] }
 0x1ad   : > { %4151 = vperm.xlu1 %6290, %v4117_v50   ;;  %v4683_v50 = vld [vmem:[%s8264_s5 + $0x2c0] sm:$0xff] }
 0x1ae   : > { %3904 = vperm.xlu0 %6289, %v4681_v4   ;;  %v4120_v4 = vld [vmem:[%s8265_s6 + $0x38] sm:$0xff]  ;;  %v7444_v44 = vpop.permute.xlu1 %2643 }
 0x1af   : > { %8320 = vst [vmem:[#allocation56_spill] sm:$0xff] %v7444_v44 }
 0x1b1   : > { %4156 = vperm.xlu1 %6290, %v4118_v42   ;;  %v4684_v42 = vld [vmem:[%s8264_s5 + $0x2c8] sm:$0xff] }
 0x1b2   : > { %3909 = vperm.xlu0 %6289, %v4682_v38   ;;  %v7449_v38 = vpop.permute.xlu0 %2638 }
 0x1b3   : > { %8321 = vst [vmem:[#allocation57_spill] sm:$0xff] %v7449_v38  ;;  %v4122_v38 = vld [vmem:[%s8265_s6 + $0x48] sm:$0xff] }
 0x1b5   : > { %4161 = vperm.xlu1 %6290, %v4119_v43   ;;  %v4685_v43 = vld [vmem:[%s8264_s5 + $0x2d0] sm:$0xff] }
 0x1b6   : > { %3914 = vperm.xlu0 %6289, %v4683_v50   ;;  %v7457_v50 = vpop.permute.xlu1 %2653  ;;  %v7459_v44 = vpop.permute.xlu0 %2648 }
 0x1b7   : > { %8322 = vst [vmem:[#allocation58_spill] sm:$0xff] %v7457_v50  ;;  %8323 = vst [vmem:[#allocation59_spill] sm:$0xff] %v7459_v44  ;;  %v4124_v44 = vld [vmem:[%s8265_s6 + $0x58] sm:$0xff] }
 0x1b9   : > { %4166 = vperm.xlu1 %6290, %v4120_v4   ;;  %v4686_v4 = vld [vmem:[%s8264_s5 + $0x2d8] sm:$0xff] }
 0x1ba   : > { %3919 = vperm.xlu0 %6289, %v4684_v42   ;;  %v4123_v42 = vld [vmem:[%s8265_s6 + $0x50] sm:$0xff]  ;;  %v7470_v16 = vpop.permute.xlu1 %2663 }
 0x1bb   : > { %8324 = vst [vmem:[#allocation60_spill] sm:$0xff] %v7470_v16 }
 0x1bd   : > { %4171 = vperm.xlu1 %6290, %v4121_v34   ;;  %v4687_v34 = vld [vmem:[%s8264_s5 + $0x2e0] sm:$0xff] }
 0x1be   : > { %3924 = vperm.xlu0 %6289, %v4685_v43   ;;  %v7475_v43 = vpop.permute.xlu0 %2658 }
 0x1bf   : > { %8325 = vst [vmem:[#allocation61_spill] sm:$0xff] %v7475_v43  ;;  %v4125_v43 = vld [vmem:[%s8265_s6 + $0x60] sm:$0xff] }
 0x1c1   : > { %4176 = vperm.xlu1 %6290, %v4122_v38   ;;  %v4688_v38 = vld [vmem:[%s8264_s5 + $0x2e8] sm:$0xff] }
 0x1c2   : > { %3929 = vperm.xlu0 %6289, %v4686_v4   ;;  %v7483_v4 = vpop.permute.xlu1 %2673  ;;  %v7485_v16 = vpop.permute.xlu0 %2668 }
 0x1c3   : > { %8326 = vst [vmem:[#allocation62_spill] sm:$0xff] %v7483_v4  ;;  %8327 = vst [vmem:[#allocation63_spill] sm:$0xff] %v7485_v16  ;;  %v4128_v16 = vld [vmem:[%s8265_s6 + $0x78] sm:$0xff] }
 0x1c5   : > { %4181 = vperm.xlu1 %6290, %v4123_v42   ;;  %v4689_v42 = vld [vmem:[%s8264_s5 + $0x2f0] sm:$0xff] }
 0x1c6   : > { %3934 = vperm.xlu0 %6289, %v4687_v34   ;;  %v4126_v34 = vld [vmem:[%s8265_s6 + $0x68] sm:$0xff]  ;;  %v7496_v50 = vpop.permute.xlu1 %2683 }
 0x1c7   : > { %8328 = vst [vmem:[#allocation64_spill] sm:$0xff] %v7496_v50 }
 0x1c9   : > { %4186 = vperm.xlu1 %6290, %v4124_v44   ;;  %v4690_v44 = vld [vmem:[%s8264_s5 + $0x2f8] sm:$0xff] }
 0x1ca   : > { %3939 = vperm.xlu0 %6289, %v4688_v38   ;;  %v7501_v38 = vpop.permute.xlu0 %2678 }
 0x1cb   : > { %8329 = vst [vmem:[#allocation65_spill] sm:$0xff] %v7501_v38 }
 0x1cd   : > { %4191 = vperm.xlu1 %6290, %v4125_v43   ;;  %v4127_v43 = vld [vmem:[%s8265_s6 + $0x70] sm:$0xff] }
 0x1ce   : > { %3944 = vperm.xlu0 %6289, %v4689_v42   ;;  %v7509_v42 = vpop.permute.xlu1 %2693  ;;  %v7511_v50 = vpop.permute.xlu0 %2688 }
 0x1cf   : > { %8330 = vst [vmem:[#allocation66_spill] sm:$0xff] %v7509_v42  ;;  %8331 = vst [vmem:[#allocation67_spill] sm:$0xff] %v7511_v50 }
 0x1d1   : > { %4196 = vperm.xlu1 %6290, %v4126_v34  }
 0x1d2   : > { %3949 = vperm.xlu0 %6289, %v4690_v44  }
 0x1d5   : > { %4206 = vperm.xlu1 %6290, %v4128_v16  }
 0x1d6   : > { %4201 = vperm.xlu0 %6289, %v4127_v43  }
 0x1ef   : > { %v5195_v4 = vpop.f32.mrb[0].mxu1 }
 0x1f0   : > { %v969_v46 = vadd.f32 %v5195_v4, %v6803_v53  ;;  %v963_v38 = vpop.f32.mrb[1].mxu1 }
 0x1f1   : > { %v964_v34 = vadd.f32 %v963_v38, %v6805_v54 }
 0x1f2   : > { %v1043_v44 = vmax.f32 %v969_v46, 0.0 }
 0x1f3   : > { %v1042_v11 = vmax.f32 %v964_v34, 0.0  ;;  %v5198_v41 = vpop.f32.mrb[2].mxu1 }
 0x1f4   : > { %v979_v15 = vadd.f32 %v5198_v41, %v6813_v57  ;;  %v973_v37 = vpop.f32.mrb[3].mxu1 }
 0x1f5   : > { %v5865_v26 = vpack.c.bf16 %v1043_v44, %v1042_v11  ;;  %v974_v33 = vadd.f32 %v973_v37, %v6815_v58 }
 0x1f6   : > { %v1045_v42 = vmax.f32 %v979_v15, 0.0 }
 0x1f7   : > { %v1044_v16 = vmax.f32 %v974_v33, 0.0  ;;  %v5201_v12 = vpop.f32.mrb[4].mxu1  ;;  %5866 = vmatprep.subr.bf16.mxu1 %v5865_v26 }
 0x1f8   : > { %v989_v43 = vadd.f32 %v5201_v12, %v6823_v61  ;;  %v983_v50 = vpop.f32.mrb[5].mxu1  ;;  %5868 = vmatpush3.bf16.msra.mxu1 %v5865_v26 }
 0x1f9   : > { %v5869_v53 = vpack.c.bf16 %v1045_v42, %v1044_v16  ;;  %v984_v54 = vadd.f32 %v983_v50, %v6825_v62 }
 0x1fa   : > { %v1047_v46 = vmax.f32 %v989_v43, 0.0 }
 0x1fb   : > { %v1046_v4 = vmax.f32 %v984_v54, 0.0  ;;  %v5204_v38 = vpop.f32.mrb[6].mxu1  ;;  %5870 = vmatprep.subr.bf16.mxu1 %v5869_v53 }
 0x1fc   : > { %v999_v57 = vadd.f32 %v5204_v38, %v6833_v1  ;;  %v993_v41 = vpop.f32.mrb[7].mxu1  ;;  %5872 = vmatpush3.bf16.msra.mxu1 %v5869_v53 }
 0x1fd   : > { %v5873_v58 = vpack.c.bf16 %v1047_v46, %v1046_v4  ;;  %v994_v33 = vadd.f32 %v993_v41, %v6835_v2 }
 0x1fe   : > { %v1049_v37 = vmax.f32 %v999_v57, 0.0 }
 0x1ff   : > { %v1048_v15 = vmax.f32 %v994_v33, 0.0  ;;  %v5207_v11 = vpop.f32.mrb[8].mxu1  ;;  %5874 = vmatprep.subr.bf16.mxu1 %v5873_v58 }
 0x200   : > { %v1009_v61 = vadd.f32 %v5207_v11, %v6843_v5  ;;  %v1003_v12 = vpop.f32.mrb[9].mxu1  ;;  %5876 = vmatpush3.bf16.msra.mxu1 %v5873_v58  ;;  %v4375_v11 = vld [vmem:[%s8261_s2 + $0xa0] sm:$0xff] }
 0x201   : > { %v5877_v62 = vpack.c.bf16 %v1049_v37, %v1048_v15  ;;  %v1004_v26 = vadd.f32 %v1003_v12, %v6845_v6  ;;  %v4377_v12 = vld [vmem:[%s8261_s2 + $0xb0] sm:$0xff] }
 0x202   : > { %v1051_v50 = vmax.f32 %v1009_v61, 0.0  ;;  %v4376_v61 = vld [vmem:[%s8261_s2 + $0xa8] sm:$0xff] }
 0x203   : > { %v1050_v42 = vmax.f32 %v1004_v26, 0.0  ;;  %v5210_v34 = vpop.f32.mrb[10].mxu1  ;;  %5878 = vmatprep.subr.bf16.mxu1 %v5877_v62  ;;  %v4379_v26 = vld [vmem:[%s8261_s2 + $0xc0] sm:$0xff] }
 0x204   : > { %v1019_v1 = vadd.f32 %v5210_v34, %v6853_v9  ;;  %v1013_v44 = vpop.f32.mrb[11].mxu1  ;;  %5880 = vmatpush3.bf16.msra.mxu1 %v5877_v62  ;;  %v4378_v62 = vld [vmem:[%s8261_s2 + $0xb8] sm:$0xff] }
 0x205   : > { %v5881_v2 = vpack.c.bf16 %v1051_v50, %v1050_v42  ;;  %v1014_v16 = vadd.f32 %v1013_v44, %v6855_v10  ;;  %v4380_v50 = vld [vmem:[%s8261_s2 + $0xc8] sm:$0xff]  ;;  %v4381_v42 = vld [vmem:[%s8261_s2 + $0xd0] sm:$0xff]  ;;  %v4382_v34 = vld [vmem:[%s8261_s2 + $0xd8] sm:$0xff] }
 0x206   : > { %v1053_v43 = vmax.f32 %v1019_v1, 0.0  ;;  %v4383_v1 = vld [vmem:[%s8261_s2 + $0xe0] sm:$0xff]  ;;  %v4384_v44 = vld [vmem:[%s8261_s2 + $0xe8] sm:$0xff] }
 0x207   : > { %v1052_v53 = vmax.f32 %v1014_v16, 0.0  ;;  %v5213_v54 = vpop.f32.mrb[12].mxu1  ;;  %5882 = vmatprep.subr.bf16.mxu1 %v5881_v2  ;;  %v4386_v16 = vld [vmem:[%s8261_s2 + $0xf8] sm:$0xff] }
 0x208   : > { %v1029_v5 = vadd.f32 %v5213_v54, %v6863_v13  ;;  %v1023_v46 = vpop.f32.mrb[13].mxu1  ;;  %5884 = vmatpush3.bf16.msra.mxu1 %v5881_v2  ;;  %v4385_v2 = vld [vmem:[%s8261_s2 + $0xf0] sm:$0xff] }
 0x209   : > { %v5885_v6 = vpack.c.bf16 %v1053_v43, %v1052_v53  ;;  %v1024_v4 = vadd.f32 %v1023_v46, %v6865_v14  ;;  %v4372_v14 = vld [vmem:[%s8261_s2 + $0x88] sm:$0xff]  ;;  %v318_v43 = vld [vmem:[%s8260_s1 + $0x80] sm:$0xff]  ;;  %v320_v54 = vld [vmem:[%s8260_s1 + $0x90] sm:$0xff] }
 0x20a   : > { %v1055_v38 = vmax.f32 %v1029_v5, 0.0  ;;  %5137 = vmatprep.mubr.msk.f32.mxu0 %vm334_vm0, %v318_v43  ;;  %v319_v53 = vld [vmem:[%s8260_s1 + $0x88] sm:$0xff]  ;;  %v321_v5 = vld [vmem:[%s8260_s1 + $0x98] sm:$0xff]  ;;  %v322_v46 = vld [vmem:[%s8260_s1 + $0xa0] sm:$0xff] }
 0x20b   : > { %v1054_v57 = vmax.f32 %v1024_v4, 0.0  ;;  %v5216_v41 = vpop.f32.mrb[14].mxu1  ;;  %5886 = vmatprep.subr.bf16.mxu1 %v5885_v6  ;;  %5138 = vmatmul.mubr.msk.f32.gmra.mrb[16].mxu0 %vm334_vm0, %v319_v53  ;;  %v324_v4 = vld [vmem:[%s8260_s1 + $0xb0] sm:$0xff] }
 0x20c   : > { %v1039_v9 = vadd.f32 %v5216_v41, %v6873_v17  ;;  %v1033_v58 = vpop.f32.mrb[15].mxu1  ;;  %5888 = vmatpush3.bf16.msra.mxu1 %v5885_v6  ;;  %v4373_v17 = vld [vmem:[%s8261_s2 + $0x90] sm:$0xff]  ;;  %5140 = vmatprep.mubr.msk.f32.mxu0 %vm334_vm0, %v320_v54  ;;  %v323_v6 = vld [vmem:[%s8260_s1 + $0xa8] sm:$0xff] }
 0x20d   : > { %v5889_v10 = vpack.c.bf16 %v1055_v38, %v1054_v57  ;;  %v1034_v33 = vadd.f32 %v1033_v58, %v6875_v18  ;;  %v4374_v18 = vld [vmem:[%s8261_s2 + $0x98] sm:$0xff]  ;;  %v326_v57 = vld [vmem:[%s8260_s1 + $0xc0] sm:$0xff]  ;;  %v327_v41 = vld [vmem:[%s8260_s1 + $0xc8] sm:$0xff] }
 0x20e   : > { %v1057_v37 = vmax.f32 %v1039_v9, 0.0  ;;  %v325_v38 = vld [vmem:[%s8260_s1 + $0xb8] sm:$0xff]  ;;  %v328_v9 = vld [vmem:[%s8260_s1 + $0xd0] sm:$0xff] }
 0x20f   : > { %v1056_v15 = vmax.f32 %v1034_v33, 0.0  ;;  %5890 = vmatprep.subr.bf16.mxu1 %v5889_v10  ;;  %5141 = vmatmul.mubr.msk.f32.gmra.mrb[18].mxu0 %vm334_vm0, %v321_v5  ;;  %v329_v58 = vld [vmem:[%s8260_s1 + $0xd8] sm:$0xff]  ;;  %v331_v33 = vld [vmem:[%s8260_s1 + $0xe8] sm:$0xff] }
 0x210   : > { %5892 = vmatpush3.bf16.msra.mxu1 %v5889_v10  ;;  %5143 = vmatprep.mubr.msk.f32.mxu0 %vm334_vm0, %v322_v46  ;;  %v330_v10 = vld [vmem:[%s8260_s1 + $0xe0] sm:$0xff] }
 0x211   : > { %v5893_v13 = vpack.c.bf16 %v1057_v37, %v1056_v15  ;;  %v332_v37 = vld [vmem:[%s8260_s1 + $0xf0] sm:$0xff]  ;;  %v333_v15 = vld [vmem:[%s8260_s1 + $0xf8] sm:$0xff] }
 0x213   : > { %5894 = vmatprep.subr.bf16.mxu1 %v5893_v13  ;;  %5144 = vmatmul.mubr.msk.f32.gmra.mrb[20].mxu0 %vm334_vm0, %v323_v6 }
 0x214   : > { %5896 = vmatpush3.bf16.msra.mxu1 %v5893_v13  ;;  %5146 = vmatprep.mubr.msk.f32.mxu0 %vm334_vm0, %v324_v4  ;;  %v4403_v13 = vld [vmem:[%s8261_s2 + $0x100] sm:$0xff] }
 0x217   : > { %5250 = vmatmul.mubr.f32.vlgmr.msra.gmra.mrb[16].mxu1 %v4372_v14  ;;  %5147 = vmatmul.mubr.msk.f32.gmra.mrb[22].mxu0 %vm334_vm0, %v325_v38 }
 0x218   : > { %5252 = vmatprep.mubr.f32.mxu1 %v4373_v17  ;;  %5149 = vmatprep.mubr.msk.f32.mxu0 %vm334_vm0, %v326_v57 }
 0x21b   : > { %5253 = vmatmul.mubr.f32.gmra.mrb[18].mxu1 %v4374_v18  ;;  %5150 = vmatmul.mubr.msk.f32.gmra.mrb[24].mxu0 %vm334_vm0, %v327_v41 }
 0x21c   : > { %5255 = vmatprep.mubr.f32.mxu1 %v4375_v11  ;;  %5152 = vmatprep.mubr.msk.f32.mxu0 %vm334_vm0, %v328_v9 }
 0x21f   : > { %5256 = vmatmul.mubr.f32.gmra.mrb[20].mxu1 %v4376_v61  ;;  %5153 = vmatmul.mubr.msk.f32.gmra.mrb[26].mxu0 %vm334_vm0, %v329_v58 }
 0x220   : > { %5258 = vmatprep.mubr.f32.mxu1 %v4377_v12  ;;  %5155 = vmatprep.mubr.msk.f32.mxu0 %vm334_vm0, %v330_v10 }
 0x223   : > { %5259 = vmatmul.mubr.f32.gmra.mrb[22].mxu1 %v4378_v62  ;;  %5156 = vmatmul.mubr.msk.f32.gmra.mrb[28].mxu0 %vm334_vm0, %v331_v33 }
 0x224   : > { %5261 = vmatprep.mubr.f32.mxu1 %v4379_v26  ;;  %5158 = vmatprep.mubr.msk.f32.mxu0 %vm334_vm0, %v332_v37 }
 0x227   : > { %5262 = vmatmul.mubr.f32.gmra.mrb[24].mxu1 %v4380_v50  ;;  %5159 = vmatmul.mubr.msk.f32.gmra.mrb[30].mxu0 %vm334_vm0, %v333_v15 }
 0x228   : > { %5264 = vmatprep.mubr.f32.mxu1 %v4381_v42  ;;  %5305 = vmatprep.mubr.f32.mxu0 %v4403_v13 }
 0x22b   : > { %5265 = vmatmul.mubr.f32.gmra.mrb[26].mxu1 %v4382_v34 }
 0x22c   : > { %5267 = vmatprep.mubr.f32.mxu1 %v4383_v1 }
 0x22f   : > { %5268 = vmatmul.mubr.f32.gmra.mrb[28].mxu1 %v4384_v44 }
 0x230   : > { %5270 = vmatprep.mubr.f32.mxu1 %v4385_v2 }
 0x233   : > { %5271 = vmatmul.mubr.f32.gmra.mrb[30].mxu1 %v4386_v16 }
 0x2ea   : > { %v5251_v14 = vpop.f32.mrb[16].mxu1 }
 0x2eb   : > { %v1244_v17 = vadd.f32 %v5251_v14, %v6883_v23  ;;  %v1238_v18 = vpop.f32.mrb[17].mxu1 }
 0x2ec   : > { %v1239_v11 = vadd.f32 %v1238_v18, %v6885_v24 }
 0x2ed   : > { %v1318_v61 = vmax.f32 %v1244_v17, 0.0 }
 0x2ee   : > { %v1317_v12 = vmax.f32 %v1239_v11, 0.0  ;;  %v5254_v62 = vpop.f32.mrb[18].mxu1 }
 0x2ef   : > { %v1254_v26 = vadd.f32 %v5254_v62, %v6893_v31  ;;  %v1248_v50 = vpop.f32.mrb[19].mxu1 }
 0x2f0   : > { %v5897_v42 = vpack.c.bf16 %v1318_v61, %v1317_v12  ;;  %v1249_v34 = vadd.f32 %v1248_v50, %v6895_v32 }
 0x2f1   : > { %v1320_v1 = vmax.f32 %v1254_v26, 0.0 }
 0x2f2   : > { %v1319_v44 = vmax.f32 %v1249_v34, 0.0  ;;  %v5257_v2 = vpop.f32.mrb[20].mxu1  ;;  %5898 = vmatprep.subr.bf16.mxu0 %v5897_v42 }
 0x2f3   : > { %v1264_v16 = vadd.f32 %v5257_v2, %v6903_v39  ;;  %v1258_v43 = vpop.f32.mrb[21].mxu1  ;;  %5900 = vmatpush3.bf16.msra.mxu0 %v5897_v42  ;;  %v4409_v2 = vld [vmem:[%s8261_s2 + $0x130] sm:$0xff] }
 0x2f4   : > { %v5901_v23 = vpack.c.bf16 %v1320_v1, %v1319_v44  ;;  %v1259_v24 = vadd.f32 %v1258_v43, %v6905_v40  ;;  %v4407_v1 = vld [vmem:[%s8261_s2 + $0x120] sm:$0xff]  ;;  %v4408_v44 = vld [vmem:[%s8261_s2 + $0x128] sm:$0xff] }
 0x2f5   : > { %v1322_v53 = vmax.f32 %v1264_v16, 0.0  ;;  %v4410_v16 = vld [vmem:[%s8261_s2 + $0x138] sm:$0xff]  ;;  %v4411_v43 = vld [vmem:[%s8261_s2 + $0x140] sm:$0xff] }
 0x2f6   : > { %v1321_v54 = vmax.f32 %v1259_v24, 0.0  ;;  %v5260_v5 = vpop.f32.mrb[22].mxu1  ;;  %5902 = vmatprep.subr.bf16.mxu0 %v5901_v23  ;;  %v4413_v24 = vld [vmem:[%s8261_s2 + $0x150] sm:$0xff] }
 0x2f7   : > { %v1274_v31 = vadd.f32 %v5260_v5, %v6913_v47  ;;  %v1268_v46 = vpop.f32.mrb[23].mxu1  ;;  %5904 = vmatpush3.bf16.msra.mxu0 %v5901_v23  ;;  %v4412_v23 = vld [vmem:[%s8261_s2 + $0x148] sm:$0xff] }
 0x2f8   : > { %v5905_v32 = vpack.c.bf16 %v1322_v53, %v1321_v54  ;;  %v1269_v6 = vadd.f32 %v1268_v46, %v6915_v48  ;;  %v4414_v53 = vld [vmem:[%s8261_s2 + $0x158] sm:$0xff]  ;;  %v4415_v54 = vld [vmem:[%s8261_s2 + $0x160] sm:$0xff]  ;;  %v4416_v5 = vld [vmem:[%s8261_s2 + $0x168] sm:$0xff] }
 0x2f9   : > { %v1324_v4 = vmax.f32 %v1274_v31, 0.0  ;;  %v4417_v31 = vld [vmem:[%s8261_s2 + $0x170] sm:$0xff]  ;;  %v4418_v46 = vld [vmem:[%s8261_s2 + $0x178] sm:$0xff] }
 0x2fa   : > { %v1323_v38 = vmax.f32 %v1269_v6, 0.0  ;;  %v5263_v57 = vpop.f32.mrb[24].mxu1  ;;  %5906 = vmatprep.subr.bf16.mxu0 %v5905_v32 }
 0x2fb   : > { %v1284_v39 = vadd.f32 %v5263_v57, %v6923_v55  ;;  %v1278_v41 = vpop.f32.mrb[25].mxu1  ;;  %5908 = vmatpush3.bf16.msra.mxu0 %v5905_v32  ;;  %v4435_v32 = vld [vmem:[%s8261_s2 + $0x180] sm:$0xff] }
 0x2fc   : > { %v5909_v40 = vpack.c.bf16 %v1324_v4, %v1323_v38  ;;  %v1279_v9 = vadd.f32 %v1278_v41, %v6925_v56  ;;  %5361 = vmatprep.mubr.f32.mxu1 %v4435_v32  ;;  %v4443_v32 = vld [vmem:[%s8261_s2 + $0x1c0] sm:$0xff] }
 0x2fd   : > { %v1326_v58 = vmax.f32 %v1284_v39, 0.0 }
 0x2fe   : > { %v1325_v10 = vmax.f32 %v1279_v9, 0.0  ;;  %v5266_v33 = vpop.f32.mrb[26].mxu1  ;;  %5910 = vmatprep.subr.bf16.mxu0 %v5909_v40 }
 0x2ff   : > { %v1294_v47 = vadd.f32 %v5266_v33, %v6933_v63  ;;  %v1288_v37 = vpop.f32.mrb[27].mxu1  ;;  %5912 = vmatpush3.bf16.msra.mxu0 %v5909_v40 }
 0x300   : > { %v5913_v48 = vpack.c.bf16 %v1326_v58, %v1325_v10  ;;  %v1289_v15 = vadd.f32 %v1288_v37, %v6935_v0 }
 0x301   : > { %v1328_v13 = vmax.f32 %v1294_v47, 0.0 }
 0x302   : > { %v1327_v14 = vmax.f32 %v1289_v15, 0.0  ;;  %v5269_v17 = vpop.f32.mrb[28].mxu1  ;;  %5914 = vmatprep.subr.bf16.mxu0 %v5913_v48 }
 0x303   : > { %v1304_v55 = vadd.f32 %v5269_v17, %v6943_v7  ;;  %v1298_v18 = vpop.f32.mrb[29].mxu1  ;;  %5916 = vmatpush3.bf16.msra.mxu0 %v5913_v48 }
 0x304   : > { %v5917_v56 = vpack.c.bf16 %v1328_v13, %v1327_v14  ;;  %v1299_v11 = vadd.f32 %v1298_v18, %v6945_v8  ;;  %v4404_v8 = vld [vmem:[%s8261_s2 + $0x108] sm:$0xff] }
 0x305   : > { %v1330_v61 = vmax.f32 %v1304_v55, 0.0 }
 0x306   : > { %v1329_v12 = vmax.f32 %v1299_v11, 0.0  ;;  %v5272_v62 = vpop.f32.mrb[30].mxu1  ;;  %5918 = vmatprep.subr.bf16.mxu0 %v5917_v56 }
 0x307   : > { %v1314_v63 = vadd.f32 %v5272_v62, %v6954_v19  ;;  %v1308_v26 = vpop.f32.mrb[31].mxu1  ;;  %5920 = vmatpush3.bf16.msra.mxu0 %v5917_v56  ;;  %v4405_v19 = vld [vmem:[%s8261_s2 + $0x110] sm:$0xff] }
 0x308   : > { %v5921_v0 = vpack.c.bf16 %v1330_v61, %v1329_v12  ;;  %v1309_v50 = vadd.f32 %v1308_v26, %v6956_v22  ;;  %v4406_v22 = vld [vmem:[%s8261_s2 + $0x118] sm:$0xff] }
 0x309   : > { %v1332_v42 = vmax.f32 %v1314_v63, 0.0 }
 0x30a   : > { %v1331_v34 = vmax.f32 %v1309_v50, 0.0  ;;  %5922 = vmatprep.subr.bf16.mxu0 %v5921_v0 }
 0x30b   : > { %5924 = vmatpush3.bf16.msra.mxu0 %v5921_v0 }
 0x30c   : > { %v5925_v7 = vpack.c.bf16 %v1332_v42, %v1331_v34 }
 0x30e   : > { %5926 = vmatprep.subr.bf16.mxu0 %v5925_v7 }
 0x30f   : > { %5928 = vmatpush3.bf16.msra.mxu0 %v5925_v7 }
 0x312   : > { %5306 = vmatmul.mubr.f32.vlgmr.msra.gmra.mrb[32].mxu0 %v4404_v8 }
 0x313   : > { %5308 = vmatprep.mubr.f32.mxu0 %v4405_v19 }
 0x316   : > { %5309 = vmatmul.mubr.f32.gmra.mrb[34].mxu0 %v4406_v22 }
 0x317   : > { %5311 = vmatprep.mubr.f32.mxu0 %v4407_v1 }
 0x31a   : > { %5312 = vmatmul.mubr.f32.gmra.mrb[36].mxu0 %v4408_v44 }
 0x31b   : > { %5314 = vmatprep.mubr.f32.mxu0 %v4409_v2 }
 0x31e   : > { %5315 = vmatmul.mubr.f32.gmra.mrb[38].mxu0 %v4410_v16 }
 0x31f   : > { %5317 = vmatprep.mubr.f32.mxu0 %v4411_v43 }
 0x322   : > { %5318 = vmatmul.mubr.f32.gmra.mrb[40].mxu0 %v4412_v23 }
 0x323   : > { %5320 = vmatprep.mubr.f32.mxu0 %v4413_v24 }
 0x326   : > { %5321 = vmatmul.mubr.f32.gmra.mrb[42].mxu0 %v4414_v53 }
 0x327   : > { %5323 = vmatprep.mubr.f32.mxu0 %v4415_v54  ;;  %v4439_v54 = vld [vmem:[%s8261_s2 + $0x1a0] sm:$0xff] }
 0x32a   : > { %5324 = vmatmul.mubr.f32.gmra.mrb[44].mxu0 %v4416_v5  ;;  %v4440_v5 = vld [vmem:[%s8261_s2 + $0x1a8] sm:$0xff] }
 0x32b   : > { %5326 = vmatprep.mubr.f32.mxu0 %v4417_v31  ;;  %v4441_v31 = vld [vmem:[%s8261_s2 + $0x1b0] sm:$0xff] }
 0x32e   : > { %5327 = vmatmul.mubr.f32.gmra.mrb[46].mxu0 %v4418_v46  ;;  %v4442_v46 = vld [vmem:[%s8261_s2 + $0x1b8] sm:$0xff] }
 0x3e5   : > { %v5307_v6 = vpop.f32.mrb[32].mxu0 }
 0x3e6   : > { %v1519_v4 = vadd.f32 %v5307_v6, %v6966_v52  ;;  %v1513_v38 = vpop.f32.mrb[33].mxu0  ;;  %v4444_v6 = vld [vmem:[%s8261_s2 + $0x1c8] sm:$0xff] }
 0x3e7   : > { %v1514_v57 = vadd.f32 %v1513_v38, %v6968_v59  ;;  %v4446_v38 = vld [vmem:[%s8261_s2 + $0x1d8] sm:$0xff] }
 0x3e8   : > { %v1593_v39 = vmax.f32 %v1519_v4, 0.0  ;;  %v4445_v4 = vld [vmem:[%s8261_s2 + $0x1d0] sm:$0xff] }
 0x3e9   : > { %v1592_v41 = vmax.f32 %v1514_v57, 0.0  ;;  %v5310_v40 = vpop.f32.mrb[34].mxu0  ;;  %v4447_v57 = vld [vmem:[%s8261_s2 + $0x1e0] sm:$0xff] }
 0x3ea   : > { %v1529_v9 = vadd.f32 %v5310_v40, %v6978_v27  ;;  %v1523_v58 = vpop.f32.mrb[35].mxu0  ;;  %v4450_v40 = vld [vmem:[%s8261_s2 + $0x1f8] sm:$0xff] }
 0x3eb   : > { %v5929_v10 = vpack.c.bf16 %v1593_v39, %v1592_v41  ;;  %v1524_v33 = vadd.f32 %v1523_v58, %v6980_v35  ;;  %v4448_v39 = vld [vmem:[%s8261_s2 + $0x1e8] sm:$0xff]  ;;  %v4449_v41 = vld [vmem:[%s8261_s2 + $0x1f0] sm:$0xff] }
 0x3ec   : > { %v1595_v47 = vmax.f32 %v1529_v9, 0.0  ;;  %v4467_v9 = vld [vmem:[%s8261_s2 + $0x200] sm:$0xff] }
 0x3ed   : > { %v1594_v37 = vmax.f32 %v1524_v33, 0.0  ;;  %v5313_v48 = vpop.f32.mrb[36].mxu0  ;;  %5930 = vmatprep.subr.bf16.mxu1 %v5929_v10  ;;  %5417 = vmatprep.mubr.f32.mxu0 %v4467_v9  ;;  %v8346_v9 = vld [vmem:[#allocation20_spill] sm:$0xff] }
 0x3ee   : > { %v1539_v15 = vadd.f32 %v5313_v48, %v6990_v3  ;;  %v1533_v13 = vpop.f32.mrb[37].mxu0  ;;  %5932 = vmatpush3.bf16.msra.mxu1 %v5929_v10  ;;  %v8332_v10 = vld [vmem:[#allocation6_spill] sm:$0xff] }
 0x3ef   : > { %v5933_v52 = vpack.c.bf16 %v1595_v47, %v1594_v37  ;;  %v1534_v59 = vadd.f32 %v1533_v13, %v6992_v21  ;;  %v8333_v37 = vld [vmem:[#allocation7_spill] sm:$0xff] }
 0x3f0   : > { %v1597_v14 = vmax.f32 %v1539_v15, 0.0 }
 0x3f1   : > { %v1596_v17 = vmax.f32 %v1534_v59, 0.0  ;;  %v5316_v55 = vpop.f32.mrb[38].mxu0  ;;  %5934 = vmatprep.subr.bf16.mxu1 %v5933_v52  ;;  %v8334_v59 = vld [vmem:[#allocation8_spill] sm:$0xff] }
 0x3f2   : > { %v1549_v27 = vadd.f32 %v5316_v55, %v7002_v20  ;;  %v1543_v18 = vpop.f32.mrb[39].mxu0  ;;  %5936 = vmatpush3.bf16.msra.mxu1 %v5933_v52 }
 0x3f3   : > { %v5937_v35 = vpack.c.bf16 %v1597_v14, %v1596_v17  ;;  %v1544_v56 = vadd.f32 %v1543_v18, %v7004_v28 }
 0x3f4   : > { %v1599_v11 = vmax.f32 %v1549_v27, 0.0  ;;  %v8335_v27 = vld [vmem:[#allocation9_spill] sm:$0xff] }
 0x3f5   : > { %v1598_v61 = vmax.f32 %v1544_v56, 0.0  ;;  %v5319_v12 = vpop.f32.mrb[40].mxu0  ;;  %5938 = vmatprep.subr.bf16.mxu1 %v5937_v35 }
 0x3f6   : > { %v1559_v3 = vadd.f32 %v5319_v12, %v7014_v30  ;;  %v1553_v62 = vpop.f32.mrb[41].mxu0  ;;  %5940 = vmatpush3.bf16.msra.mxu1 %v5937_v35 }
 0x3f7   : > { %v5941_v21 = vpack.c.bf16 %v1599_v11, %v1598_v61  ;;  %v1554_v63 = vadd.f32 %v1553_v62, %v7016_v25  ;;  %v8336_v61 = vld [vmem:[#allocation10_spill] sm:$0xff] }
 0x3f8   : > { %v1601_v26 = vmax.f32 %v1559_v3, 0.0 }
 0x3f9   : > { %v1600_v0 = vmax.f32 %v1554_v63, 0.0  ;;  %v5322_v50 = vpop.f32.mrb[42].mxu0  ;;  %5942 = vmatprep.subr.bf16.mxu1 %v5941_v21 }
 0x3fa   : > { %v1569_v20 = vadd.f32 %v5322_v50, %v7030_v51  ;;  %v1563_v42 = vpop.f32.mrb[43].mxu0  ;;  %5944 = vmatpush3.bf16.msra.mxu1 %v5941_v21  ;;  %v8337_v21 = vld [vmem:[#allocation11_spill] sm:$0xff] }
 0x3fb   : > { %v5945_v28 = vpack.c.bf16 %v1601_v26, %v1600_v0  ;;  %v1564_v34 = vadd.f32 %v1563_v42, %v7035_v60 }
 0x3fc   : > { %v1603_v7 = vmax.f32 %v1569_v20, 0.0  ;;  %v8338_v20 = vld [vmem:[#allocation12_spill] sm:$0xff] }
 0x3fd   : > { %v1602_v8 = vmax.f32 %v1564_v34, 0.0  ;;  %v5325_v19 = vpop.f32.mrb[44].mxu0  ;;  %5946 = vmatprep.subr.bf16.mxu1 %v5945_v28 }
 0x3fe   : > { %v1579_v30 = vadd.f32 %v5325_v19, %v7045_v49  ;;  %v1573_v22 = vpop.f32.mrb[45].mxu0  ;;  %5948 = vmatpush3.bf16.msra.mxu1 %v5945_v28 }
 0x3ff   : > { %v5949_v25 = vpack.c.bf16 %v1603_v7, %v1602_v8  ;;  %v1574_v1 = vadd.f32 %v1573_v22, %v7047_v36  ;;  %v4436_v36 = vld [vmem:[%s8261_s2 + $0x188] sm:$0xff]  ;;  %v8339_v7 = vld [vmem:[#allocation13_spill] sm:$0xff] }
 0x400   : > { %v1605_v44 = vmax.f32 %v1579_v30, 0.0 }
 0x401   : > { %v1604_v2 = vmax.f32 %v1574_v1, 0.0  ;;  %v5328_v16 = vpop.f32.mrb[46].mxu0  ;;  %5950 = vmatprep.subr.bf16.mxu1 %v5949_v25 }
 0x402   : > { %v1589_v51 = vadd.f32 %v5328_v16, %v7064_v29  ;;  %v1583_v43 = vpop.f32.mrb[47].mxu0  ;;  %5952 = vmatpush3.bf16.msra.mxu1 %v5949_v25  ;;  %v4437_v29 = vld [vmem:[%s8261_s2 + $0x190] sm:$0xff]  ;;  %v8340_v25 = vld [vmem:[#allocation14_spill] sm:$0xff] }
 0x403   : > { %v5953_v60 = vpack.c.bf16 %v1605_v44, %v1604_v2  ;;  %v1584_v23 = vadd.f32 %v1583_v43, %v7069_v45  ;;  %v4438_v45 = vld [vmem:[%s8261_s2 + $0x198] sm:$0xff]  ;;  %v8341_v16 = vld [vmem:[#allocation15_spill] sm:$0xff] }
 0x404   : > { %v1607_v24 = vmax.f32 %v1589_v51, 0.0 }
 0x405   : > { %v1606_v53 = vmax.f32 %v1584_v23, 0.0  ;;  %5954 = vmatprep.subr.bf16.mxu1 %v5953_v60 }
 0x406   : > { %5956 = vmatpush3.bf16.msra.mxu1 %v5953_v60 }
 0x407   : > { %v5957_v49 = vpack.c.bf16 %v1607_v24, %v1606_v53  ;;  %v8342_v24 = vld [vmem:[#allocation16_spill] sm:$0xff] }
 0x409   : > { %5958 = vmatprep.subr.bf16.mxu1 %v5957_v49 }
 0x40a   : > { %5960 = vmatpush3.bf16.msra.mxu1 %v5957_v49 }
 0x40d   : > { %5362 = vmatmul.mubr.f32.vlgmr.msra.gmra.mrb[32].mxu1 %v4436_v36 }
 0x40e   : > { %5364 = vmatprep.mubr.f32.mxu1 %v4437_v29  ;;  %v8343_v29 = vld [vmem:[#allocation17_spill] sm:$0xff] }
 0x411   : > { %5365 = vmatmul.mubr.f32.gmra.mrb[34].mxu1 %v4438_v45 }
 0x412   : > { %5367 = vmatprep.mubr.f32.mxu1 %v4439_v54 }
 0x415   : > { %5368 = vmatmul.mubr.f32.gmra.mrb[36].mxu1 %v4440_v5 }
 0x416   : > { %5370 = vmatprep.mubr.f32.mxu1 %v4441_v31 }
 0x419   : > { %5371 = vmatmul.mubr.f32.gmra.mrb[38].mxu1 %v4442_v46  ;;  %v8344_v46 = vld [vmem:[#allocation18_spill] sm:$0xff] }
 0x41a   : > { %5373 = vmatprep.mubr.f32.mxu1 %v4443_v32 }
 0x41d   : > { %5374 = vmatmul.mubr.f32.gmra.mrb[40].mxu1 %v4444_v6 }
 0x41e   : > { %5376 = vmatprep.mubr.f32.mxu1 %v4445_v4 }
 0x421   : > { %5377 = vmatmul.mubr.f32.gmra.mrb[42].mxu1 %v4446_v38  ;;  %v8345_v38 = vld [vmem:[#allocation19_spill] sm:$0xff] }
 0x422   : > { %5379 = vmatprep.mubr.f32.mxu1 %v4447_v57 }
 0x425   : > { %5380 = vmatmul.mubr.f32.gmra.mrb[44].mxu1 %v4448_v39 }
 0x426   : > { %5382 = vmatprep.mubr.f32.mxu1 %v4449_v41 }
 0x429   : > { %5383 = vmatmul.mubr.f32.gmra.mrb[46].mxu1 %v4450_v40 }
 0x4e0   : > { %v5363_v58 = vpop.f32.mrb[32].mxu1 }
 0x4e1   : > { %v1794_v33 = vadd.f32 %v5363_v58, %v8332_v10  ;;  %v1788_v47 = vpop.f32.mrb[33].mxu1 }
 0x4e2   : > { %v1789_v48 = vadd.f32 %v1788_v47, %v8333_v37  ;;  %v8347_v47 = vld [vmem:[#allocation21_spill] sm:$0xff] }
 0x4e3   : > { %v1868_v15 = vmax.f32 %v1794_v33, 0.0 }
 0x4e4   : > { %v1867_v13 = vmax.f32 %v1789_v48, 0.0  ;;  %v5366_v52 = vpop.f32.mrb[34].mxu1 }
 0x4e5   : > { %v1804_v14 = vadd.f32 %v5366_v52, %v8334_v59  ;;  %v1798_v17 = vpop.f32.mrb[35].mxu1  ;;  %v4468_v52 = vld [vmem:[%s8261_s2 + $0x208] sm:$0xff]  ;;  %v4469_v59 = vld [vmem:[%s8261_s2 + $0x210] sm:$0xff] }
 0x4e6   : > { %v5961_v55 = vpack.c.bf16 %v1868_v15, %v1867_v13  ;;  %v1799_v18 = vadd.f32 %v1798_v17, %v8335_v27  ;;  %v4471_v17 = vld [vmem:[%s8261_s2 + $0x220] sm:$0xff]  ;;  %v4473_v27 = vld [vmem:[%s8261_s2 + $0x230] sm:$0xff] }
 0x4e7   : > { %v1870_v35 = vmax.f32 %v1804_v14, 0.0  ;;  %v4470_v14 = vld [vmem:[%s8261_s2 + $0x218] sm:$0xff] }
 0x4e8   : > { %v1869_v56 = vmax.f32 %v1799_v18, 0.0  ;;  %v5369_v11 = vpop.f32.mrb[36].mxu1  ;;  %5962 = vmatprep.subr.bf16.mxu0 %v5961_v55  ;;  %v4474_v18 = vld [vmem:[%s8261_s2 + $0x238] sm:$0xff] }
 0x4e9   : > { %v1814_v12 = vadd.f32 %v5369_v11, %v8336_v61  ;;  %v1808_v3 = vpop.f32.mrb[37].mxu1  ;;  %5964 = vmatpush3.bf16.msra.mxu0 %v5961_v55  ;;  %v4472_v55 = vld [vmem:[%s8261_s2 + $0x228] sm:$0xff]  ;;  %v4477_v11 = vld [vmem:[%s8261_s2 + $0x250] sm:$0xff]  ;;  %v4478_v61 = vld [vmem:[%s8261_s2 + $0x258] sm:$0xff] }
 0x4ea   : > { %v5965_v62 = vpack.c.bf16 %v1870_v35, %v1869_v56  ;;  %v1809_v63 = vadd.f32 %v1808_v3, %v8337_v21  ;;  %v4475_v35 = vld [vmem:[%s8261_s2 + $0x240] sm:$0xff]  ;;  %v4476_v56 = vld [vmem:[%s8261_s2 + $0x248] sm:$0xff]  ;;  %v4482_v21 = vld [vmem:[%s8261_s2 + $0x278] sm:$0xff] }
 0x4eb   : > { %v1872_v26 = vmax.f32 %v1814_v12, 0.0  ;;  %v4479_v12 = vld [vmem:[%s8261_s2 + $0x260] sm:$0xff]  ;;  %v4480_v3 = vld [vmem:[%s8261_s2 + $0x268] sm:$0xff] }
 0x4ec   : > { %v1871_v0 = vmax.f32 %v1809_v63, 0.0  ;;  %v5372_v50 = vpop.f32.mrb[38].mxu1  ;;  %5966 = vmatprep.subr.bf16.mxu0 %v5965_v62  ;;  %v4499_v63 = vld [vmem:[%s8261_s2 + $0x280] sm:$0xff] }
 0x4ed   : > { %v1824_v42 = vadd.f32 %v5372_v50, %v8338_v20  ;;  %v1818_v28 = vpop.f32.mrb[39].mxu1  ;;  %5968 = vmatpush3.bf16.msra.mxu0 %v5965_v62  ;;  %v4481_v62 = vld [vmem:[%s8261_s2 + $0x270] sm:$0xff]  ;;  %5473 = vmatprep.mubr.f32.mxu1 %v4499_v63 }
 0x4ee   : > { %v5969_v34 = vpack.c.bf16 %v1872_v26, %v1871_v0  ;;  %v1819_v8 = vadd.f32 %v1818_v28, %v8339_v7  ;;  %v8348_v0 = vld [vmem:[#allocation22_spill] sm:$0xff]  ;;  %v8362_v63 = vld [vmem:[#allocation36_spill] sm:$0xff] }
 0x4ef   : > { %v1874_v19 = vmax.f32 %v1824_v42, 0.0  ;;  %v8349_v42 = vld [vmem:[#allocation23_spill] sm:$0xff] }
 0x4f0   : > { %v1873_v30 = vmax.f32 %v1819_v8, 0.0  ;;  %v5375_v22 = vpop.f32.mrb[40].mxu1  ;;  %5970 = vmatprep.subr.bf16.mxu0 %v5969_v34 }
 0x4f1   : > { %v1834_v1 = vadd.f32 %v5375_v22, %v8340_v25  ;;  %v1828_v44 = vpop.f32.mrb[41].mxu1  ;;  %5972 = vmatpush3.bf16.msra.mxu0 %v5969_v34 }
 0x4f2   : > { %v5973_v2 = vpack.c.bf16 %v1874_v19, %v1873_v30  ;;  %v1829_v51 = vadd.f32 %v1828_v44, %v8341_v16  ;;  %v8350_v19 = vld [vmem:[#allocation24_spill] sm:$0xff] }
 0x4f3   : > { %v1876_v43 = vmax.f32 %v1834_v1, 0.0  ;;  %v8351_v1 = vld [vmem:[#allocation25_spill] sm:$0xff] }
 0x4f4   : > { %v1875_v60 = vmax.f32 %v1829_v51, 0.0  ;;  %v5378_v23 = vpop.f32.mrb[42].mxu1  ;;  %5974 = vmatprep.subr.bf16.mxu0 %v5973_v2 }
 0x4f5   : > { %v1844_v53 = vadd.f32 %v5378_v23, %v8342_v24  ;;  %v1838_v49 = vpop.f32.mrb[43].mxu1  ;;  %5976 = vmatpush3.bf16.msra.mxu0 %v5973_v2 }
 0x4f6   : > { %v5977_v36 = vpack.c.bf16 %v1876_v43, %v1875_v60  ;;  %v1839_v45 = vadd.f32 %v1838_v49, %v8343_v29  ;;  %v8352_v43 = vld [vmem:[#allocation26_spill] sm:$0xff] }
 0x4f7   : > { %v1878_v54 = vmax.f32 %v1844_v53, 0.0  ;;  %v8353_v53 = vld [vmem:[#allocation27_spill] sm:$0xff] }
 0x4f8   : > { %v1877_v5 = vmax.f32 %v1839_v45, 0.0  ;;  %v5381_v31 = vpop.f32.mrb[44].mxu1  ;;  %5978 = vmatprep.subr.bf16.mxu0 %v5977_v36 }
 0x4f9   : > { %v1854_v32 = vadd.f32 %v5381_v31, %v8344_v46  ;;  %v1848_v6 = vpop.f32.mrb[45].mxu1  ;;  %5980 = vmatpush3.bf16.msra.mxu0 %v5977_v36 }
 0x4fa   : > { %v5981_v4 = vpack.c.bf16 %v1878_v54, %v1877_v5  ;;  %v1849_v57 = vadd.f32 %v1848_v6, %v8345_v38  ;;  %v8354_v54 = vld [vmem:[#allocation28_spill] sm:$0xff] }
 0x4fb   : > { %v1880_v39 = vmax.f32 %v1854_v32, 0.0  ;;  %v8355_v32 = vld [vmem:[#allocation29_spill] sm:$0xff] }
 0x4fc   : > { %v1879_v41 = vmax.f32 %v1849_v57, 0.0  ;;  %v5384_v40 = vpop.f32.mrb[46].mxu1  ;;  %5982 = vmatprep.subr.bf16.mxu0 %v5981_v4 }
 0x4fd   : > { %v1864_v58 = vadd.f32 %v5384_v40, %v8346_v9  ;;  %v1858_v10 = vpop.f32.mrb[47].mxu1  ;;  %5984 = vmatpush3.bf16.msra.mxu0 %v5981_v4 }
 0x4fe   : > { %v5985_v33 = vpack.c.bf16 %v1880_v39, %v1879_v41  ;;  %v1859_v37 = vadd.f32 %v1858_v10, %v8347_v47  ;;  %v8356_v39 = vld [vmem:[#allocation30_spill] sm:$0xff] }
 0x4ff   : > { %v1882_v48 = vmax.f32 %v1864_v58, 0.0  ;;  %v8357_v58 = vld [vmem:[#allocation31_spill] sm:$0xff] }
 0x500   : > { %v1881_v15 = vmax.f32 %v1859_v37, 0.0  ;;  %5986 = vmatprep.subr.bf16.mxu0 %v5985_v33 }
 0x501   : > { %5988 = vmatpush3.bf16.msra.mxu0 %v5985_v33 }
 0x502   : > { %v5989_v13 = vpack.c.bf16 %v1882_v48, %v1881_v15  ;;  %v8358_v48 = vld [vmem:[#allocation32_spill] sm:$0xff] }
 0x504   : > { %5990 = vmatprep.subr.bf16.mxu0 %v5989_v13 }
 0x505   : > { %5992 = vmatpush3.bf16.msra.mxu0 %v5989_v13 }
 0x508   : > { %5418 = vmatmul.mubr.f32.vlgmr.msra.gmra.mrb[48].mxu0 %v4468_v52 }
 0x509   : > { %5420 = vmatprep.mubr.f32.mxu0 %v4469_v59  ;;  %v8359_v59 = vld [vmem:[#allocation33_spill] sm:$0xff] }
 0x50c   : > { %5421 = vmatmul.mubr.f32.gmra.mrb[50].mxu0 %v4470_v14 }
 0x50d   : > { %5423 = vmatprep.mubr.f32.mxu0 %v4471_v17 }
 0x510   : > { %5424 = vmatmul.mubr.f32.gmra.mrb[52].mxu0 %v4472_v55 }
 0x511   : > { %5426 = vmatprep.mubr.f32.mxu0 %v4473_v27 }
 0x514   : > { %5427 = vmatmul.mubr.f32.gmra.mrb[54].mxu0 %v4474_v18  ;;  %v8360_v18 = vld [vmem:[#allocation34_spill] sm:$0xff] }
 0x515   : > { %5429 = vmatprep.mubr.f32.mxu0 %v4475_v35 }
 0x518   : > { %5430 = vmatmul.mubr.f32.gmra.mrb[56].mxu0 %v4476_v56 }
 0x519   : > { %5432 = vmatprep.mubr.f32.mxu0 %v4477_v11 }
 0x51c   : > { %5433 = vmatmul.mubr.f32.gmra.mrb[58].mxu0 %v4478_v61  ;;  %v8361_v61 = vld [vmem:[#allocation35_spill] sm:$0xff] }
 0x51d   : > { %5435 = vmatprep.mubr.f32.mxu0 %v4479_v12 }
 0x520   : > { %5436 = vmatmul.mubr.f32.gmra.mrb[60].mxu0 %v4480_v3 }
 0x521   : > { %5438 = vmatprep.mubr.f32.mxu0 %v4481_v62 }
 0x524   : > { %5439 = vmatmul.mubr.f32.gmra.mrb[62].mxu0 %v4482_v21 }
 0x5db   : > { %v5419_v26 = vpop.f32.mrb[48].mxu0 }
 0x5dc   : > { %v2069_v50 = vadd.f32 %v5419_v26, %v8348_v0  ;;  %v2063_v20 = vpop.f32.mrb[49].mxu0 }
 0x5dd   : > { %v2064_v28 = vadd.f32 %v2063_v20, %v8349_v42  ;;  %v8363_v20 = vld [vmem:[#allocation37_spill] sm:$0xff] }
 0x5de   : > { %v2143_v34 = vmax.f32 %v2069_v50, 0.0 }
 0x5df   : > { %v2142_v7 = vmax.f32 %v2064_v28, 0.0  ;;  %v5422_v8 = vpop.f32.mrb[50].mxu0 }
 0x5e0   : > { %v2079_v30 = vadd.f32 %v5422_v8, %v8350_v19  ;;  %v2073_v22 = vpop.f32.mrb[51].mxu0  ;;  %v4500_v8 = vld [vmem:[%s8261_s2 + $0x288] sm:$0xff]  ;;  %v4501_v19 = vld [vmem:[%s8261_s2 + $0x290] sm:$0xff] }
 0x5e1   : > { %v5993_v25 = vpack.c.bf16 %v2143_v34, %v2142_v7  ;;  %v2074_v44 = vadd.f32 %v2073_v22, %v8351_v1  ;;  %v4503_v22 = vld [vmem:[%s8261_s2 + $0x2a0] sm:$0xff]  ;;  %v4505_v1 = vld [vmem:[%s8261_s2 + $0x2b0] sm:$0xff] }
 0x5e2   : > { %v2145_v2 = vmax.f32 %v2079_v30, 0.0  ;;  %v4502_v30 = vld [vmem:[%s8261_s2 + $0x298] sm:$0xff] }
 0x5e3   : > { %v2144_v16 = vmax.f32 %v2074_v44, 0.0  ;;  %v5425_v51 = vpop.f32.mrb[52].mxu0  ;;  %5994 = vmatprep.subr.bf16.mxu1 %v5993_v25  ;;  %v4506_v44 = vld [vmem:[%s8261_s2 + $0x2b8] sm:$0xff] }
 0x5e4   : > { %v2089_v60 = vadd.f32 %v5425_v51, %v8352_v43  ;;  %v2083_v23 = vpop.f32.mrb[53].mxu0  ;;  %5996 = vmatpush3.bf16.msra.mxu1 %v5993_v25  ;;  %v4504_v25 = vld [vmem:[%s8261_s2 + $0x2a8] sm:$0xff]  ;;  %v4509_v51 = vld [vmem:[%s8261_s2 + $0x2d0] sm:$0xff]  ;;  %v4510_v43 = vld [vmem:[%s8261_s2 + $0x2d8] sm:$0xff] }
 0x5e5   : > { %v5997_v24 = vpack.c.bf16 %v2145_v2, %v2144_v16  ;;  %v2084_v49 = vadd.f32 %v2083_v23, %v8353_v53  ;;  %v4507_v2 = vld [vmem:[%s8261_s2 + $0x2c0] sm:$0xff]  ;;  %v4508_v16 = vld [vmem:[%s8261_s2 + $0x2c8] sm:$0xff]  ;;  %v4514_v53 = vld [vmem:[%s8261_s2 + $0x2f8] sm:$0xff] }
 0x5e6   : > { %v2147_v36 = vmax.f32 %v2089_v60, 0.0  ;;  %v4511_v60 = vld [vmem:[%s8261_s2 + $0x2e0] sm:$0xff]  ;;  %v4512_v23 = vld [vmem:[%s8261_s2 + $0x2e8] sm:$0xff] }
 0x5e7   : > { %v2146_v29 = vmax.f32 %v2084_v49, 0.0  ;;  %v5428_v45 = vpop.f32.mrb[54].mxu0  ;;  %5998 = vmatprep.subr.bf16.mxu1 %v5997_v24  ;;  %v2433_v49 = vld [vmem:[%s8263_s4] sm:$0xff] }
 0x5e8   : > { %v2099_v5 = vadd.f32 %v5428_v45, %v8354_v54  ;;  %v2093_v31 = vpop.f32.mrb[55].mxu0  ;;  %6000 = vmatpush3.bf16.msra.mxu1 %v5997_v24  ;;  %v4513_v24 = vld [vmem:[%s8261_s2 + $0x2f0] sm:$0xff]  ;;  %5529 = vmatprep.mubr.f32.mxu0 %v2433_v49 }
 0x5e9   : > { %v6001_v46 = vpack.c.bf16 %v2147_v36, %v2146_v29  ;;  %v2094_v6 = vadd.f32 %v2093_v31, %v8355_v32  ;;  %v8364_v29 = vld [vmem:[#allocation38_spill] sm:$0xff]  ;;  %v8378_v49 = vld [vmem:[#allocation52_spill] sm:$0xff] }
 0x5ea   : > { %v2149_v4 = vmax.f32 %v2099_v5, 0.0  ;;  %v8365_v5 = vld [vmem:[#allocation39_spill] sm:$0xff] }
 0x5eb   : > { %v2148_v38 = vmax.f32 %v2094_v6, 0.0  ;;  %v5431_v57 = vpop.f32.mrb[56].mxu0  ;;  %6002 = vmatprep.subr.bf16.mxu1 %v6001_v46 }
 0x5ec   : > { %v2109_v41 = vadd.f32 %v5431_v57, %v8356_v39  ;;  %v2103_v40 = vpop.f32.mrb[57].mxu0  ;;  %6004 = vmatpush3.bf16.msra.mxu1 %v6001_v46 }
 0x5ed   : > { %v6005_v9 = vpack.c.bf16 %v2149_v4, %v2148_v38  ;;  %v2104_v10 = vadd.f32 %v2103_v40, %v8357_v58  ;;  %v8366_v4 = vld [vmem:[#allocation40_spill] sm:$0xff] }
 0x5ee   : > { %v2151_v33 = vmax.f32 %v2109_v41, 0.0  ;;  %v8367_v41 = vld [vmem:[#allocation41_spill] sm:$0xff] }
 0x5ef   : > { %v2150_v47 = vmax.f32 %v2104_v10, 0.0  ;;  %v5434_v37 = vpop.f32.mrb[58].mxu0  ;;  %6006 = vmatprep.subr.bf16.mxu1 %v6005_v9 }
 0x5f0   : > { %v2119_v15 = vadd.f32 %v5434_v37, %v8358_v48  ;;  %v2113_v13 = vpop.f32.mrb[59].mxu0  ;;  %6008 = vmatpush3.bf16.msra.mxu1 %v6005_v9 }
 0x5f1   : > { %v6009_v52 = vpack.c.bf16 %v2151_v33, %v2150_v47  ;;  %v2114_v14 = vadd.f32 %v2113_v13, %v8359_v59  ;;  %v8368_v33 = vld [vmem:[#allocation42_spill] sm:$0xff] }
 0x5f2   : > { %v2153_v17 = vmax.f32 %v2119_v15, 0.0  ;;  %v8369_v15 = vld [vmem:[#allocation43_spill] sm:$0xff] }
 0x5f3   : > { %v2152_v55 = vmax.f32 %v2114_v14, 0.0  ;;  %v5437_v27 = vpop.f32.mrb[60].mxu0  ;;  %6010 = vmatprep.subr.bf16.mxu1 %v6009_v52 }
 0x5f4   : > { %v2129_v35 = vadd.f32 %v5437_v27, %v8360_v18  ;;  %v2123_v56 = vpop.f32.mrb[61].mxu0  ;;  %6012 = vmatpush3.bf16.msra.mxu1 %v6009_v52 }
 0x5f5   : > { %v6013_v11 = vpack.c.bf16 %v2153_v17, %v2152_v55  ;;  %v2124_v12 = vadd.f32 %v2123_v56, %v8361_v61  ;;  %v8370_v17 = vld [vmem:[#allocation44_spill] sm:$0xff] }
 0x5f6   : > { %v2155_v3 = vmax.f32 %v2129_v35, 0.0  ;;  %v8371_v35 = vld [vmem:[#allocation45_spill] sm:$0xff] }
 0x5f7   : > { %v2154_v62 = vmax.f32 %v2124_v12, 0.0  ;;  %v5440_v21 = vpop.f32.mrb[62].mxu0  ;;  %6014 = vmatprep.subr.bf16.mxu1 %v6013_v11 }
 0x5f8   : > { %v2139_v26 = vadd.f32 %v5440_v21, %v8362_v63  ;;  %v2133_v0 = vpop.f32.mrb[63].mxu0  ;;  %6016 = vmatpush3.bf16.msra.mxu1 %v6013_v11 }
 0x5f9   : > { %v6017_v50 = vpack.c.bf16 %v2155_v3, %v2154_v62  ;;  %v2134_v42 = vadd.f32 %v2133_v0, %v8363_v20  ;;  %v8372_v3 = vld [vmem:[#allocation46_spill] sm:$0xff] }
 0x5fa   : > { %v2157_v28 = vmax.f32 %v2139_v26, 0.0  ;;  %v8373_v26 = vld [vmem:[#allocation47_spill] sm:$0xff] }
 0x5fb   : > { %v2156_v34 = vmax.f32 %v2134_v42, 0.0  ;;  %6018 = vmatprep.subr.bf16.mxu1 %v6017_v50 }
 0x5fc   : > { %6020 = vmatpush3.bf16.msra.mxu1 %v6017_v50 }
 0x5fd   : > { %v6021_v7 = vpack.c.bf16 %v2157_v28, %v2156_v34  ;;  %v8374_v28 = vld [vmem:[#allocation48_spill] sm:$0xff] }
 0x5ff   : > { %6022 = vmatprep.subr.bf16.mxu1 %v6021_v7 }
 0x600   : > { %6024 = vmatpush3.bf16.msra.mxu1 %v6021_v7 }
 0x603   : > { %5474 = vmatmul.mubr.f32.vlgmr.msra.gmra.mrb[48].mxu1 %v4500_v8 }
 0x604   : > { %5476 = vmatprep.mubr.f32.mxu1 %v4501_v19  ;;  %v8375_v19 = vld [vmem:[#allocation49_spill] sm:$0xff] }
 0x607   : > { %5477 = vmatmul.mubr.f32.gmra.mrb[50].mxu1 %v4502_v30 }
 0x608   : > { %5479 = vmatprep.mubr.f32.mxu1 %v4503_v22 }
 0x60b   : > { %5480 = vmatmul.mubr.f32.gmra.mrb[52].mxu1 %v4504_v25 }
 0x60c   : > { %5482 = vmatprep.mubr.f32.mxu1 %v4505_v1 }
 0x60f   : > { %5483 = vmatmul.mubr.f32.gmra.mrb[54].mxu1 %v4506_v44  ;;  %v8376_v44 = vld [vmem:[#allocation50_spill] sm:$0xff] }
 0x610   : > { %5485 = vmatprep.mubr.f32.mxu1 %v4507_v2 }
 0x613   : > { %5486 = vmatmul.mubr.f32.gmra.mrb[56].mxu1 %v4508_v16 }
 0x614   : > { %5488 = vmatprep.mubr.f32.mxu1 %v4509_v51 }
 0x617   : > { %5489 = vmatmul.mubr.f32.gmra.mrb[58].mxu1 %v4510_v43  ;;  %v8377_v43 = vld [vmem:[#allocation51_spill] sm:$0xff] }
 0x618   : > { %5491 = vmatprep.mubr.f32.mxu1 %v4511_v60 }
 0x61b   : > { %5492 = vmatmul.mubr.f32.gmra.mrb[60].mxu1 %v4512_v23 }
 0x61c   : > { %5494 = vmatprep.mubr.f32.mxu1 %v4513_v24 }
 0x61f   : > { %5495 = vmatmul.mubr.f32.gmra.mrb[62].mxu1 %v4514_v53 }
 0x6d6   : > { %v5475_v36 = vpop.f32.mrb[48].mxu1 }
 0x6d7   : > { %v2344_v45 = vadd.f32 %v5475_v36, %v8364_v29  ;;  %v2338_v54 = vpop.f32.mrb[49].mxu1 }
 0x6d8   : > { %v2339_v31 = vadd.f32 %v2338_v54, %v8365_v5  ;;  %v8379_v54 = vld [vmem:[#allocation53_spill] sm:$0xff] }
 0x6d9   : > { %v2418_v46 = vmax.f32 %v2344_v45, 0.0 }
 0x6da   : > { %v2417_v32 = vmax.f32 %v2339_v31, 0.0  ;;  %v5478_v6 = vpop.f32.mrb[50].mxu1 }
 0x6db   : > { %v2354_v38 = vadd.f32 %v5478_v6, %v8366_v4  ;;  %v2348_v57 = vpop.f32.mrb[51].mxu1  ;;  %v2434_v6 = vld [vmem:[%s8263_s4 + $0x8] sm:$0xff]  ;;  %v2435_v4 = vld [vmem:[%s8263_s4 + $0x10] sm:$0xff] }
 0x6dc   : > { %v6025_v39 = vpack.c.bf16 %v2418_v46, %v2417_v32  ;;  %v2349_v40 = vadd.f32 %v2348_v57, %v8367_v41  ;;  %v2437_v57 = vld [vmem:[%s8263_s4 + $0x20] sm:$0xff]  ;;  %v2439_v41 = vld [vmem:[%s8263_s4 + $0x30] sm:$0xff] }
 0x6dd   : > { %v2420_v9 = vmax.f32 %v2354_v38, 0.0  ;;  %v2436_v38 = vld [vmem:[%s8263_s4 + $0x18] sm:$0xff] }
 0x6de   : > { %v2419_v58 = vmax.f32 %v2349_v40, 0.0  ;;  %v5481_v10 = vpop.f32.mrb[52].mxu1  ;;  %6026 = vmatprep.subr.bf16.mxu0 %v6025_v39  ;;  %v2440_v40 = vld [vmem:[%s8263_s4 + $0x38] sm:$0xff] }
 0x6df   : > { %v2364_v47 = vadd.f32 %v5481_v10, %v8368_v33  ;;  %v2358_v37 = vpop.f32.mrb[53].mxu1  ;;  %6028 = vmatpush3.bf16.msra.mxu0 %v6025_v39  ;;  %v2438_v39 = vld [vmem:[%s8263_s4 + $0x28] sm:$0xff]  ;;  %v2443_v10 = vld [vmem:[%s8263_s4 + $0x50] sm:$0xff]  ;;  %v2444_v33 = vld [vmem:[%s8263_s4 + $0x58] sm:$0xff] }
 0x6e0   : > { %v6029_v48 = vpack.c.bf16 %v2420_v9, %v2419_v58  ;;  %v2359_v13 = vadd.f32 %v2358_v37, %v8369_v15  ;;  %v2441_v9 = vld [vmem:[%s8263_s4 + $0x40] sm:$0xff]  ;;  %v2442_v58 = vld [vmem:[%s8263_s4 + $0x48] sm:$0xff]  ;;  %v2448_v15 = vld [vmem:[%s8263_s4 + $0x78] sm:$0xff] }
 0x6e1   : > { %v2422_v52 = vmax.f32 %v2364_v47, 0.0  ;;  %v2445_v47 = vld [vmem:[%s8263_s4 + $0x60] sm:$0xff]  ;;  %v2446_v37 = vld [vmem:[%s8263_s4 + $0x68] sm:$0xff] }
 0x6e2   : > { %v2421_v59 = vmax.f32 %v2359_v13, 0.0  ;;  %v5484_v14 = vpop.f32.mrb[54].mxu1  ;;  %6030 = vmatprep.subr.bf16.mxu0 %v6029_v48  ;;  %v4531_v13 = vld [vmem:[%s8263_s4 + $0x80] sm:$0xff] }
 0x6e3   : > { %v2374_v55 = vadd.f32 %v5484_v14, %v8370_v17  ;;  %v2368_v27 = vpop.f32.mrb[55].mxu1  ;;  %6032 = vmatpush3.bf16.msra.mxu0 %v6029_v48  ;;  %v2447_v48 = vld [vmem:[%s8263_s4 + $0x70] sm:$0xff]  ;;  %5585 = vmatprep.mubr.f32.mxu1 %v4531_v13 }
 0x6e4   : > { %v6033_v18 = vpack.c.bf16 %v2422_v52, %v2421_v59  ;;  %v2369_v56 = vadd.f32 %v2368_v27, %v8371_v35  ;;  %v8380_v59 = vld [vmem:[#allocation54_spill] sm:$0xff] }
 0x6e5   : > { %v2424_v11 = vmax.f32 %v2374_v55, 0.0  ;;  %v8381_v55 = vld [vmem:[#allocation55_spill] sm:$0xff] }
 0x6e6   : > { %v2423_v61 = vmax.f32 %v2369_v56, 0.0  ;;  %v5487_v12 = vpop.f32.mrb[56].mxu1  ;;  %6034 = vmatprep.subr.bf16.mxu0 %v6033_v18 }
 0x6e7   : > { %v2384_v62 = vadd.f32 %v5487_v12, %v8372_v3  ;;  %v2378_v21 = vpop.f32.mrb[57].mxu1  ;;  %6036 = vmatpush3.bf16.msra.mxu0 %v6033_v18 }
 0x6e8   : > { %v6037_v63 = vpack.c.bf16 %v2424_v11, %v2423_v61  ;;  %v2379_v0 = vadd.f32 %v2378_v21, %v8373_v26  ;;  %v8382_v11 = vld [vmem:[#allocation56_spill] sm:$0xff] }
 0x6e9   : > { %v2426_v50 = vmax.f32 %v2384_v62, 0.0  ;;  %v8383_v62 = vld [vmem:[#allocation57_spill] sm:$0xff] }
 0x6ea   : > { %v2425_v20 = vmax.f32 %v2379_v0, 0.0  ;;  %v5490_v42 = vpop.f32.mrb[58].mxu1  ;;  %6038 = vmatprep.subr.bf16.mxu0 %v6037_v63 }
 0x6eb   : > { %v2394_v34 = vadd.f32 %v5490_v42, %v8374_v28  ;;  %v2388_v7 = vpop.f32.mrb[59].mxu1  ;;  %6040 = vmatpush3.bf16.msra.mxu0 %v6037_v63 }
 0x6ec   : > { %v6041_v8 = vpack.c.bf16 %v2426_v50, %v2425_v20  ;;  %v2389_v30 = vadd.f32 %v2388_v7, %v8375_v19  ;;  %v8384_v50 = vld [vmem:[#allocation58_spill] sm:$0xff] }
 0x6ed   : > { %v2428_v22 = vmax.f32 %v2394_v34, 0.0  ;;  %v8385_v34 = vld [vmem:[#allocation59_spill] sm:$0xff] }
 0x6ee   : > { %v2427_v25 = vmax.f32 %v2389_v30, 0.0  ;;  %v5493_v1 = vpop.f32.mrb[60].mxu1  ;;  %6042 = vmatprep.subr.bf16.mxu0 %v6041_v8 }
 0x6ef   : > { %v2404_v2 = vadd.f32 %v5493_v1, %v8376_v44  ;;  %v2398_v16 = vpop.f32.mrb[61].mxu1  ;;  %6044 = vmatpush3.bf16.msra.mxu0 %v6041_v8 }
 0x6f0   : > { %v6045_v51 = vpack.c.bf16 %v2428_v22, %v2427_v25  ;;  %v2399_v60 = vadd.f32 %v2398_v16, %v8377_v43  ;;  %v8386_v22 = vld [vmem:[#allocation60_spill] sm:$0xff] }
 0x6f1   : > { %v2430_v23 = vmax.f32 %v2404_v2, 0.0  ;;  %v8387_v2 = vld [vmem:[#allocation61_spill] sm:$0xff] }
 0x6f2   : > { %v2429_v24 = vmax.f32 %v2399_v60, 0.0  ;;  %v5496_v53 = vpop.f32.mrb[62].mxu1  ;;  %6046 = vmatprep.subr.bf16.mxu0 %v6045_v51 }
 0x6f3   : > { %v2414_v36 = vadd.f32 %v5496_v53, %v8378_v49  ;;  %v2408_v29 = vpop.f32.mrb[63].mxu1  ;;  %6048 = vmatpush3.bf16.msra.mxu0 %v6045_v51 }
 0x6f4   : > { %v6049_v45 = vpack.c.bf16 %v2430_v23, %v2429_v24  ;;  %v2409_v5 = vadd.f32 %v2408_v29, %v8379_v54  ;;  %v8388_v23 = vld [vmem:[#allocation62_spill] sm:$0xff] }
 0x6f5   : > { %v2432_v31 = vmax.f32 %v2414_v36, 0.0  ;;  %v8389_v36 = vld [vmem:[#allocation63_spill] sm:$0xff] }
 0x6f6   : > { %v2431_v46 = vmax.f32 %v2409_v5, 0.0  ;;  %6050 = vmatprep.subr.bf16.mxu0 %v6049_v45 }
 0x6f7   : > { %6052 = vmatpush3.bf16.msra.mxu0 %v6049_v45 }
 0x6f8   : > { %v6053_v32 = vpack.c.bf16 %v2432_v31, %v2431_v46  ;;  %v8390_v31 = vld [vmem:[#allocation64_spill] sm:$0xff] }
 0x6fa   : > { %6054 = vmatprep.subr.bf16.mxu0 %v6053_v32 }
 0x6fb   : > { %6056 = vmatpush3.bf16.msra.mxu0 %v6053_v32 }
 0x6fe   : > { %5530 = vmatmul.mubr.f32.vlgmr.msra.gmra.mrb[16].mxu0 %v2434_v6 }
 0x6ff   : > { %5532 = vmatprep.mubr.f32.mxu0 %v2435_v4  ;;  %v8391_v4 = vld [vmem:[#allocation65_spill] sm:$0xff] }
 0x702   : > { %5533 = vmatmul.mubr.f32.gmra.mrb[18].mxu0 %v2436_v38 }
 0x703   : > { %5535 = vmatprep.mubr.f32.mxu0 %v2437_v57 }
 0x706   : > { %5536 = vmatmul.mubr.f32.gmra.mrb[20].mxu0 %v2438_v39 }
 0x707   : > { %5538 = vmatprep.mubr.f32.mxu0 %v2439_v41 }
 0x70a   : > { %5539 = vmatmul.mubr.f32.gmra.mrb[22].mxu0 %v2440_v40  ;;  %v8392_v40 = vld [vmem:[#allocation66_spill] sm:$0xff] }
 0x70b   : > { %5541 = vmatprep.mubr.f32.mxu0 %v2441_v9 }
 0x70e   : > { %5542 = vmatmul.mubr.f32.gmra.mrb[24].mxu0 %v2442_v58 }
 0x70f   : > { %5544 = vmatprep.mubr.f32.mxu0 %v2443_v10 }
 0x712   : > { %5545 = vmatmul.mubr.f32.gmra.mrb[26].mxu0 %v2444_v33  ;;  %v8393_v33 = vld [vmem:[#allocation67_spill] sm:$0xff] }
 0x713   : > { %5547 = vmatprep.mubr.f32.mxu0 %v2445_v47 }
 0x716   : > { %5548 = vmatmul.mubr.f32.gmra.mrb[28].mxu0 %v2446_v37 }
 0x717   : > { %5550 = vmatprep.mubr.f32.mxu0 %v2447_v48  ;;  %v2704_v48 = vpop.permute.xlu1 %2703 }
 0x71a   : > { %5551 = vmatmul.mubr.f32.gmra.mrb[30].mxu0 %v2448_v15 }
 0x7d1   : > { %v5531_v52 = vpop.f32.mrb[16].mxu0 }
 0x7d2   : > { %v2707_v14 = vadd.f32 %v5531_v52, %v8380_v59  ;;  %v2515_v17 = vpop.f32.mrb[17].mxu0  ;;  %v2699_v52 = vpop.permute.xlu0 %2698 }
 0x7d3   : > { %v2706_v27 = vadd.f32 %v8381_v55, %v2515_v17 }
 0x7d4   : > { %v2723_v18 = vmax.f32 %v2707_v14, 0.0 }
 0x7d5   : > { %v2722_v35 = vmax.f32 %v2706_v27, 0.0  ;;  %v5534_v56 = vpop.f32.mrb[18].mxu0 }
 0x7d6   : > { %v2709_v61 = vadd.f32 %v5534_v56, %v8382_v11  ;;  %v2525_v12 = vpop.f32.mrb[19].mxu0  ;;  %v4532_v56 = vld [vmem:[%s8263_s4 + $0x88] sm:$0xff]  ;;  %v4533_v11 = vld [vmem:[%s8263_s4 + $0x90] sm:$0xff] }
 0x7d7   : > { %v6057_v3 = vpack.c.bf16 %v2723_v18, %v2722_v35  ;;  %v2708_v21 = vadd.f32 %v8383_v62, %v2525_v12  ;;  %v4535_v12 = vld [vmem:[%s8263_s4 + $0xa0] sm:$0xff]  ;;  %v4537_v62 = vld [vmem:[%s8263_s4 + $0xb0] sm:$0xff] }
 0x7d8   : > { %v2725_v63 = vmax.f32 %v2709_v61, 0.0  ;;  %v4534_v61 = vld [vmem:[%s8263_s4 + $0x98] sm:$0xff] }
 0x7d9   : > { %v2724_v26 = vmax.f32 %v2708_v21, 0.0  ;;  %v5537_v0 = vpop.f32.mrb[20].mxu0  ;;  %6058 = vmatprep.subr.bf16.mxu1 %v6057_v3  ;;  %v4538_v21 = vld [vmem:[%s8263_s4 + $0xb8] sm:$0xff] }
 0x7da   : > { %v2711_v20 = vadd.f32 %v5537_v0, %v8384_v50  ;;  %v2535_v42 = vpop.f32.mrb[21].mxu0  ;;  %6060 = vmatpush3.bf16.msra.mxu1 %v6057_v3  ;;  %v4536_v3 = vld [vmem:[%s8263_s4 + $0xa8] sm:$0xff]  ;;  %v4541_v0 = vld [vmem:[%s8263_s4 + $0xd0] sm:$0xff]  ;;  %v4542_v50 = vld [vmem:[%s8263_s4 + $0xd8] sm:$0xff] }
 0x7db   : > { %v6061_v28 = vpack.c.bf16 %v2725_v63, %v2724_v26  ;;  %v2710_v7 = vadd.f32 %v8385_v34, %v2535_v42  ;;  %v4539_v63 = vld [vmem:[%s8263_s4 + $0xc0] sm:$0xff]  ;;  %v4540_v26 = vld [vmem:[%s8263_s4 + $0xc8] sm:$0xff]  ;;  %v4546_v34 = vld [vmem:[%s8263_s4 + $0xf8] sm:$0xff] }
 0x7dc   : > { %v2727_v8 = vmax.f32 %v2711_v20, 0.0  ;;  %v4543_v20 = vld [vmem:[%s8263_s4 + $0xe0] sm:$0xff]  ;;  %v4544_v42 = vld [vmem:[%s8263_s4 + $0xe8] sm:$0xff] }
 0x7dd   : > { %v2726_v19 = vmax.f32 %v2710_v7, 0.0  ;;  %v5540_v30 = vpop.f32.mrb[22].mxu0  ;;  %6062 = vmatprep.subr.bf16.mxu1 %v6061_v28  ;;  %v4563_v7 = vld [vmem:[%s8263_s4 + $0x100] sm:$0xff] }
 0x7de   : > { %v2713_v25 = vadd.f32 %v5540_v30, %v8386_v22  ;;  %v2545_v1 = vpop.f32.mrb[23].mxu0  ;;  %6064 = vmatpush3.bf16.msra.mxu1 %v6061_v28  ;;  %v4545_v28 = vld [vmem:[%s8263_s4 + $0xf0] sm:$0xff]  ;;  %5641 = vmatprep.mubr.f32.mxu0 %v4563_v7 }
 0x7df   : > { %v6065_v44 = vpack.c.bf16 %v2727_v8, %v2726_v19  ;;  %v2712_v16 = vadd.f32 %v8387_v2, %v2545_v1  ;;  %v2780_v8 = vpop.permute.xlu1 %2779  ;;  %v2775_v19 = vpop.permute.xlu0 %2774 }
 0x7e0   : > { %v2729_v51 = vmax.f32 %v2713_v25, 0.0 }
 0x7e1   : > { %v2728_v43 = vmax.f32 %v2712_v16, 0.0  ;;  %v5543_v60 = vpop.f32.mrb[24].mxu0  ;;  %6066 = vmatprep.subr.bf16.mxu1 %v6065_v44 }
 0x7e2   : > { %v2715_v24 = vadd.f32 %v5543_v60, %v8388_v23  ;;  %v2555_v53 = vpop.f32.mrb[25].mxu0  ;;  %6068 = vmatpush3.bf16.msra.mxu1 %v6065_v44 }
 0x7e3   : > { %v6069_v49 = vpack.c.bf16 %v2729_v51, %v2728_v43  ;;  %v2714_v29 = vadd.f32 %v8389_v36, %v2555_v53  ;;  %v2790_v30 = vpop.permute.xlu1 %2789  ;;  %v2785_v22 = vpop.permute.xlu0 %2784 }
 0x7e4   : > { %v2731_v45 = vmax.f32 %v2715_v24, 0.0 }
 0x7e5   : > { %v2730_v54 = vmax.f32 %v2714_v29, 0.0  ;;  %v5546_v5 = vpop.f32.mrb[26].mxu0  ;;  %6070 = vmatprep.subr.bf16.mxu1 %v6069_v49 }
 0x7e6   : > { %v2717_v46 = vadd.f32 %v5546_v5, %v8390_v31  ;;  %v2565_v32 = vpop.f32.mrb[27].mxu0  ;;  %6072 = vmatpush3.bf16.msra.mxu1 %v6069_v49 }
 0x7e7   : > { %v6073_v6 = vpack.c.bf16 %v2731_v45, %v2730_v54  ;;  %v2716_v38 = vadd.f32 %v8391_v4, %v2565_v32  ;;  %v2800_v25 = vpop.permute.xlu1 %2799  ;;  %v2795_v1 = vpop.permute.xlu0 %2794 }
 0x7e8   : > { %v2733_v57 = vmax.f32 %v2717_v46, 0.0 }
 0x7e9   : > { %v2732_v39 = vmax.f32 %v2716_v38, 0.0  ;;  %v5549_v41 = vpop.f32.mrb[28].mxu0  ;;  %6074 = vmatprep.subr.bf16.mxu1 %v6073_v6 }
 0x7ea   : > { %v2719_v9 = vadd.f32 %v5549_v41, %v8392_v40  ;;  %v2575_v58 = vpop.f32.mrb[29].mxu0  ;;  %6076 = vmatpush3.bf16.msra.mxu1 %v6073_v6 }
 0x7eb   : > { %v6077_v10 = vpack.c.bf16 %v2733_v57, %v2732_v39  ;;  %v2718_v47 = vadd.f32 %v8393_v33, %v2575_v58  ;;  %v2810_v60 = vpop.permute.xlu1 %2809  ;;  %v2805_v53 = vpop.permute.xlu0 %2804 }
 0x7ec   : > { %v2735_v37 = vmax.f32 %v2719_v9, 0.0 }
 0x7ed   : > { %v2734_v15 = vmax.f32 %v2718_v47, 0.0  ;;  %v5552_v13 = vpop.f32.mrb[30].mxu0  ;;  %6078 = vmatprep.subr.bf16.mxu1 %v6077_v10 }
 0x7ee   : > { %v2721_v59 = vadd.f32 %v5552_v13, %v2704_v48  ;;  %v2585_v14 = vpop.f32.mrb[31].mxu0  ;;  %6080 = vmatpush3.bf16.msra.mxu1 %v6077_v10 }
 0x7ef   : > { %v6081_v17 = vpack.c.bf16 %v2735_v37, %v2734_v15  ;;  %v2720_v55 = vadd.f32 %v2699_v52, %v2585_v14  ;;  %v2820_v6 = vpop.permute.xlu1 %2819  ;;  %v2815_v57 = vpop.permute.xlu0 %2814 }
 0x7f0   : > { %v2737_v27 = vmax.f32 %v2721_v59, 0.0 }
 0x7f1   : > { %v2736_v18 = vmax.f32 %v2720_v55, 0.0  ;;  %6082 = vmatprep.subr.bf16.mxu1 %v6081_v17 }
 0x7f2   : > { %6084 = vmatpush3.bf16.msra.mxu1 %v6081_v17 }
 0x7f3   : > { %v6085_v35 = vpack.c.bf16 %v2737_v27, %v2736_v18  ;;  %v2830_v37 = vpop.permute.xlu1 %2829  ;;  %v2825_v13 = vpop.permute.xlu0 %2824 }
 0x7f5   : > { %6086 = vmatprep.subr.bf16.mxu1 %v6085_v35 }
 0x7f6   : > { %6088 = vmatpush3.bf16.msra.mxu1 %v6085_v35 }
 0x7f9   : > { %5586 = vmatmul.mubr.f32.vlgmr.msra.gmra.mrb[64].mxu1 %v4532_v56 }
 0x7fa   : > { %5588 = vmatprep.mubr.f32.mxu1 %v4533_v11  ;;  %v2840_v11 = vpop.permute.xlu1 %2839 }
 0x7fd   : > { %5589 = vmatmul.mubr.f32.gmra.mrb[66].mxu1 %v4534_v61 }
 0x7fe   : > { %5591 = vmatprep.mubr.f32.mxu1 %v4535_v12 }
 0x801   : > { %5592 = vmatmul.mubr.f32.gmra.mrb[68].mxu1 %v4536_v3  ;;  %v2835_v3 = vpop.permute.xlu0 %2834 }
 0x802   : > { %5594 = vmatprep.mubr.f32.mxu1 %v4537_v62 }
 0x805   : > { %5595 = vmatmul.mubr.f32.gmra.mrb[70].mxu1 %v4538_v21 }
 0x806   : > { %5597 = vmatprep.mubr.f32.mxu1 %v4539_v63 }
 0x809   : > { %5598 = vmatmul.mubr.f32.gmra.mrb[72].mxu1 %v4540_v26 }
 0x80a   : > { %5600 = vmatprep.mubr.f32.mxu1 %v4541_v0 }
 0x80d   : > { %5601 = vmatmul.mubr.f32.gmra.mrb[74].mxu1 %v4542_v50 }
 0x80e   : > { %5603 = vmatprep.mubr.f32.mxu1 %v4543_v20 }
 0x811   : > { %5604 = vmatmul.mubr.f32.gmra.mrb[76].mxu1 %v4544_v42 }
 0x812   : > { %5606 = vmatprep.mubr.f32.mxu1 %v4545_v28  ;;  %v2850_v28 = vpop.permute.xlu1 %2849 }
 0x815   : > { %5607 = vmatmul.mubr.f32.gmra.mrb[78].mxu1 %v4546_v34 }
 0x8cc   : > { %v5587_v44 = vpop.f32.mrb[64].mxu1 }
 0x8cd   : > { %v2924_v2 = vadd.f32 %v5587_v44, %v2780_v8  ;;  %v2918_v16 = vpop.f32.mrb[65].mxu1  ;;  %v2845_v8 = vpop.permute.xlu0 %2844 }
 0x8ce   : > { %v2919_v51 = vadd.f32 %v2918_v16, %v2775_v19  ;;  %v4564_v16 = vld [vmem:[%s8263_s4 + $0x108] sm:$0xff] }
 0x8cf   : > { %v2998_v43 = vmax.f32 %v2924_v2, 0.0 }
 0x8d0   : > { %v2997_v23 = vmax.f32 %v2919_v51, 0.0  ;;  %v5590_v24 = vpop.f32.mrb[66].mxu1  ;;  %v4565_v51 = vld [vmem:[%s8263_s4 + $0x110] sm:$0xff] }
 0x8d1   : > { %v2934_v49 = vadd.f32 %v5590_v24, %v2790_v30  ;;  %v2928_v36 = vpop.f32.mrb[67].mxu1  ;;  %v4569_v24 = vld [vmem:[%s8263_s4 + $0x130] sm:$0xff] }
 0x8d2   : > { %v6089_v29 = vpack.c.bf16 %v2998_v43, %v2997_v23  ;;  %v2929_v45 = vadd.f32 %v2928_v36, %v2785_v22  ;;  %v4566_v43 = vld [vmem:[%s8263_s4 + $0x118] sm:$0xff]  ;;  %v4568_v23 = vld [vmem:[%s8263_s4 + $0x128] sm:$0xff] }
 0x8d3   : > { %v3000_v54 = vmax.f32 %v2934_v49, 0.0  ;;  %v4571_v49 = vld [vmem:[%s8263_s4 + $0x140] sm:$0xff]  ;;  %v4572_v36 = vld [vmem:[%s8263_s4 + $0x148] sm:$0xff] }
 0x8d4   : > { %v2999_v5 = vmax.f32 %v2929_v45, 0.0  ;;  %v5593_v31 = vpop.f32.mrb[68].mxu1  ;;  %6090 = vmatprep.subr.bf16.mxu0 %v6089_v29  ;;  %v4574_v45 = vld [vmem:[%s8263_s4 + $0x158] sm:$0xff] }
 0x8d5   : > { %v2944_v46 = vadd.f32 %v5593_v31, %v2800_v25  ;;  %v2938_v32 = vpop.f32.mrb[69].mxu1  ;;  %6092 = vmatpush3.bf16.msra.mxu0 %v6089_v29  ;;  %v4573_v29 = vld [vmem:[%s8263_s4 + $0x150] sm:$0xff] }
 0x8d6   : > { %v6093_v4 = vpack.c.bf16 %v3000_v54, %v2999_v5  ;;  %v2939_v38 = vadd.f32 %v2938_v32, %v2795_v1  ;;  %v4575_v54 = vld [vmem:[%s8263_s4 + $0x160] sm:$0xff]  ;;  %v4576_v5 = vld [vmem:[%s8263_s4 + $0x168] sm:$0xff]  ;;  %v4577_v31 = vld [vmem:[%s8263_s4 + $0x170] sm:$0xff] }
 0x8d7   : > { %v3002_v39 = vmax.f32 %v2944_v46, 0.0  ;;  %v4578_v46 = vld [vmem:[%s8263_s4 + $0x178] sm:$0xff]  ;;  %v4595_v32 = vld [vmem:[%s8263_s4 + $0x180] sm:$0xff] }
 0x8d8   : > { %v3001_v41 = vmax.f32 %v2939_v38, 0.0  ;;  %v5596_v40 = vpop.f32.mrb[70].mxu1  ;;  %6094 = vmatprep.subr.bf16.mxu0 %v6093_v4  ;;  %5697 = vmatprep.mubr.f32.mxu1 %v4595_v32 }
 0x8d9   : > { %v2954_v9 = vadd.f32 %v5596_v40, %v2810_v60  ;;  %v2948_v58 = vpop.f32.mrb[71].mxu1  ;;  %6096 = vmatpush3.bf16.msra.mxu0 %v6093_v4  ;;  %v4567_v60 = vld [vmem:[%s8263_s4 + $0x120] sm:$0xff]  ;;  %v3050_v4 = vpop.permute.xlu0 %3049 }
 0x8da   : > { %v6097_v10 = vpack.c.bf16 %v3002_v39, %v3001_v41  ;;  %v2949_v33 = vadd.f32 %v2948_v58, %v2805_v53  ;;  %v4570_v53 = vld [vmem:[%s8263_s4 + $0x138] sm:$0xff] }
 0x8db   : > { %v3004_v47 = vmax.f32 %v2954_v9, 0.0 }
 0x8dc   : > { %v3003_v48 = vmax.f32 %v2949_v33, 0.0  ;;  %v5599_v15 = vpop.f32.mrb[72].mxu1  ;;  %6098 = vmatprep.subr.bf16.mxu0 %v6097_v10 }
 0x8dd   : > { %v2964_v52 = vadd.f32 %v5599_v15, %v2820_v6  ;;  %v2958_v59 = vpop.f32.mrb[73].mxu1  ;;  %6100 = vmatpush3.bf16.msra.mxu0 %v6097_v10  ;;  %v3055_v6 = vpop.permute.xlu1 %3054 }
 0x8de   : > { %v6101_v14 = vpack.c.bf16 %v3004_v47, %v3003_v48  ;;  %v2959_v17 = vadd.f32 %v2958_v59, %v2815_v57  ;;  %v3060_v57 = vpop.permute.xlu0 %3059 }
 0x8df   : > { %v3006_v55 = vmax.f32 %v2964_v52, 0.0 }
 0x8e0   : > { %v3005_v27 = vmax.f32 %v2959_v17, 0.0  ;;  %v5602_v18 = vpop.f32.mrb[74].mxu1  ;;  %6102 = vmatprep.subr.bf16.mxu0 %v6101_v14 }
 0x8e1   : > { %v2974_v35 = vadd.f32 %v5602_v18, %v2830_v37  ;;  %v2968_v56 = vpop.f32.mrb[75].mxu1  ;;  %6104 = vmatpush3.bf16.msra.mxu0 %v6101_v14  ;;  %v3065_v38 = vpop.permute.xlu1 %3064 }
 0x8e2   : > { %v6105_v61 = vpack.c.bf16 %v3006_v55, %v3005_v27  ;;  %v2969_v12 = vadd.f32 %v2968_v56, %v2825_v13  ;;  %v3070_v41 = vpop.permute.xlu0 %3069 }
 0x8e3   : > { %v3008_v62 = vmax.f32 %v2974_v35, 0.0 }
 0x8e4   : > { %v3007_v21 = vmax.f32 %v2969_v12, 0.0  ;;  %v5605_v63 = vpop.f32.mrb[76].mxu1  ;;  %6106 = vmatprep.subr.bf16.mxu0 %v6105_v61 }
 0x8e5   : > { %v2984_v26 = vadd.f32 %v5605_v63, %v2840_v11  ;;  %v2978_v0 = vpop.f32.mrb[77].mxu1  ;;  %6108 = vmatpush3.bf16.msra.mxu0 %v6105_v61  ;;  %v3075_v39 = vpop.permute.xlu1 %3074 }
 0x8e6   : > { %v6109_v50 = vpack.c.bf16 %v3008_v62, %v3007_v21  ;;  %v2979_v20 = vadd.f32 %v2978_v0, %v2835_v3  ;;  %v3080_v15 = vpop.permute.xlu0 %3079 }
 0x8e7   : > { %v3010_v42 = vmax.f32 %v2984_v26, 0.0 }
 0x8e8   : > { %v3009_v34 = vmax.f32 %v2979_v20, 0.0  ;;  %v5608_v7 = vpop.f32.mrb[78].mxu1  ;;  %6110 = vmatprep.subr.bf16.mxu0 %v6109_v50 }
 0x8e9   : > { %v2994_v19 = vadd.f32 %v5608_v7, %v2850_v28  ;;  %v2988_v30 = vpop.f32.mrb[79].mxu1  ;;  %6112 = vmatpush3.bf16.msra.mxu0 %v6109_v50  ;;  %v3085_v47 = vpop.permute.xlu1 %3084 }
 0x8ea   : > { %v6113_v22 = vpack.c.bf16 %v3010_v42, %v3009_v34  ;;  %v2989_v25 = vadd.f32 %v2988_v30, %v2845_v8  ;;  %v3090_v12 = vpop.permute.xlu0 %3089 }
 0x8eb   : > { %v3012_v1 = vmax.f32 %v2994_v19, 0.0 }
 0x8ec   : > { %v3011_v44 = vmax.f32 %v2989_v25, 0.0  ;;  %6114 = vmatprep.subr.bf16.mxu0 %v6113_v22 }
 0x8ed   : > { %6116 = vmatpush3.bf16.msra.mxu0 %v6113_v22  ;;  %v3095_v56 = vpop.permute.xlu1 %3094 }
 0x8ee   : > { %v6117_v2 = vpack.c.bf16 %v3012_v1, %v3011_v44  ;;  %v3100_v7 = vpop.permute.xlu0 %3099 }
 0x8f0   : > { %6118 = vmatprep.subr.bf16.mxu0 %v6117_v2 }
 0x8f1   : > { %6120 = vmatpush3.bf16.msra.mxu0 %v6117_v2  ;;  %v3105_v42 = vpop.permute.xlu1 %3104 }
 0x8f4   : > { %5642 = vmatmul.mubr.f32.vlgmr.msra.gmra.mrb[64].mxu0 %v4564_v16 }
 0x8f5   : > { %5644 = vmatprep.mubr.f32.mxu0 %v4565_v51  ;;  %v3115_v51 = vpop.permute.xlu1 %3114 }
 0x8f8   : > { %5645 = vmatmul.mubr.f32.gmra.mrb[66].mxu0 %v4566_v43 }
 0x8f9   : > { %5647 = vmatprep.mubr.f32.mxu0 %v4567_v60 }
 0x8fc   : > { %5648 = vmatmul.mubr.f32.gmra.mrb[68].mxu0 %v4568_v23  ;;  %v3110_v23 = vpop.permute.xlu0 %3109 }
 0x8fd   : > { %5650 = vmatprep.mubr.f32.mxu0 %v4569_v24 }
 0x900   : > { %5651 = vmatmul.mubr.f32.gmra.mrb[70].mxu0 %v4570_v53 }
 0x901   : > { %5653 = vmatprep.mubr.f32.mxu0 %v4571_v49 }
 0x904   : > { %5654 = vmatmul.mubr.f32.gmra.mrb[72].mxu0 %v4572_v36 }
 0x905   : > { %5656 = vmatprep.mubr.f32.mxu0 %v4573_v29 }
 0x908   : > { %5657 = vmatmul.mubr.f32.gmra.mrb[74].mxu0 %v4574_v45 }
 0x909   : > { %5659 = vmatprep.mubr.f32.mxu0 %v4575_v54 }
 0x90c   : > { %5660 = vmatmul.mubr.f32.gmra.mrb[76].mxu0 %v4576_v5 }
 0x90d   : > { %5662 = vmatprep.mubr.f32.mxu0 %v4577_v31  ;;  %v3125_v31 = vpop.permute.xlu1 %3124 }
 0x910   : > { %5663 = vmatmul.mubr.f32.gmra.mrb[78].mxu0 %v4578_v46 }
 0x9c7   : > { %v5643_v40 = vpop.f32.mrb[64].mxu0 }
 0x9c8   : > { %v3199_v9 = vadd.f32 %v5643_v40, %v3055_v6  ;;  %v3193_v58 = vpop.f32.mrb[65].mxu0  ;;  %v3120_v6 = vpop.permute.xlu0 %3119 }
 0x9c9   : > { %v3194_v10 = vadd.f32 %v3193_v58, %v3050_v4  ;;  %v4596_v58 = vld [vmem:[%s8263_s4 + $0x188] sm:$0xff] }
 0x9ca   : > { %v3273_v33 = vmax.f32 %v3199_v9, 0.0 }
 0x9cb   : > { %v3272_v37 = vmax.f32 %v3194_v10, 0.0  ;;  %v5646_v48 = vpop.f32.mrb[66].mxu0  ;;  %v4597_v10 = vld [vmem:[%s8263_s4 + $0x190] sm:$0xff] }
 0x9cc   : > { %v3209_v13 = vadd.f32 %v5646_v48, %v3065_v38  ;;  %v3203_v52 = vpop.f32.mrb[67].mxu0  ;;  %v4601_v48 = vld [vmem:[%s8263_s4 + $0x1b0] sm:$0xff] }
 0x9cd   : > { %v6121_v59 = vpack.c.bf16 %v3273_v33, %v3272_v37  ;;  %v3204_v14 = vadd.f32 %v3203_v52, %v3060_v57  ;;  %v4598_v33 = vld [vmem:[%s8263_s4 + $0x198] sm:$0xff]  ;;  %v4600_v37 = vld [vmem:[%s8263_s4 + $0x1a8] sm:$0xff] }
 0x9ce   : > { %v3275_v17 = vmax.f32 %v3209_v13, 0.0  ;;  %v4603_v13 = vld [vmem:[%s8263_s4 + $0x1c0] sm:$0xff]  ;;  %v4604_v52 = vld [vmem:[%s8263_s4 + $0x1c8] sm:$0xff] }
 0x9cf   : > { %v3274_v55 = vmax.f32 %v3204_v14, 0.0  ;;  %v5649_v27 = vpop.f32.mrb[68].mxu0  ;;  %6122 = vmatprep.subr.bf16.mxu1 %v6121_v59  ;;  %v4606_v14 = vld [vmem:[%s8263_s4 + $0x1d8] sm:$0xff] }
 0x9d0   : > { %v3219_v18 = vadd.f32 %v5649_v27, %v3075_v39  ;;  %v3213_v35 = vpop.f32.mrb[69].mxu0  ;;  %6124 = vmatpush3.bf16.msra.mxu1 %v6121_v59  ;;  %v4605_v59 = vld [vmem:[%s8263_s4 + $0x1d0] sm:$0xff] }
 0x9d1   : > { %v6125_v11 = vpack.c.bf16 %v3275_v17, %v3274_v55  ;;  %v3214_v61 = vadd.f32 %v3213_v35, %v3070_v41  ;;  %v4607_v17 = vld [vmem:[%s8263_s4 + $0x1e0] sm:$0xff]  ;;  %v4608_v55 = vld [vmem:[%s8263_s4 + $0x1e8] sm:$0xff]  ;;  %v4609_v27 = vld [vmem:[%s8263_s4 + $0x1f0] sm:$0xff] }
 0x9d2   : > { %v3277_v3 = vmax.f32 %v3219_v18, 0.0  ;;  %v4610_v18 = vld [vmem:[%s8263_s4 + $0x1f8] sm:$0xff]  ;;  %v4627_v35 = vld [vmem:[%s8263_s4 + $0x200] sm:$0xff] }
 0x9d3   : > { %v3276_v62 = vmax.f32 %v3214_v61, 0.0  ;;  %v5652_v21 = vpop.f32.mrb[70].mxu0  ;;  %6126 = vmatprep.subr.bf16.mxu1 %v6125_v11  ;;  %5753 = vmatprep.mubr.f32.mxu0 %v4627_v35 }
 0x9d4   : > { %v3229_v63 = vadd.f32 %v5652_v21, %v3085_v47  ;;  %v3223_v26 = vpop.f32.mrb[71].mxu0  ;;  %6128 = vmatpush3.bf16.msra.mxu1 %v6125_v11  ;;  %v4599_v47 = vld [vmem:[%s8263_s4 + $0x1a0] sm:$0xff]  ;;  %v3325_v11 = vpop.permute.xlu0 %3324 }
 0x9d5   : > { %v6129_v0 = vpack.c.bf16 %v3277_v3, %v3276_v62  ;;  %v3224_v50 = vadd.f32 %v3223_v26, %v3080_v15  ;;  %v4602_v15 = vld [vmem:[%s8263_s4 + $0x1b8] sm:$0xff] }
 0x9d6   : > { %v3279_v20 = vmax.f32 %v3229_v63, 0.0 }
 0x9d7   : > { %v3278_v28 = vmax.f32 %v3224_v50, 0.0  ;;  %v5655_v34 = vpop.f32.mrb[72].mxu0  ;;  %6130 = vmatprep.subr.bf16.mxu1 %v6129_v0 }
 0x9d8   : > { %v3239_v8 = vadd.f32 %v5655_v34, %v3095_v56  ;;  %v3233_v19 = vpop.f32.mrb[73].mxu0  ;;  %6132 = vmatpush3.bf16.msra.mxu1 %v6129_v0  ;;  %v3330_v56 = vpop.permute.xlu1 %3329 }
 0x9d9   : > { %v6133_v30 = vpack.c.bf16 %v3279_v20, %v3278_v28  ;;  %v3234_v22 = vadd.f32 %v3233_v19, %v3090_v12  ;;  %v3335_v12 = vpop.permute.xlu0 %3334 }
 0x9da   : > { %v3281_v25 = vmax.f32 %v3239_v8, 0.0 }
 0x9db   : > { %v3280_v1 = vmax.f32 %v3234_v22, 0.0  ;;  %v5658_v44 = vpop.f32.mrb[74].mxu0  ;;  %6134 = vmatprep.subr.bf16.mxu1 %v6133_v30 }
 0x9dc   : > { %v3249_v2 = vadd.f32 %v5658_v44, %v3105_v42  ;;  %v3243_v16 = vpop.f32.mrb[75].mxu0  ;;  %6136 = vmatpush3.bf16.msra.mxu1 %v6133_v30  ;;  %v3340_v61 = vpop.permute.xlu1 %3339 }
 0x9dd   : > { %v6137_v43 = vpack.c.bf16 %v3281_v25, %v3280_v1  ;;  %v3244_v60 = vadd.f32 %v3243_v16, %v3100_v7  ;;  %v3345_v62 = vpop.permute.xlu0 %3344 }
 0x9de   : > { %v3283_v24 = vmax.f32 %v3249_v2, 0.0 }
 0x9df   : > { %v3282_v53 = vmax.f32 %v3244_v60, 0.0  ;;  %v5661_v49 = vpop.f32.mrb[76].mxu0  ;;  %6138 = vmatprep.subr.bf16.mxu1 %v6137_v43 }
 0x9e0   : > { %v3259_v36 = vadd.f32 %v5661_v49, %v3115_v51  ;;  %v3253_v29 = vpop.f32.mrb[77].mxu0  ;;  %6140 = vmatpush3.bf16.msra.mxu1 %v6137_v43  ;;  %v3350_v3 = vpop.permute.xlu1 %3349 }
 0x9e1   : > { %v6141_v45 = vpack.c.bf16 %v3283_v24, %v3282_v53  ;;  %v3254_v54 = vadd.f32 %v3253_v29, %v3110_v23  ;;  %v3355_v34 = vpop.permute.xlu0 %3354 }
 0x9e2   : > { %v3285_v5 = vmax.f32 %v3259_v36, 0.0 }
 0x9e3   : > { %v3284_v46 = vmax.f32 %v3254_v54, 0.0  ;;  %v5664_v32 = vpop.f32.mrb[78].mxu0  ;;  %6142 = vmatprep.subr.bf16.mxu1 %v6141_v45 }
 0x9e4   : > { %v3269_v4 = vadd.f32 %v5664_v32, %v3125_v31  ;;  %v3263_v38 = vpop.f32.mrb[79].mxu0  ;;  %6144 = vmatpush3.bf16.msra.mxu1 %v6141_v45  ;;  %v3360_v20 = vpop.permute.xlu1 %3359 }
 0x9e5   : > { %v6145_v57 = vpack.c.bf16 %v3285_v5, %v3284_v46  ;;  %v3264_v39 = vadd.f32 %v3263_v38, %v3120_v6  ;;  %v3365_v60 = vpop.permute.xlu0 %3364 }
 0x9e6   : > { %v3287_v41 = vmax.f32 %v3269_v4, 0.0 }
 0x9e7   : > { %v3286_v40 = vmax.f32 %v3264_v39, 0.0  ;;  %6146 = vmatprep.subr.bf16.mxu1 %v6145_v57 }
 0x9e8   : > { %6148 = vmatpush3.bf16.msra.mxu1 %v6145_v57  ;;  %v3370_v16 = vpop.permute.xlu1 %3369 }
 0x9e9   : > { %v6149_v9 = vpack.c.bf16 %v3287_v41, %v3286_v40  ;;  %v3375_v32 = vpop.permute.xlu0 %3374 }
 0x9eb   : > { %6150 = vmatprep.subr.bf16.mxu1 %v6149_v9 }
 0x9ec   : > { %6152 = vmatpush3.bf16.msra.mxu1 %v6149_v9  ;;  %v3380_v5 = vpop.permute.xlu1 %3379 }
 0x9ef   : > { %5698 = vmatmul.mubr.f32.vlgmr.msra.gmra.mrb[80].mxu1 %v4596_v58 }
 0x9f0   : > { %5700 = vmatprep.mubr.f32.mxu1 %v4597_v10  ;;  %v3390_v10 = vpop.permute.xlu1 %3389 }
 0x9f3   : > { %5701 = vmatmul.mubr.f32.gmra.mrb[82].mxu1 %v4598_v33 }
 0x9f4   : > { %5703 = vmatprep.mubr.f32.mxu1 %v4599_v47 }
 0x9f7   : > { %5704 = vmatmul.mubr.f32.gmra.mrb[84].mxu1 %v4600_v37  ;;  %v3385_v37 = vpop.permute.xlu0 %3384 }
 0x9f8   : > { %5706 = vmatprep.mubr.f32.mxu1 %v4601_v48 }
 0x9fb   : > { %5707 = vmatmul.mubr.f32.gmra.mrb[86].mxu1 %v4602_v15 }
 0x9fc   : > { %5709 = vmatprep.mubr.f32.mxu1 %v4603_v13 }
 0x9ff   : > { %5710 = vmatmul.mubr.f32.gmra.mrb[88].mxu1 %v4604_v52 }
 0xa00   : > { %5712 = vmatprep.mubr.f32.mxu1 %v4605_v59 }
 0xa03   : > { %5713 = vmatmul.mubr.f32.gmra.mrb[90].mxu1 %v4606_v14 }
 0xa04   : > { %5715 = vmatprep.mubr.f32.mxu1 %v4607_v17 }
 0xa07   : > { %5716 = vmatmul.mubr.f32.gmra.mrb[92].mxu1 %v4608_v55 }
 0xa08   : > { %5718 = vmatprep.mubr.f32.mxu1 %v4609_v27  ;;  %v3400_v27 = vpop.permute.xlu1 %3399 }
 0xa0b   : > { %5719 = vmatmul.mubr.f32.gmra.mrb[94].mxu1 %v4610_v18 }
 0xac2   : > { %v5699_v21 = vpop.f32.mrb[80].mxu1 }
 0xac3   : > { %v3474_v63 = vadd.f32 %v5699_v21, %v3330_v56  ;;  %v3468_v26 = vpop.f32.mrb[81].mxu1  ;;  %v3395_v56 = vpop.permute.xlu0 %3394 }
 0xac4   : > { %v3469_v0 = vadd.f32 %v3468_v26, %v3325_v11  ;;  %v4628_v26 = vld [vmem:[%s8263_s4 + $0x208] sm:$0xff] }
 0xac5   : > { %v3548_v50 = vmax.f32 %v3474_v63, 0.0 }
 0xac6   : > { %v3547_v42 = vmax.f32 %v3469_v0, 0.0  ;;  %v5702_v28 = vpop.f32.mrb[82].mxu1  ;;  %v4629_v0 = vld [vmem:[%s8263_s4 + $0x210] sm:$0xff] }
 0xac7   : > { %v3484_v7 = vadd.f32 %v5702_v28, %v3340_v61  ;;  %v3478_v8 = vpop.f32.mrb[83].mxu1  ;;  %v4633_v28 = vld [vmem:[%s8263_s4 + $0x230] sm:$0xff] }
 0xac8   : > { %v6153_v19 = vpack.c.bf16 %v3548_v50, %v3547_v42  ;;  %v3479_v30 = vadd.f32 %v3478_v8, %v3335_v12  ;;  %v4630_v50 = vld [vmem:[%s8263_s4 + $0x218] sm:$0xff]  ;;  %v4632_v42 = vld [vmem:[%s8263_s4 + $0x228] sm:$0xff] }
 0xac9   : > { %v3550_v22 = vmax.f32 %v3484_v7, 0.0  ;;  %v4635_v7 = vld [vmem:[%s8263_s4 + $0x240] sm:$0xff]  ;;  %v4636_v8 = vld [vmem:[%s8263_s4 + $0x248] sm:$0xff] }
 0xaca   : > { %v3549_v25 = vmax.f32 %v3479_v30, 0.0  ;;  %v5705_v1 = vpop.f32.mrb[84].mxu1  ;;  %6154 = vmatprep.subr.bf16.mxu0 %v6153_v19  ;;  %v4638_v30 = vld [vmem:[%s8263_s4 + $0x258] sm:$0xff] }
 0xacb   : > { %v3494_v44 = vadd.f32 %v5705_v1, %v3350_v3  ;;  %v3488_v2 = vpop.f32.mrb[85].mxu1  ;;  %6156 = vmatpush3.bf16.msra.mxu0 %v6153_v19  ;;  %v4637_v19 = vld [vmem:[%s8263_s4 + $0x250] sm:$0xff] }
 0xacc   : > { %v6157_v51 = vpack.c.bf16 %v3550_v22, %v3549_v25  ;;  %v3489_v43 = vadd.f32 %v3488_v2, %v3345_v62  ;;  %v4639_v22 = vld [vmem:[%s8263_s4 + $0x260] sm:$0xff]  ;;  %v4640_v25 = vld [vmem:[%s8263_s4 + $0x268] sm:$0xff]  ;;  %v4641_v1 = vld [vmem:[%s8263_s4 + $0x270] sm:$0xff] }
 0xacd   : > { %v3552_v23 = vmax.f32 %v3494_v44, 0.0  ;;  %v4642_v44 = vld [vmem:[%s8263_s4 + $0x278] sm:$0xff]  ;;  %v4659_v2 = vld [vmem:[%s8263_s4 + $0x280] sm:$0xff] }
 0xace   : > { %v3551_v24 = vmax.f32 %v3489_v43, 0.0  ;;  %v5708_v53 = vpop.f32.mrb[86].mxu1  ;;  %6158 = vmatprep.subr.bf16.mxu0 %v6157_v51  ;;  %v3600_v43 = vpop.permute.xlu0 %3599 }
 0xacf   : > { %v3504_v49 = vadd.f32 %v5708_v53, %v3360_v20  ;;  %v3498_v36 = vpop.f32.mrb[87].mxu1  ;;  %6160 = vmatpush3.bf16.msra.mxu0 %v6157_v51  ;;  %v4631_v20 = vld [vmem:[%s8263_s4 + $0x220] sm:$0xff]  ;;  %v3605_v51 = vpop.permute.xlu1 %3604 }
 0xad0   : > { %v6161_v29 = vpack.c.bf16 %v3552_v23, %v3551_v24  ;;  %v3499_v45 = vadd.f32 %v3498_v36, %v3355_v34  ;;  %v4634_v34 = vld [vmem:[%s8263_s4 + $0x238] sm:$0xff] }
 0xad1   : > { %v3554_v54 = vmax.f32 %v3504_v49, 0.0 }
 0xad2   : > { %v3553_v31 = vmax.f32 %v3499_v45, 0.0  ;;  %v5711_v46 = vpop.f32.mrb[88].mxu1  ;;  %6162 = vmatprep.subr.bf16.mxu0 %v6161_v29  ;;  %v3610_v23 = vpop.permute.xlu0 %3609 }
 0xad3   : > { %v3514_v6 = vadd.f32 %v5711_v46, %v3370_v16  ;;  %v3508_v4 = vpop.f32.mrb[89].mxu1  ;;  %6164 = vmatpush3.bf16.msra.mxu0 %v6161_v29  ;;  %v4665_v16 = vld [vmem:[%s8263_s4 + $0x2b0] sm:$0xff] }
 0xad4   : > { %v6165_v38 = vpack.c.bf16 %v3554_v54, %v3553_v31  ;;  %v3509_v57 = vadd.f32 %v3508_v4, %v3365_v60  ;;  %5818 = vmatprep.mubr.f32.mxu1 %v4665_v16  ;;  %v3615_v60 = vpop.permute.xlu1 %3614 }
 0xad5   : > { %v3556_v39 = vmax.f32 %v3514_v6, 0.0 }
 0xad6   : > { %v3555_v41 = vmax.f32 %v3509_v57, 0.0  ;;  %v5714_v40 = vpop.f32.mrb[90].mxu1  ;;  %6166 = vmatprep.subr.bf16.mxu0 %v6165_v38  ;;  %v3620_v53 = vpop.permute.xlu0 %3619 }
 0xad7   : > { %v3524_v9 = vadd.f32 %v5714_v40, %v3380_v5  ;;  %v3518_v58 = vpop.f32.mrb[91].mxu1  ;;  %6168 = vmatpush3.bf16.msra.mxu0 %v6165_v38 }
 0xad8   : > { %v6169_v33 = vpack.c.bf16 %v3556_v39, %v3555_v41  ;;  %v3519_v47 = vadd.f32 %v3518_v58, %v3375_v32  ;;  %v3625_v24 = vpop.permute.xlu1 %3624 }
 0xad9   : > { %v3558_v48 = vmax.f32 %v3524_v9, 0.0 }
 0xada   : > { %v3557_v15 = vmax.f32 %v3519_v47, 0.0  ;;  %v5717_v13 = vpop.f32.mrb[92].mxu1  ;;  %6170 = vmatprep.subr.bf16.mxu0 %v6169_v33  ;;  %v3630_v32 = vpop.permute.xlu0 %3629 }
 0xadb   : > { %v3534_v52 = vadd.f32 %v5717_v13, %v3390_v10  ;;  %v3528_v59 = vpop.f32.mrb[93].mxu1  ;;  %6172 = vmatpush3.bf16.msra.mxu0 %v6169_v33 }
 0xadc   : > { %v6173_v14 = vpack.c.bf16 %v3558_v48, %v3557_v15  ;;  %v3529_v17 = vadd.f32 %v3528_v59, %v3385_v37  ;;  %v3635_v5 = vpop.permute.xlu1 %3634 }
 0xadd   : > { %v3560_v55 = vmax.f32 %v3534_v52, 0.0 }
 0xade   : > { %v3559_v18 = vmax.f32 %v3529_v17, 0.0  ;;  %v5720_v35 = vpop.f32.mrb[94].mxu1  ;;  %6174 = vmatprep.subr.bf16.mxu0 %v6173_v14  ;;  %v3640_v37 = vpop.permute.xlu0 %3639 }
 0xadf   : > { %v3544_v11 = vadd.f32 %v5720_v35, %v3400_v27  ;;  %v3538_v61 = vpop.f32.mrb[95].mxu1  ;;  %6176 = vmatpush3.bf16.msra.mxu0 %v6173_v14 }
 0xae0   : > { %v6177_v12 = vpack.c.bf16 %v3560_v55, %v3559_v18  ;;  %v3539_v3 = vadd.f32 %v3538_v61, %v3395_v56  ;;  %v3645_v10 = vpop.permute.xlu1 %3644 }
 0xae1   : > { %v3562_v62 = vmax.f32 %v3544_v11, 0.0 }
 0xae2   : > { %v3561_v21 = vmax.f32 %v3539_v3, 0.0  ;;  %6178 = vmatprep.subr.bf16.mxu0 %v6177_v12  ;;  %v3650_v56 = vpop.permute.xlu0 %3649 }
 0xae3   : > { %6180 = vmatpush3.bf16.msra.mxu0 %v6177_v12 }
 0xae4   : > { %v6181_v63 = vpack.c.bf16 %v3562_v62, %v3561_v21  ;;  %v3655_v27 = vpop.permute.xlu1 %3654 }
 0xae6   : > { %6182 = vmatprep.subr.bf16.mxu0 %v6181_v63 }
 0xae7   : > { %6184 = vmatpush3.bf16.msra.mxu0 %v6181_v63 }
 0xaea   : > { %5754 = vmatmul.mubr.f32.vlgmr.msra.gmra.mrb[80].mxu0 %v4628_v26 }
 0xaeb   : > { %5756 = vmatprep.mubr.f32.mxu0 %v4629_v0 }
 0xaee   : > { %5757 = vmatmul.mubr.f32.gmra.mrb[82].mxu0 %v4630_v50  ;;  %v3665_v50 = vpop.permute.xlu1 %3664 }
 0xaef   : > { %5759 = vmatprep.mubr.f32.mxu0 %v4631_v20 }
 0xaf2   : > { %5760 = vmatmul.mubr.f32.gmra.mrb[84].mxu0 %v4632_v42 }
 0xaf3   : > { %5762 = vmatprep.mubr.f32.mxu0 %v4633_v28  ;;  %v3660_v28 = vpop.permute.xlu0 %3659 }
 0xaf6   : > { %5763 = vmatmul.mubr.f32.gmra.mrb[86].mxu0 %v4634_v34 }
 0xaf7   : > { %5765 = vmatprep.mubr.f32.mxu0 %v4635_v7 }
 0xafa   : > { %5766 = vmatmul.mubr.f32.gmra.mrb[88].mxu0 %v4636_v8 }
 0xafb   : > { %5768 = vmatprep.mubr.f32.mxu0 %v4637_v19 }
 0xafe   : > { %5769 = vmatmul.mubr.f32.gmra.mrb[90].mxu0 %v4638_v30 }
 0xaff   : > { %5771 = vmatprep.mubr.f32.mxu0 %v4639_v22 }
 0xb02   : > { %5772 = vmatmul.mubr.f32.gmra.mrb[92].mxu0 %v4640_v25 }
 0xb03   : > { %5774 = vmatprep.mubr.f32.mxu0 %v4641_v1 }
 0xb06   : > { %5775 = vmatmul.mubr.f32.gmra.mrb[94].mxu0 %v4642_v44  ;;  %v3675_v44 = vpop.permute.xlu1 %3674 }
 0xb07   : > { %5809 = vmatprep.mubr.f32.mxu0 %v4659_v2 }
 0xbbd   : > { %v5755_v49 = vpop.f32.mrb[80].mxu0 }
 0xbbe   : > { %v3749_v36 = vadd.f32 %v5755_v49, %v3605_v51  ;;  %v3743_v29 = vpop.f32.mrb[81].mxu0  ;;  %v3670_v51 = vpop.permute.xlu0 %3669 }
 0xbbf   : > { %v3744_v45 = vadd.f32 %v3743_v29, %v3600_v43  ;;  %v4660_v29 = vld [vmem:[%s8263_s4 + $0x288] sm:$0xff] }
 0xbc0   : > { %v3823_v54 = vmax.f32 %v3749_v36, 0.0 }
 0xbc1   : > { %v3822_v31 = vmax.f32 %v3744_v45, 0.0  ;;  %v5758_v46 = vpop.f32.mrb[82].mxu0  ;;  %v4666_v45 = vld [vmem:[%s8263_s4 + $0x2b8] sm:$0xff] }
 0xbc2   : > { %v3759_v6 = vadd.f32 %v5758_v46, %v3615_v60  ;;  %v3753_v4 = vpop.f32.mrb[83].mxu0  ;;  %v4668_v46 = vld [vmem:[%s8263_s4 + $0x2c8] sm:$0xff] }
 0xbc3   : > { %v6185_v38 = vpack.c.bf16 %v3823_v54, %v3822_v31  ;;  %v3754_v57 = vadd.f32 %v3753_v4, %v3610_v23  ;;  %v4661_v54 = vld [vmem:[%s8263_s4 + $0x290] sm:$0xff]  ;;  %v4662_v31 = vld [vmem:[%s8263_s4 + $0x298] sm:$0xff]  ;;  %v4664_v4 = vld [vmem:[%s8263_s4 + $0x2a8] sm:$0xff] }
 0xbc4   : > { %v3825_v39 = vmax.f32 %v3759_v6, 0.0  ;;  %v4669_v6 = vld [vmem:[%s8263_s4 + $0x2d0] sm:$0xff] }
 0xbc5   : > { %v3824_v41 = vmax.f32 %v3754_v57, 0.0  ;;  %v5761_v40 = vpop.f32.mrb[84].mxu0  ;;  %6186 = vmatprep.subr.bf16.mxu0 %v6185_v38  ;;  %6217 = vmatprep.subr.bf16.mxu1 %v6185_v38  ;;  %v4671_v57 = vld [vmem:[%s8263_s4 + $0x2e0] sm:$0xff] }
 0xbc6   : > { %v3769_v9 = vadd.f32 %v5761_v40, %v3625_v24  ;;  %v3763_v58 = vpop.f32.mrb[85].mxu0  ;;  %6188 = vmatpush3.bf16.msra.mxu0 %v6185_v38  ;;  %6225 = vmatpush3.bf16.msra.mxu1 %v6185_v38  ;;  %v4670_v38 = vld [vmem:[%s8263_s4 + $0x2d8] sm:$0xff] }
 0xbc7   : > { %v6189_v33 = vpack.c.bf16 %v3825_v39, %v3824_v41  ;;  %v3764_v47 = vadd.f32 %v3763_v58, %v3620_v53  ;;  %v4672_v39 = vld [vmem:[%s8263_s4 + $0x2e8] sm:$0xff]  ;;  %v4673_v41 = vld [vmem:[%s8263_s4 + $0x2f0] sm:$0xff]  ;;  %v4674_v40 = vld [vmem:[%s8263_s4 + $0x2f8] sm:$0xff]  ;;  %v3880_v58 = vpop.permute.xlu1 %3879 }
 0xbc8   : > { %v3827_v48 = vmax.f32 %v3769_v9, 0.0  ;;  %v3875_v9 = vpop.permute.xlu0 %3874 }
 0xbc9   : > { %v3826_v15 = vmax.f32 %v3764_v47, 0.0  ;;  %v5764_v13 = vpop.f32.mrb[86].mxu0  ;;  %6190 = vmatprep.subr.bf16.mxu0 %v6189_v33  ;;  %6218 = vmatprep.subr.bf16.mxu1 %v6189_v33 }
 0xbca   : > { %v3779_v52 = vadd.f32 %v5764_v13, %v3635_v5  ;;  %v3773_v59 = vpop.f32.mrb[87].mxu0  ;;  %6192 = vmatpush3.bf16.msra.mxu0 %v6189_v33  ;;  %6226 = vmatpush3.bf16.msra.mxu1 %v6189_v33  ;;  %v4667_v5 = vld [vmem:[%s8263_s4 + $0x2c0] sm:$0xff] }
 0xbcb   : > { %v6193_v14 = vpack.c.bf16 %v3827_v48, %v3826_v15  ;;  %v3774_v17 = vadd.f32 %v3773_v59, %v3630_v32  ;;  %v4663_v32 = vld [vmem:[%s8263_s4 + $0x2a0] sm:$0xff]  ;;  %v3890_v33 = vpop.permute.xlu1 %3889 }
 0xbcc   : > { %v3829_v55 = vmax.f32 %v3779_v52, 0.0 }
 0xbcd   : > { %v3828_v18 = vmax.f32 %v3774_v17, 0.0  ;;  %v5767_v35 = vpop.f32.mrb[88].mxu0  ;;  %6194 = vmatprep.subr.bf16.mxu0 %v6193_v14  ;;  %6219 = vmatprep.subr.bf16.mxu1 %v6193_v14 }
 0xbce   : > { %v3789_v11 = vadd.f32 %v5767_v35, %v3645_v10  ;;  %v3783_v61 = vpop.f32.mrb[89].mxu0  ;;  %6196 = vmatpush3.bf16.msra.mxu0 %v6193_v14  ;;  %6227 = vmatpush3.bf16.msra.mxu1 %v6193_v14  ;;  %v3885_v10 = vpop.permute.xlu0 %3884 }
 0xbcf   : > { %v6197_v12 = vpack.c.bf16 %v3829_v55, %v3828_v18  ;;  %v3784_v3 = vadd.f32 %v3783_v61, %v3640_v37  ;;  %v4137_v37 = vpop.permute.xlu1 %4136 }
 0xbd0   : > { %v3831_v62 = vmax.f32 %v3789_v11, 0.0 }
 0xbd1   : > { %v3830_v21 = vmax.f32 %v3784_v3, 0.0  ;;  %v5770_v63 = vpop.f32.mrb[90].mxu0  ;;  %6198 = vmatprep.subr.bf16.mxu0 %v6197_v12  ;;  %6220 = vmatprep.subr.bf16.mxu1 %v6197_v12 }
 0xbd2   : > { %v3799_v26 = vadd.f32 %v5770_v63, %v3655_v27  ;;  %v3793_v0 = vpop.f32.mrb[91].mxu0  ;;  %6200 = vmatpush3.bf16.msra.mxu0 %v6197_v12  ;;  %6228 = vmatpush3.bf16.msra.mxu1 %v6197_v12  ;;  %v4132_v47 = vpop.permute.xlu0 %4131 }
 0xbd3   : > { %v6201_v20 = vpack.c.bf16 %v3831_v62, %v3830_v21  ;;  %v3794_v42 = vadd.f32 %v3793_v0, %v3650_v56  ;;  %v4142_v15 = vpop.permute.xlu1 %4141 }
 0xbd4   : > { %v3833_v34 = vmax.f32 %v3799_v26, 0.0 }
 0xbd5   : > { %v3832_v7 = vmax.f32 %v3794_v42, 0.0  ;;  %v5773_v8 = vpop.f32.mrb[92].mxu0  ;;  %6202 = vmatprep.subr.bf16.mxu0 %v6201_v20  ;;  %6221 = vmatprep.subr.bf16.mxu1 %v6201_v20 }
 0xbd6   : > { %v3809_v19 = vadd.f32 %v5773_v8, %v3665_v50  ;;  %v3803_v30 = vpop.f32.mrb[93].mxu0  ;;  %6204 = vmatpush3.bf16.msra.mxu0 %v6201_v20  ;;  %6229 = vmatpush3.bf16.msra.mxu1 %v6201_v20  ;;  %v3895_v48 = vpop.permute.xlu0 %3894 }
 0xbd7   : > { %v6205_v22 = vpack.c.bf16 %v3833_v34, %v3832_v7  ;;  %v3804_v25 = vadd.f32 %v3803_v30, %v3660_v28  ;;  %v4147_v52 = vpop.permute.xlu1 %4146 }
 0xbd8   : > { %v3835_v1 = vmax.f32 %v3809_v19, 0.0 }
 0xbd9   : > { %v3834_v2 = vmax.f32 %v3804_v25, 0.0  ;;  %v5776_v16 = vpop.f32.mrb[94].mxu0  ;;  %6206 = vmatprep.subr.bf16.mxu0 %v6205_v22  ;;  %6222 = vmatprep.subr.bf16.mxu1 %v6205_v22 }
 0xbda   : > { %v3819_v43 = vadd.f32 %v5776_v16, %v3675_v44  ;;  %v3813_v60 = vpop.f32.mrb[95].mxu0  ;;  %6208 = vmatpush3.bf16.msra.mxu0 %v6205_v22  ;;  %6230 = vmatpush3.bf16.msra.mxu1 %v6205_v22  ;;  %v3900_v13 = vpop.permute.xlu0 %3899 }
 0xbdb   : > { %v6209_v23 = vpack.c.bf16 %v3835_v1, %v3834_v2  ;;  %v3814_v24 = vadd.f32 %v3813_v60, %v3670_v51  ;;  %v4152_v14 = vpop.permute.xlu1 %4151 }
 0xbdc   : > { %v3837_v53 = vmax.f32 %v3819_v43, 0.0 }
 0xbdd   : > { %v3836_v49 = vmax.f32 %v3814_v24, 0.0  ;;  %6210 = vmatprep.subr.bf16.mxu0 %v6209_v23  ;;  %6223 = vmatprep.subr.bf16.mxu1 %v6209_v23 }
 0xbde   : > { %6212 = vmatpush3.bf16.msra.mxu0 %v6209_v23  ;;  %6231 = vmatpush3.bf16.msra.mxu1 %v6209_v23  ;;  %v3905_v59 = vpop.permute.xlu0 %3904 }
 0xbdf   : > { %v6213_v36 = vpack.c.bf16 %v3837_v53, %v3836_v49  ;;  %v4157_v55 = vpop.permute.xlu1 %4156 }
 0xbe1   : > { %6214 = vmatprep.subr.bf16.mxu0 %v6213_v36  ;;  %6224 = vmatprep.subr.bf16.mxu1 %v6213_v36 }
 0xbe2   : > { %6216 = vmatpush3.bf16.msra.mxu0 %v6213_v36  ;;  %6232 = vmatpush3.bf16.msra.mxu1 %v6213_v36  ;;  %v3910_v17 = vpop.permute.xlu0 %3909 }
 0xbe3   : > { %v4162_v18 = vpop.permute.xlu1 %4161 }
 0xbe5   : > { %5810 = vmatmul.mubr.f32.vlgmr.msra.gmra.mrb[96].mxu0 %v4660_v29  ;;  %5819 = vmatmul.mubr.f32.vlgmr.msra.gmra.mrb[96].mxu1 %v4666_v45 }
 0xbe6   : > { %5812 = vmatprep.mubr.f32.mxu0 %v4661_v54  ;;  %5821 = vmatprep.mubr.f32.mxu1 %v4667_v5  ;;  %v3915_v27 = vpop.permute.xlu0 %3914 }
 0xbe7   : > { %v4167_v56 = vpop.permute.xlu1 %4166 }
 0xbe9   : > { %5813 = vmatmul.mubr.f32.gmra.mrb[98].mxu0 %v4662_v31  ;;  %5822 = vmatmul.mubr.f32.gmra.mrb[98].mxu1 %v4668_v46 }
 0xbea   : > { %5815 = vmatprep.mubr.f32.mxu0 %v4663_v32  ;;  %5824 = vmatprep.mubr.f32.mxu1 %v4669_v6  ;;  %v3920_v35 = vpop.permute.xlu0 %3919 }
 0xbeb   : > { %v4172_v61 = vpop.permute.xlu1 %4171 }
 0xbed   : > { %5816 = vmatmul.mubr.f32.gmra.mrb[100].mxu0 %v4664_v4  ;;  %5825 = vmatmul.mubr.f32.gmra.mrb[100].mxu1 %v4670_v38 }
 0xbee   : > { %5827 = vmatprep.mubr.f32.mxu1 %v4671_v57  ;;  %v3925_v11 = vpop.permute.xlu0 %3924 }
 0xbef   : > { %v4177_v50 = vpop.permute.xlu1 %4176 }
 0xbf1   : > { %5828 = vmatmul.mubr.f32.gmra.mrb[102].mxu1 %v4672_v39 }
 0xbf2   : > { %5830 = vmatprep.mubr.f32.mxu1 %v4673_v41  ;;  %v3930_v12 = vpop.permute.xlu0 %3929 }
 0xbf3   : > { %v4182_v29 = vpop.permute.xlu1 %4181 }
 0xbf5   : > { %5831 = vmatmul.mubr.f32.gmra.mrb[104].mxu1 %v4674_v40 }
 0xbf6   : > { %v3935_v1 = vpop.permute.xlu0 %3934 }
 0xbfa   : > { %v3940_v41 = vpop.permute.xlu0 %3939 }
 0xcb8   : > { %v5811_v3 = vpop.f32.mrb[96].mxu0  ;;  %v5820_v62 = vpop.f32.mrb[96].mxu1 }
 0xcb9   : > { %v4024_v21 = vadd.f32 %v5811_v3, %v3880_v58  ;;  %v4018_v63 = vpop.f32.mrb[97].mxu0  ;;  %v4048_v26 = vpop.f32.mrb[97].mxu1  ;;  %v4054_v45 = vadd.f32 %v5820_v62, %v3910_v17 }
 0xcba   : > { %v4019_v0 = vadd.f32 %v4018_v63, %v3875_v9  ;;  %v4049_v53 = vadd.f32 %v4048_v26, %v3905_v59 }
 0xcbb   : > { %v4098_v20 = vmax.f32 %v4024_v21, 0.0  ;;  %v4104_v40 = vmax.f32 %v4054_v45, 0.0  ;;  %v3945_v21 = vpop.permute.xlu0 %3944 }
 0xcbc   : > { %v4097_v42 = vmax.f32 %v4019_v0, 0.0  ;;  %v5814_v28 = vpop.f32.mrb[98].mxu0  ;;  %v5823_v34 = vpop.f32.mrb[98].mxu1  ;;  %v4103_v4 = vmax.f32 %v4049_v53, 0.0 }
 0xcbd   : > { %v4210_v7 = vmul.f32 %v4137_v37, %v4098_v20  ;;  %v4034_v8 = vadd.f32 %v5814_v28, %v3890_v33  ;;  %v4028_v19 = vpop.f32.mrb[99].mxu0  ;;  %v4058_v30 = vpop.f32.mrb[99].mxu1  ;;  %v4064_v9 = vadd.f32 %v5823_v34, %v3920_v35  ;;  %v4216_v59 = vmul.f32 %v4167_v56, %v4104_v40 }
 0xcbe   : > { %v4209_v22 = vmul.f32 %v4132_v47, %v4097_v42  ;;  %v4029_v25 = vadd.f32 %v4028_v19, %v3885_v10  ;;  %v4059_v38 = vadd.f32 %v4058_v30, %v3915_v27  ;;  %v4187_v47 = vpop.permute.xlu1 %4186 }
 0xcbf   : > { %v4100_v2 = vmax.f32 %v4034_v8, 0.0  ;;  %v4106_v17 = vmax.f32 %v4064_v9, 0.0  ;;  %v3950_v8 = vpop.permute.xlu0 %3949 }
 0xcc0   : > { %v4225_v44 = vadd.f32 %v4210_v7, %v4209_v22  ;;  %v4099_v16 = vmax.f32 %v4029_v25, 0.0  ;;  %v5817_v51 = vpop.f32.mrb[100].mxu0  ;;  %v5826_v43 = vpop.f32.mrb[100].mxu1 }
 0xcc1   : > { %v4044_v60 = vadd.f32 %v5817_v51, %v3900_v13  ;;  %v4038_v23 = vpop.f32.mrb[101].mxu0  ;;  %v4068_v24 = vpop.f32.mrb[101].mxu1  ;;  %v4212_v54 = vmul.f32 %v4147_v52, %v4100_v2  ;;  %v4074_v3 = vadd.f32 %v5826_v43, %v3930_v12  ;;  %v4218_v35 = vmul.f32 %v4177_v50, %v4106_v17 }
 0xcc2   : > { %v4211_v49 = vmul.f32 %v4142_v15, %v4099_v16  ;;  %v4039_v36 = vadd.f32 %v4038_v23, %v3895_v48  ;;  %v4215_v48 = vmul.f32 %v4162_v18, %v4103_v4  ;;  %v4105_v15 = vmax.f32 %v4059_v38, 0.0  ;;  %v4192_v0 = vpop.permute.xlu1 %4191 }
 0xcc3   : > { %v4102_v31 = vmax.f32 %v4044_v60, 0.0  ;;  %v4069_v52 = vadd.f32 %v4068_v24, %v3925_v11  ;;  %v4202_v2 = vpop.permute.xlu0 %4201 }
 0xcc4   : > { %v4226_v5 = vadd.f32 %v4225_v44, %v4211_v49  ;;  %v4101_v46 = vmax.f32 %v4039_v36, 0.0  ;;  %v5829_v32 = vpop.f32.mrb[102].mxu1  ;;  %v4217_v27 = vmul.f32 %v4172_v61, %v4105_v15 }
 0xcc5   : > { %v4078_v6 = vpop.f32.mrb[103].mxu1  ;;  %v4214_v58 = vmul.f32 %v4157_v55, %v4102_v31  ;;  %v4108_v55 = vmax.f32 %v4074_v3, 0.0  ;;  %v4084_v42 = vadd.f32 %v5829_v32, %v3940_v41 }
 0xcc6   : > { %v4213_v57 = vmul.f32 %v4152_v14, %v4101_v46  ;;  %v4227_v39 = vadd.f32 %v4226_v5, %v4212_v54  ;;  %v4107_v14 = vmax.f32 %v4069_v52, 0.0  ;;  %v4079_v26 = vadd.f32 %v4078_v6, %v3935_v1  ;;  %v4197_v30 = vpop.permute.xlu1 %4196 }
 0xcc7   : > { %v4220_v11 = vmul.f32 %v4187_v47, %v4108_v55  ;;  %v4110_v19 = vmax.f32 %v4084_v42, 0.0  ;;  %v4247_v54 = vstv %s4246_s23 }
 0xcc8   : > { %v4228_v10 = vadd.f32 %v4227_v39, %v4213_v57  ;;  %v5832_v33 = vpop.f32.mrb[104].mxu1  ;;  %v4219_v28 = vmul.f32 %v4182_v29, %v4107_v14  ;;  %v4109_v18 = vmax.f32 %v4079_v26, 0.0 }
 0xcc9   : > { %v4088_v37 = vpop.f32.mrb[105].mxu1  ;;  %v4094_v12 = vadd.f32 %v5832_v33, %v3950_v8  ;;  %v4222_v1 = vmul.f32 %v4197_v30, %v4110_v19 }
 0xcca   : > { %v4229_v13 = vadd.f32 %v4228_v10, %v4214_v58  ;;  %v4089_v7 = vadd.f32 %v4088_v37, %v3945_v21  ;;  %v4221_v22 = vmul.f32 %v4192_v0, %v4109_v18  ;;  %v4207_v43 = vpop.permute.xlu1 %4206 }
 0xccb   : > { %v4112_v50 = vmax.f32 %v4094_v12, 0.0 }
 0xccc   : > { %v4230_v62 = vadd.f32 %v4229_v13, %v4215_v48  ;;  %v4111_v25 = vmax.f32 %v4089_v7, 0.0 }
 0xccd   : > { %v4224_v60 = vmul.f32 %v4207_v43, %v4112_v50 }
 0xcce   : > { %v4231_v63 = vadd.f32 %v4230_v62, %v4216_v59  ;;  %v4223_v16 = vmul.f32 %v4202_v2, %v4111_v25 }
 0xcd0   : > { %v4232_v20 = vadd.f32 %v4231_v63, %v4217_v27 }
 0xcd2   : > { %v4233_v34 = vadd.f32 %v4232_v20, %v4218_v35 }
 0xcd4   : > { %v4234_v56 = vadd.f32 %v4233_v34, %v4219_v28 }
 0xcd6   : > { %v4235_v61 = vadd.f32 %v4234_v56, %v4220_v11 }
 0xcd8   : > { %v4236_v44 = vadd.f32 %v4235_v61, %v4221_v22 }
 0xcda   : > { %v4237_v51 = vadd.f32 %v4236_v44, %v4222_v1 }
 0xcdc   : > { %v4238_v23 = vadd.f32 %v4237_v51, %v4223_v16 }
 0xcde   : > { %v4239_v24 = vadd.f32 %v4238_v23, %v4224_v60 }
 0xce0   : > { %v4240_v53 = vrot.slane %v4239_v24, 4 }
 0xce2   : > { %v4241_v49 = vadd.f32 %v4240_v53, %v4239_v24 }
 0xce4   : > { %v4242_v36 = vrot.slane %v4241_v49, 2 }
 0xce6   : > { %v4243_v29 = vadd.f32 %v4242_v36, %v4241_v49 }
 0xce8   : > { %v4244_v45 = vrot.slane %v4243_v29, 1 }
 0xcea   : > { %v4245_v5 = vadd.f32 %v4244_v45, %v4243_v29 }
 0xcec   : > { %v4248_v31 = vadd.f32 %v4247_v54, %v4245_v5 }
 0xcee   : > { %4249 = vst [vmem:[%s296_s26] sm:$0x1] %v4248_v31 }
 0xcef   : > { %6304 = shalt.err (!%p6301_p3)
}
 0xcf0   : > { %s6305_s21 = scalar_lea.hbm %s8217_s13, 16  ;;  %s6309_s25 = scalar_lea.hbm %s8267_s8, 48 }
 0xcf1   : > { %p6306_p4 = scmp.ne.s32.totalorder %s8217_s13, %s6305_s21  ;;  %p6310_p9 = scmp.lt.u32.totalorder %s8217_s13, %s8267_s8 }
 0xcf2   : > { %p6311_p10 = scmp.lt.u32.totalorder %s6309_s25, %s6305_s21  ;;  %p6313_p12 = scmp.lt.u32.totalorder %s6305_s21, %s8217_s13 }
 0xcf3   : > { %p6307_p7 = pnand %p6306_p4, %p6443_p5 }
 0xcf4   : > { %p6312_p11 = por %p6311_p10, %p6310_p9 }
 0xcf5   : > { %p6308_p8 = pneg %p6307_p7 }
 0xcf6   : > { %p6314_p13 = por %p6313_p12, %p6312_p11 }
 0xcf8   : > { %p6315_p0 = pnand %p6314_p13, %p6308_p8 }
 0xcfa   : > { %6318 = shalt.err (!%p6315_p0)
}
 0xcfb   : > { %6249 = dma.vmem_to_hbm [thread:$0]  (%p6443_p5), %s8219_s27, 16, %s8217_s13, %s4251_s14  }
 0xcfc PF: > { %p6255_p1 = scmp.ge.s32.totalorder %s6353_s10, 2  ;;  %s4275_s28 = sand.u32 1, %s6341_s29  }
 0xcfd   : > { %s4276_s11 = scalar_lea.sflag [#allocation4], %s4275_s28 }
 0xcfe   : > { %p6252_p2 = pnand %p6255_p1, %p6447_p6 }
 0xd00   : > { %6336 = dma.done.wait (!%p6252_p2), %s4276_s11, 16  }
 0xd01   : > { %6338 = vsyncadd (!%p6252_p2), %s4276_s11, 4294967280  ;;  %p19_p3 = scmp.ge.s32.totalorder %s6430_s12, 5   ;;  %s8394_s29 = smov %s6345_s30 }
 0xd02   : > { %s8395_s30 = smov %s6349_s9  ;;  %s8396_s9 = smov %s6441_s15 }
 0xd03   : > { %s8397_s10 = smov %s6430_s12  ;;  %21 = sbr.rel (!%p19_p3) target bundleno = 5 (0x5), region = 108 }
 0xd0a   :  { %4280 = vsyncpa [#allocation4], 1 }
 0xd0b   :  { %4282 = vsyncpa [#allocation4 + $0x1], 1 }

</bundles_post_ra>
